<compile_context>
chip_gen: v6e
topology: v6e:2x2x1
jax: 0.10.0
libtpu: 0.0.40
codegen_flags: <defaults>
</compile_context>

<pallas_src>
import functools

import jax
import jax.numpy as jnp
from jax import lax
from jax.experimental import pallas as pl
from jax.experimental.pallas import tpu as pltpu

EPS = float(jnp.finfo(jnp.float32).eps)   # torch.nn.RMSNorm(eps=None) on float32


# ----------------------------- RMSNorm kernel -------------------------------
def _rmsnorm_kernel(x_ref, w_ref, o_ref):
    x = x_ref[0]                                          # [S, H]
    ms = jnp.mean(x * x, axis=-1, keepdims=True)
    o_ref[0] = x * lax.rsqrt(ms + EPS) * w_ref[...]


def rmsnorm(x, w):
    B, S, H = x.shape
    return pl.pallas_call(
        _rmsnorm_kernel,
        out_shape=jax.ShapeDtypeStruct((B, S, H), x.dtype),
        grid=(B,),
        in_specs=[pl.BlockSpec((1, S, H), lambda b: (b, 0, 0)),
                  pl.BlockSpec((1, H), lambda b: (0, 0))],
        out_specs=pl.BlockSpec((1, S, H), lambda b: (b, 0, 0)),
        compiler_params=pltpu.CompilerParams(dimension_semantics=("parallel",)),
    )(x, w.reshape(1, H))


# ------------------ fused RotaryCrossEncoderLayer kernel --------------------
def _layer_kernel(x_ref, ny_ref,
                  cq_ref, saq_ref, sbq_ref,
                  ck_ref, sak_ref, sbk_ref,
                  ln1_ref, wq_ref, wk_ref, wv_ref, wo_ref,
                  ln2_ref, w1a_ref, w1b_ref, w2_ref, lnf_ref,
                  o_ref, k_scr, v_scr, attn_scr, *, n_head, final_norm):
    f32 = jnp.float32
    bf16 = jnp.bfloat16
    H = x_ref.shape[-1]
    dh = H // n_head

    def rms(v, w):
        ms = jnp.mean(v * v, axis=-1, keepdims=True)
        return v * lax.rsqrt(ms + EPS) * w

    def rope(t, cos, sin_a, sin_b):
        # interleaved-pair rotation via XLU rolls; cross-pair / cross-head
        # pickups are always multiplied by a 0 entry of sin_a / sin_b.
        n = t.shape[-1]
        ax = t.ndim - 1
        t_nxt = pltpu.roll(t, shift=n - 1, axis=ax)       # t_nxt[j] = t[j+1]
        t_prv = pltpu.roll(t, shift=1, axis=ax)           # t_prv[j] = t[j-1]
        return t * cos + t_nxt * sin_a + t_prv * sin_b

    # --- K / V projection + RoPE(K): once per batch row, reused across q tiles
    @pl.when(pl.program_id(1) == 0)
    def _():
        ny = ny_ref[0].astype(bf16)                       # [Sk, H]
        k = jnp.dot(ny, wk_ref[...], preferred_element_type=f32)   # [Sk, H]
        v = jnp.dot(ny, wv_ref[...], preferred_element_type=f32)   # [Sk, H]
        k = rope(k, ck_ref[...], sak_ref[...], sbk_ref[...])
        k_scr[...] = k.astype(bf16)
        v_scr[...] = v.astype(bf16)

    x = x_ref[0]                                          # [tq, H] f32 residual

    # --- attention sub-block: x + out_proj(attn(RMSNorm(x), norm_y)) ---------
    nx = rms(x, ln1_ref[...]).astype(bf16)
    q = jnp.dot(nx, wq_ref[...], preferred_element_type=f32)        # [tq, H]
    q = rope(q, cq_ref[...], saq_ref[...], sbq_ref[...]).astype(bf16)

    # Per-head QK^T / softmax / PV; each head's result is stored into the
    # head-major attn scratch so live ranges stay bounded and the output
    # projection is a single full-width matmul.
    for h in range(n_head):
        lo, hi = h * dh, (h + 1) * dh
        qh = q[:, lo:hi]                                  # [tq, Dh] bf16
        kh = k_scr[:, lo:hi]                              # [Sk, Dh] bf16
        vh = v_scr[:, lo:hi]                              # [Sk, Dh] bf16
        # NOTE: reference forward never applies self.scale -> no scaling here.
        s = lax.dot_general(qh, kh, (((1,), (1,)), ((), ())),
                            preferred_element_type=f32)   # [tq, Sk] f32
        s = s - jnp.max(s, axis=-1, keepdims=True)
        p = jnp.exp(s)
        p = p * pl.reciprocal(jnp.sum(p, axis=-1, keepdims=True), approx=True)
        oh = jnp.dot(p.astype(bf16), vh, preferred_element_type=f32)
        attn_scr[:, lo:hi] = oh.astype(bf16)

    attn = jnp.dot(attn_scr[...], wo_ref[...], preferred_element_type=f32)
    x = x + attn                                          # dropout = identity (eval)

    # --- MLP sub-block: x + SwiGLU(RMSNorm(x)) -------------------------------
    nx = rms(x, ln2_ref[...]).astype(bf16)
    x1 = jnp.dot(nx, w1a_ref[...], preferred_element_type=f32)      # [tq, I]
    x3 = jnp.dot(nx, w1b_ref[...], preferred_element_type=f32)      # [tq, I]
    gated = (x1 * jax.nn.sigmoid(x1) * x3).astype(bf16)             # SiLU(x1)*x3
    x = x + jnp.dot(gated, w2_ref[...], preferred_element_type=f32)

    if final_norm:                                        # fused ln_final epilogue
        x = rms(x, lnf_ref[...])
    o_ref[0] = x


def _choose_q_tile(sq, target=256):
    if sq <= target:
        return sq
    for t in range(target, 7, -1):
        if sq % t == 0 and t % 8 == 0:
            return t
    return sq


def encoder_layer(x, norm_y, lw, rope_q, rope_k, ln_final, n_head, *,
                  final_norm=False, q_tile=256):
    B, Sq, H = x.shape
    Sk = norm_y.shape[1]
    Dh = H // n_head
    inter = lw['w2T'].shape[0]
    tq = _choose_q_tile(Sq, q_tile)
    n_qt = Sq // tq
    cq, saq, sbq = rope_q
    ck, sak, sbk = rope_k

    bf16 = jnp.bfloat16
    # glue: reorganize weight columns per head / per gate (pure reshapes),
    # matching torch's .view(B,S,n_head,*) head-major layout; cast to bf16
    # (halves HBM/VMEM traffic; matmuls accumulate in f32 on the MXU).
    wq = lw['wqT'].astype(bf16)                                     # [H, H]
    wkv4 = lw['wkvT'].reshape(H, n_head, 2, Dh)
    wk = wkv4[:, :, 0, :].reshape(H, H).astype(bf16)
    wv = wkv4[:, :, 1, :].reshape(H, H).astype(bf16)
    wo = lw['woT'].astype(bf16)                                     # [H, H]
    w1a = lw['w1T'][:, :inter].astype(bf16)
    w1b = lw['w1T'][:, inter:].astype(bf16)
    w2 = lw['w2T'].astype(bf16)

    # TODO(synk): single-buffer the grid-invariant weight blocks
    # (pipeline_mode=pl.Buffered(1)) and/or add an `inter` accumulation grid
    # axis to fit very large H on v7x's 64 MiB VMEM.
    kernel = functools.partial(_layer_kernel, n_head=n_head, final_norm=final_norm)
    return pl.pallas_call(
        kernel,
        out_shape=jax.ShapeDtypeStruct((B, Sq, H), x.dtype),
        grid=(B, n_qt),
        in_specs=[
            pl.BlockSpec((1, tq, H), lambda b, qt: (b, qt, 0)),     # x tile
            pl.BlockSpec((1, Sk, H), lambda b, qt: (b, 0, 0)),      # norm_y
            pl.BlockSpec((tq, H), lambda b, qt: (qt, 0)),           # cos_q
            pl.BlockSpec((tq, H), lambda b, qt: (qt, 0)),           # sin_a_q
            pl.BlockSpec((tq, H), lambda b, qt: (qt, 0)),           # sin_b_q
            pl.BlockSpec((Sk, H), lambda b, qt: (0, 0)),            # cos_k
            pl.BlockSpec((Sk, H), lambda b, qt: (0, 0)),            # sin_a_k
            pl.BlockSpec((Sk, H), lambda b, qt: (0, 0)),            # sin_b_k
            pl.BlockSpec((1, H), lambda b, qt: (0, 0)),             # ln1
            pl.BlockSpec((H, H), lambda b, qt: (0, 0)),             # wq
            pl.BlockSpec((H, H), lambda b, qt: (0, 0)),             # wk
            pl.BlockSpec((H, H), lambda b, qt: (0, 0)),             # wv
            pl.BlockSpec((H, H), lambda b, qt: (0, 0)),             # wo
            pl.BlockSpec((1, H), lambda b, qt: (0, 0)),             # ln2
            pl.BlockSpec((H, inter), lambda b, qt: (0, 0)),         # w1 (gate)
            pl.BlockSpec((H, inter), lambda b, qt: (0, 0)),         # w1 (lin)
            pl.BlockSpec((inter, H), lambda b, qt: (0, 0)),         # w2
            pl.BlockSpec((1, H), lambda b, qt: (0, 0)),             # ln_final
        ],
        out_specs=pl.BlockSpec((1, tq, H), lambda b, qt: (b, qt, 0)),
        scratch_shapes=[pltpu.VMEM((Sk, H), jnp.bfloat16),          # K (rotated)
                        pltpu.VMEM((Sk, H), jnp.bfloat16),          # V
                        pltpu.VMEM((tq, H), jnp.bfloat16)],         # per-head attn out
        compiler_params=pltpu.CompilerParams(
            dimension_semantics=("parallel", "arbitrary"),
            vmem_limit_bytes=48 * 1024 * 1024),
    )(x, norm_y, cq, saq, sbq, ck, sak, sbk,
      lw['ln1'].reshape(1, H), wq, wk, wv, wo,
      lw['ln2'].reshape(1, H), w1a, w1b, w2, ln_final.reshape(1, H))


# ------------------------------ glue helpers --------------------------------
def rope_tables(seq_len, head_dim, n_head):
    """cos / signed-sin tables tiled across heads for the roll-based RoPE."""
    pos = jnp.arange(seq_len, dtype=jnp.float32)[:, None]
    ids = jnp.arange(head_dim // 2, dtype=jnp.float32)
    theta = 10000.0 ** (2.0 * ids / head_dim)
    ang = pos / theta                                     # [S, Dh/2]
    cos = jnp.repeat(jnp.cos(ang), 2, axis=-1)            # repeat_interleave(2)
    sin = jnp.repeat(jnp.sin(ang), 2, axis=-1)
    even = (jnp.arange(head_dim) % 2) == 0
    sin_a = jnp.where(even, -sin, 0.0)    # multiplies roll-left  (t[j+1]) at even lanes
    sin_b = jnp.where(even, 0.0, sin)     # multiplies roll-right (t[j-1]) at odd lanes
    tile = lambda t: jnp.tile(t, (1, n_head))             # [S, n_head*Dh]
    return tile(cos), tile(sin_a), tile(sin_b)


def waveform_spectrogram_cross_encoder(x, y, params, n_head):
    # Eval-mode forward.  The module's generated attention mask is all-ones and
    # only used when training, so it is a no-op here.
    # TODO(synk): training-mode dropout / mask==0 branch not implemented.
    # TODO(synk): ln_y could also be fused into the first layer's K/V path.
    B, Sq, H = x.shape
    Dh = H // n_head
    rope_q = rope_tables(Sq, Dh, n_head)
    rope_k = rope_tables(y.shape[1], Dh, n_head)
    norm_y = rmsnorm(y, params['ln_y'])
    layers = params['layers']
    if not layers:
        return rmsnorm(x, params['ln_final'])
    for i, lw in enumerate(layers):
        x = encoder_layer(x, norm_y, lw, rope_q, rope_k, params['ln_final'],
                          n_head, final_norm=(i == len(layers) - 1))
    return x


def init_params(key, n_layer, n_head, hidden):
    inter = hidden * 8 // 3
    k_lny, k_lnf, *lkeys = jax.random.split(key, 2 + n_layer)

    def norm_w(k):
        return 1.0 + 0.1 * jax.random.normal(k, (hidden,), jnp.float32)

    def lin_t(k, fan_in, fan_out):   # torch Linear weight [out,in], stored as W^T
        return jax.random.normal(k, (fan_in, fan_out), jnp.float32) / jnp.sqrt(fan_in)

    params = {'ln_y': norm_w(k_lny), 'ln_final': norm_w(k_lnf), 'layers': []}
    for lk in lkeys:
        ks = jax.random.split(lk, 7)
        params['layers'].append({
            'ln1': norm_w(ks[0]),
            'wqT': lin_t(ks[1], hidden, hidden),
            'wkvT': lin_t(ks[2], hidden, 2 * hidden),
            'woT': lin_t(ks[3], hidden, hidden),
            'ln2': norm_w(ks[4]),
            'w1T': lin_t(ks[5], hidden, 2 * inter),
            'w2T': lin_t(ks[6], inter, hidden),
        })
    return params


# --------------------- pure-JAX reference (mirrors PyTorch) -----------------
def _ref_rms(x, w):
    return x * lax.rsqrt(jnp.mean(x * x, -1, keepdims=True) + EPS) * w


def _ref_rope(t):
    B, nh, S, Dh = t.shape
    pos = jnp.arange(S, dtype=jnp.float32)[:, None]
    ids = jnp.arange(Dh // 2, dtype=jnp.float32)
    theta = 10000.0 ** (2.0 * ids / Dh)
    emb = pos / theta
    emb = jnp.stack([jnp.sin(emb), jnp.cos(emb)], axis=-1).reshape(S, Dh)
    sin_p = jnp.repeat(emb[..., 0::2], 2, axis=-1)
    cos_p = jnp.repeat(emb[..., 1::2], 2, axis=-1)
    t_sin = jnp.stack([-t[..., 1::2], t[..., 0::2]], axis=-1).reshape(t.shape)
    return t * cos_p + t_sin * sin_p


def _ref_attn(x, ny, wqT, wkvT, woT, n_head):
    B, Sq, H = x.shape
    Sk = ny.shape[1]
    Dh = H // n_head
    q = (x @ wqT).reshape(B, Sq, n_head, Dh).transpose(0, 2, 1, 3)
    kv = (ny @ wkvT).reshape(B, Sk, n_head, 2 * Dh).transpose(0, 2, 1, 3)
    k, v = kv[..., :Dh], kv[..., Dh:]
    q = _ref_rope(q)
    k = _ref_rope(k)
    s = jnp.einsum('bhqd,bhkd->bhqk', q, k)
    p = jax.nn.softmax(s, axis=-1)
    o = jnp.einsum('bhqk,bhkd->bhqd', p, v).transpose(0, 2, 1, 3).reshape(B, Sq, H)
    return o @ woT


def ref_forward(x, y, params, n_head):
    ny = _ref_rms(y, params['ln_y'])
    for p in params['layers']:
        nx = _ref_rms(x, p['ln1'])
        x = x + _ref_attn(nx, ny, p['wqT'], p['wkvT'], p['woT'], n_head)
        nx = _ref_rms(x, p['ln2'])
        h = nx @ p['w1T']
        inter = p['w2T'].shape[0]
        x1, x3 = h[..., :inter], h[..., inter:]
        x = x + (jax.nn.silu(x1) * x3) @ p['w2T']
    return _ref_rms(x, params['ln_final'])


# ---------------------------------- main ------------------------------------
if __name__ == "__main__":
    # Small but lane-dense config: H = 128 (one full vreg lane width).
    B, Sq, Sk = 2, 8, 16          # batch, waveform (query) seq, spectrogram (kv) seq
    H, n_head, n_layer = 128, 4, 2
    key = jax.random.PRNGKey(0)
    kx, ky, kp = jax.random.split(key, 3)
    x = jax.random.normal(kx, (B, Sq, H), jnp.float32)
    y = jax.random.normal(ky, (B, Sk, H), jnp.float32)
    params = init_params(kp, n_layer, n_head, H)

    fwd = jax.jit(waveform_spectrogram_cross_encoder, static_argnums=3)
    out = jax.block_until_ready(fwd(x, y, params, n_head))

    ref = ref_forward(x, y, params, n_head)
    abs_err = float(jnp.max(jnp.abs(out - ref)))
    rel_err = float(jnp.linalg.norm(out - ref) / jnp.linalg.norm(ref))
    assert out.shape == (B, Sq, H)
    assert bool(jnp.all(jnp.isfinite(out)))
    # bf16 MXU operands (f32 accumulation) vs pure-f32 XLA reference
    assert rel_err < 3e-2, f"relative mismatch vs reference: {rel_err}"
    assert abs_err < 0.25, f"abs mismatch vs reference: {abs_err}"
    print("KERNEL_OK")
</pallas_src>

<mosaic_0001>
module attributes {stable_mosaic.version = 11 : i64} {
  func.func @_rmsnorm_kernel(%arg0: i32, %arg1: memref<1x16x128xf32, #tpu.memory_space<vmem>>, %arg2: memref<1x128xf32, #tpu.memory_space<vmem>>, %arg3: memref<1x16x128xf32, #tpu.memory_space<vmem>>) attributes {dimension_semantics = [#tpu.dimension_semantics<parallel>], iteration_bounds = array<i64: 2>, scalar_prefetch = 0 : i64, scratch_operands = 0 : i64, tpu.core_type = #tpu.core_type<tc>, window_params = [{transform_indices = @transform_0, window_bounds = array<i64: 1, 16, 128>}, {pipeline_mode = #tpu.pipeline_mode<synchronous>, transform_indices = @transform_1, window_bounds = array<i64: 1, 128>}, {transform_indices = @transform_2, window_bounds = array<i64: 1, 16, 128>}]} {
    %c0 = arith.constant 0 : index
    %c0_0 = arith.constant 0 : index
    %c0_1 = arith.constant 0 : index
    %0 = vector.load %arg1[%c0, %c0_0, %c0_1] : memref<1x16x128xf32, #tpu.memory_space<vmem>>, vector<1x16x128xf32>
    %1 = vector.shape_cast %0 : vector<1x16x128xf32> to vector<16x128xf32>
    %2 = arith.mulf %1, %1 : vector<16x128xf32>
    %cst = arith.constant dense<0.000000e+00> : vector<16xf32>
    %3 = vector.multi_reduction <add>, %2, %cst [1] : vector<16x128xf32> to vector<16xf32>
    %4 = vector.shape_cast %3 : vector<16xf32> to vector<16x1xf32>
    %cst_2 = arith.constant 1.280000e+02 : f32
    %5 = vector.broadcast %cst_2 : f32 to vector<16x1xf32>
    %6 = arith.divf %4, %5 : vector<16x1xf32>
    %cst_3 = arith.constant 1.1920929E-7 : f32
    %7 = vector.broadcast %cst_3 : f32 to vector<16x1xf32>
    %8 = arith.addf %6, %7 : vector<16x1xf32>
    %9 = math.rsqrt %8 : vector<16x1xf32>
    %10 = vector.broadcast %9 : vector<16x1xf32> to vector<16x128xf32>
    %11 = arith.mulf %1, %10 : vector<16x128xf32>
    %c0_4 = arith.constant 0 : index
    %c0_5 = arith.constant 0 : index
    %12 = vector.load %arg2[%c0_4, %c0_5] : memref<1x128xf32, #tpu.memory_space<vmem>>, vector<1x128xf32>
    %13 = vector.broadcast %12 : vector<1x128xf32> to vector<16x128xf32>
    %14 = arith.mulf %11, %13 : vector<16x128xf32>
    %c0_6 = arith.constant 0 : index
    %c0_7 = arith.constant 0 : index
    %c0_8 = arith.constant 0 : index
    %15 = vector.load %arg3[%c0_6, %c0_7, %c0_8] : memref<1x16x128xf32, #tpu.memory_space<vmem>>, vector<1x16x128xf32>
    %16 = vector.shape_cast %15 : vector<1x16x128xf32> to vector<16x128xf32>
    %17 = vector.shape_cast %14 : vector<16x128xf32> to vector<1x16x128xf32>
    tpu.vector_store %arg3[%c0_6, %c0_7, %c0_8], %17 {strides = array<i32>} : memref<1x16x128xf32, #tpu.memory_space<vmem>>, vector<1x16x128xf32>,
    return
  }
  func.func @transform_0(%arg0: i32) -> (i32, i32, i32) {
    %c0_i32 = arith.constant 0 : i32
    %c0_i32_0 = arith.constant 0 : i32
    %c0_i32_1 = arith.constant 0 : i32
    return %arg0, %c0_i32, %c0_i32_0 : i32, i32, i32
  }
  func.func @transform_1(%arg0: i32) -> (i32, i32) {
    %c0_i32 = arith.constant 0 : i32
    %c0_i32_0 = arith.constant 0 : i32
    %c0_i32_1 = arith.constant 0 : i32
    return %c0_i32, %c0_i32_0 : i32, i32
  }
  func.func @transform_2(%arg0: i32) -> (i32, i32, i32) {
    %c0_i32 = arith.constant 0 : i32
    %c0_i32_0 = arith.constant 0 : i32
    %c0_i32_1 = arith.constant 0 : i32
    return %arg0, %c0_i32, %c0_i32_0 : i32, i32, i32
  }
}

module attributes {stable_mosaic.version = 11 : i64} {
  func.func @_layer_kernel(%arg0: i32, %arg1: i32, %arg2: memref<1x8x128xf32, #tpu.memory_space<vmem>>, %arg3: memref<1x16x128xf32, #tpu.memory_space<vmem>>, %arg4: memref<8x128xf32, #tpu.memory_space<vmem>>, %arg5: memref<8x128xf32, #tpu.memory_space<vmem>>, %arg6: memref<8x128xf32, #tpu.memory_space<vmem>>, %arg7: memref<16x128xf32, #tpu.memory_space<vmem>>, %arg8: memref<16x128xf32, #tpu.memory_space<vmem>>, %arg9: memref<16x128xf32, #tpu.memory_space<vmem>>, %arg10: memref<1x128xf32, #tpu.memory_space<vmem>>, %arg11: memref<128x128xbf16, #tpu.memory_space<vmem>>, %arg12: memref<128x128xbf16, #tpu.memory_space<vmem>>, %arg13: memref<128x128xbf16, #tpu.memory_space<vmem>>, %arg14: memref<128x128xbf16, #tpu.memory_space<vmem>>, %arg15: memref<1x128xf32, #tpu.memory_space<vmem>>, %arg16: memref<128x341xbf16, #tpu.memory_space<vmem>>, %arg17: memref<128x341xbf16, #tpu.memory_space<vmem>>, %arg18: memref<341x128xbf16, #tpu.memory_space<vmem>>, %arg19: memref<1x128xf32, #tpu.memory_space<vmem>>, %arg20: memref<1x8x128xf32, #tpu.memory_space<vmem>>, %arg21: memref<16x128xbf16, #tpu.memory_space<vmem>>, %arg22: memref<16x128xbf16, #tpu.memory_space<vmem>>, %arg23: memref<8x128xbf16, #tpu.memory_space<vmem>>) attributes {dimension_semantics = [#tpu.dimension_semantics<parallel>, #tpu.dimension_semantics<arbitrary>], iteration_bounds = array<i64: 2, 1>, scalar_prefetch = 0 : i64, scratch_operands = 3 : i64, tpu.core_type = #tpu.core_type<tc>, window_params = [{transform_indices = @transform_0, window_bounds = array<i64: 1, 8, 128>}, {transform_indices = @transform_1, window_bounds = array<i64: 1, 16, 128>}, {transform_indices = @transform_2, window_bounds = array<i64: 8, 128>}, {transform_indices = @transform_3, window_bounds = array<i64: 8, 128>}, {transform_indices = @transform_4, window_bounds = array<i64: 8, 128>}, {pipeline_mode = #tpu.pipeline_mode<synchronous>, transform_indices = @transform_5, window_bounds = array<i64: 16, 128>}, {pipeline_mode = #tpu.pipeline_mode<synchronous>, transform_indices = @transform_6, window_bounds = array<i64: 16, 128>}, {pipeline_mode = #tpu.pipeline_mode<synchronous>, transform_indices = @transform_7, window_bounds = array<i64: 16, 128>}, {pipeline_mode = #tpu.pipeline_mode<synchronous>, transform_indices = @transform_8, window_bounds = array<i64: 1, 128>}, {pipeline_mode = #tpu.pipeline_mode<synchronous>, transform_indices = @transform_9, window_bounds = array<i64: 128, 128>}, {pipeline_mode = #tpu.pipeline_mode<synchronous>, transform_indices = @transform_10, window_bounds = array<i64: 128, 128>}, {pipeline_mode = #tpu.pipeline_mode<synchronous>, transform_indices = @transform_11, window_bounds = array<i64: 128, 128>}, {pipeline_mode = #tpu.pipeline_mode<synchronous>, transform_indices = @transform_12, window_bounds = array<i64: 128, 128>}, {pipeline_mode = #tpu.pipeline_mode<synchronous>, transform_indices = @transform_13, window_bounds = array<i64: 1, 128>}, {pipeline_mode = #tpu.pipeline_mode<synchronous>, transform_indices = @transform_14, window_bounds = array<i64: 128, 341>}, {pipeline_mode = #tpu.pipeline_mode<synchronous>, transform_indices = @transform_15, window_bounds = array<i64: 128, 341>}, {pipeline_mode = #tpu.pipeline_mode<synchronous>, transform_indices = @transform_16, window_bounds = array<i64: 341, 128>}, {pipeline_mode = #tpu.pipeline_mode<synchronous>, transform_indices = @transform_17, window_bounds = array<i64: 1, 128>}, {transform_indices = @transform_18, window_bounds = array<i64: 1, 8, 128>}]} {
    %c0_i32 = arith.constant 0 : i32
    %0 = arith.cmpi eq, %arg1, %c0_i32 : i32
    %1 = arith.extui %0 : i1 to i32
    %c0_i32_0 = arith.constant 0 : i32
    %2 = arith.cmpi ne, %1, %c0_i32_0 : i32
    scf.if %2 {
      %c0_76 = arith.constant 0 : index
      %c0_77 = arith.constant 0 : index
      %c0_78 = arith.constant 0 : index
      %140 = vector.load %arg3[%c0_76, %c0_77, %c0_78] : memref<1x16x128xf32, #tpu.memory_space<vmem>>, vector<1x16x128xf32>
      %141 = vector.shape_cast %140 : vector<1x16x128xf32> to vector<16x128xf32>
      %142 = arith.truncf %141 : vector<16x128xf32> to vector<16x128xbf16>
      %c0_79 = arith.constant 0 : index
      %c0_80 = arith.constant 0 : index
      %143 = vector.load %arg12[%c0_79, %c0_80] : memref<128x128xbf16, #tpu.memory_space<vmem>>, vector<128x128xbf16>
      %cst_81 = arith.constant dense<0.000000e+00> : vector<16x128xf32>
      %144 = tpu.matmul %142, %143, %cst_81 {dimension_numbers = #tpu.dot_dimension_numbers<[1], [0], [0], [1], [0, 0, 1, 1], [], []>} : vector<16x128xbf16>, vector<128x128xbf16>, vector<16x128xf32> -> vector<16x128xf32>
      %c0_82 = arith.constant 0 : index
      %c0_83 = arith.constant 0 : index
      %145 = vector.load %arg13[%c0_82, %c0_83] : memref<128x128xbf16, #tpu.memory_space<vmem>>, vector<128x128xbf16>
      %cst_84 = arith.constant dense<0.000000e+00> : vector<16x128xf32>
      %146 = tpu.matmul %142, %145, %cst_84 {dimension_numbers = #tpu.dot_dimension_numbers<[1], [0], [0], [1], [0, 0, 1, 1], [], []>} : vector<16x128xbf16>, vector<128x128xbf16>, vector<16x128xf32> -> vector<16x128xf32>
      %c0_85 = arith.constant 0 : index
      %c0_86 = arith.constant 0 : index
      %147 = vector.load %arg7[%c0_85, %c0_86] : memref<16x128xf32, #tpu.memory_space<vmem>>, vector<16x128xf32>
      %c0_87 = arith.constant 0 : index
      %c0_88 = arith.constant 0 : index
      %148 = vector.load %arg8[%c0_87, %c0_88] : memref<16x128xf32, #tpu.memory_space<vmem>>, vector<16x128xf32>
      %c0_89 = arith.constant 0 : index
      %c0_90 = arith.constant 0 : index
      %149 = vector.load %arg9[%c0_89, %c0_90] : memref<16x128xf32, #tpu.memory_space<vmem>>, vector<16x128xf32>
      %c127_i32_91 = arith.constant 127 : i32
      %150 = tpu.dynamic_rotate %144 by %c127_i32_91 dim 1 : vector<16x128xf32>, i32 -> vector<16x128xf32>
      %c1_i32_92 = arith.constant 1 : i32
      %151 = tpu.dynamic_rotate %144 by %c1_i32_92 dim 1 : vector<16x128xf32>, i32 -> vector<16x128xf32>
      %152 = arith.mulf %144, %147 : vector<16x128xf32>
      %153 = arith.mulf %150, %148 : vector<16x128xf32>
      %154 = arith.addf %152, %153 : vector<16x128xf32>
      %155 = arith.mulf %151, %149 : vector<16x128xf32>
      %156 = arith.addf %154, %155 : vector<16x128xf32>
      %157 = arith.truncf %156 : vector<16x128xf32> to vector<16x128xbf16>
      %c0_93 = arith.constant 0 : index
      %c0_94 = arith.constant 0 : index
      %158 = vector.load %arg21[%c0_93, %c0_94] : memref<16x128xbf16, #tpu.memory_space<vmem>>, vector<16x128xbf16>
      tpu.vector_store %arg21[%c0_93, %c0_94], %157 {strides = array<i32>} : memref<16x128xbf16, #tpu.memory_space<vmem>>, vector<16x128xbf16>,
      %159 = arith.truncf %146 : vector<16x128xf32> to vector<16x128xbf16>
      %c0_95 = arith.constant 0 : index
      %c0_96 = arith.constant 0 : index
      %160 = vector.load %arg22[%c0_95, %c0_96] : memref<16x128xbf16, #tpu.memory_space<vmem>>, vector<16x128xbf16>
      tpu.vector_store %arg22[%c0_95, %c0_96], %159 {strides = array<i32>} : memref<16x128xbf16, #tpu.memory_space<vmem>>, vector<16x128xbf16>,
    } else {
    }
    %c0 = arith.constant 0 : index
    %c0_1 = arith.constant 0 : index
    %c0_2 = arith.constant 0 : index
    %3 = vector.load %arg2[%c0, %c0_1, %c0_2] : memref<1x8x128xf32, #tpu.memory_space<vmem>>, vector<1x8x128xf32>
    %4 = vector.shape_cast %3 : vector<1x8x128xf32> to vector<8x128xf32>
    %c0_3 = arith.constant 0 : index
    %c0_4 = arith.constant 0 : index
    %5 = vector.load %arg10[%c0_3, %c0_4] : memref<1x128xf32, #tpu.memory_space<vmem>>, vector<1x128xf32>
    %6 = arith.mulf %4, %4 : vector<8x128xf32>
    %cst = arith.constant dense<0.000000e+00> : vector<8xf32>
    %7 = vector.multi_reduction <add>, %6, %cst [1] : vector<8x128xf32> to vector<8xf32>
    %8 = vector.shape_cast %7 : vector<8xf32> to vector<8x1xf32>
    %cst_5 = arith.constant 1.280000e+02 : f32
    %9 = vector.broadcast %cst_5 : f32 to vector<8x1xf32>
    %10 = arith.divf %8, %9 : vector<8x1xf32>
    %cst_6 = arith.constant 1.1920929E-7 : f32
    %11 = vector.broadcast %cst_6 : f32 to vector<8x1xf32>
    %12 = arith.addf %10, %11 : vector<8x1xf32>
    %13 = math.rsqrt %12 : vector<8x1xf32>
    %14 = vector.broadcast %13 : vector<8x1xf32> to vector<8x128xf32>
    %15 = arith.mulf %4, %14 : vector<8x128xf32>
    %16 = vector.broadcast %5 : vector<1x128xf32> to vector<8x128xf32>
    %17 = arith.mulf %15, %16 : vector<8x128xf32>
    %18 = arith.truncf %17 : vector<8x128xf32> to vector<8x128xbf16>
    %c0_7 = arith.constant 0 : index
    %c0_8 = arith.constant 0 : index
    %19 = vector.load %arg11[%c0_7, %c0_8] : memref<128x128xbf16, #tpu.memory_space<vmem>>, vector<128x128xbf16>
    %cst_9 = arith.constant dense<0.000000e+00> : vector<8x128xf32>
    %20 = tpu.matmul %18, %19, %cst_9 {dimension_numbers = #tpu.dot_dimension_numbers<[1], [0], [0], [1], [0, 0, 1, 1], [], []>} : vector<8x128xbf16>, vector<128x128xbf16>, vector<8x128xf32> -> vector<8x128xf32>
    %c0_10 = arith.constant 0 : index
    %c0_11 = arith.constant 0 : index
    %21 = vector.load %arg4[%c0_10, %c0_11] : memref<8x128xf32, #tpu.memory_space<vmem>>, vector<8x128xf32>
    %c0_12 = arith.constant 0 : index
    %c0_13 = arith.constant 0 : index
    %22 = vector.load %arg5[%c0_12, %c0_13] : memref<8x128xf32, #tpu.memory_space<vmem>>, vector<8x128xf32>
    %c0_14 = arith.constant 0 : index
    %c0_15 = arith.constant 0 : index
    %23 = vector.load %arg6[%c0_14, %c0_15] : memref<8x128xf32, #tpu.memory_space<vmem>>, vector<8x128xf32>
    %c127_i32 = arith.constant 127 : i32
    %24 = tpu.dynamic_rotate %20 by %c127_i32 dim 1 : vector<8x128xf32>, i32 -> vector<8x128xf32>
    %c1_i32 = arith.constant 1 : i32
    %25 = tpu.dynamic_rotate %20 by %c1_i32 dim 1 : vector<8x128xf32>, i32 -> vector<8x128xf32>
    %26 = arith.mulf %20, %21 : vector<8x128xf32>
    %27 = arith.mulf %24, %22 : vector<8x128xf32>
    %28 = arith.addf %26, %27 : vector<8x128xf32>
    %29 = arith.mulf %25, %23 : vector<8x128xf32>
    %30 = arith.addf %28, %29 : vector<8x128xf32>
    %31 = arith.truncf %30 : vector<8x128xf32> to vector<8x128xbf16>
    %32 = vector.extract_strided_slice %31 {offsets = [0, 0], sizes = [8, 32], strides = [1, 1]} : vector<8x128xbf16> to vector<8x32xbf16>
    %c0_16 = arith.constant 0 : index
    %c0_17 = arith.constant 0 : index
    %33 = vector.load %arg21[%c0_16, %c0_17] : memref<16x128xbf16, #tpu.memory_space<vmem>>, vector<16x32xbf16>
    %c0_18 = arith.constant 0 : index
    %c0_19 = arith.constant 0 : index
    %34 = vector.load %arg22[%c0_18, %c0_19] : memref<16x128xbf16, #tpu.memory_space<vmem>>, vector<16x32xbf16>
    %cst_20 = arith.constant dense<0.000000e+00> : vector<8x16xf32>
    %35 = tpu.matmul %32, %33, %cst_20 {dimension_numbers = #tpu.dot_dimension_numbers<[1], [1], [0], [0], [0, 0, 1, 0], [], []>} : vector<8x32xbf16>, vector<16x32xbf16>, vector<8x16xf32> -> vector<8x16xf32>
    %cst_21 = arith.constant dense<0xFF800000> : vector<8xf32>
    %36 = vector.multi_reduction <maximumf>, %35, %cst_21 [1] : vector<8x16xf32> to vector<8xf32>
    %37 = vector.shape_cast %36 : vector<8xf32> to vector<8x1xf32>
    %38 = vector.broadcast %37 : vector<8x1xf32> to vector<8x16xf32>
    %39 = arith.subf %35, %38 : vector<8x16xf32>
    %40 = math.exp %39 : vector<8x16xf32>
    %cst_22 = arith.constant dense<0.000000e+00> : vector<8xf32>
    %41 = vector.multi_reduction <add>, %40, %cst_22 [1] : vector<8x16xf32> to vector<8xf32>
    %42 = vector.shape_cast %41 : vector<8xf32> to vector<8x1xf32>
    %43 = tpu.reciprocal %42 {approx = true} : vector<8x1xf32> -> vector<8x1xf32>
    %44 = vector.broadcast %43 : vector<8x1xf32> to vector<8x16xf32>
    %45 = arith.mulf %40, %44 : vector<8x16xf32>
    %46 = arith.truncf %45 : vector<8x16xf32> to vector<8x16xbf16>
    %cst_23 = arith.constant dense<0.000000e+00> : vector<8x32xf32>
    %47 = tpu.matmul %46, %34, %cst_23 {dimension_numbers = #tpu.dot_dimension_numbers<[1], [0], [0], [1], [0, 0, 1, 1], [], []>} : vector<8x16xbf16>, vector<16x32xbf16>, vector<8x32xf32> -> vector<8x32xf32>
    %48 = arith.truncf %47 : vector<8x32xf32> to vector<8x32xbf16>
    %c0_24 = arith.constant 0 : index
    %c0_25 = arith.constant 0 : index
    %49 = vector.load %arg23[%c0_24, %c0_25] : memref<8x128xbf16, #tpu.memory_space<vmem>>, vector<8x32xbf16>
    tpu.vector_store %arg23[%c0_24, %c0_25], %48 {strides = array<i32>} : memref<8x128xbf16, #tpu.memory_space<vmem>>, vector<8x32xbf16>,
    %50 = vector.extract_strided_slice %31 {offsets = [0, 32], sizes = [8, 32], strides = [1, 1]} : vector<8x128xbf16> to vector<8x32xbf16>
    %c0_26 = arith.constant 0 : index
    %c32 = arith.constant 32 : index
    %51 = vector.load %arg21[%c0_26, %c32] : memref<16x128xbf16, #tpu.memory_space<vmem>>, vector<16x32xbf16>
    %c0_27 = arith.constant 0 : index
    %c32_28 = arith.constant 32 : index
    %52 = vector.load %arg22[%c0_27, %c32_28] : memref<16x128xbf16, #tpu.memory_space<vmem>>, vector<16x32xbf16>
    %cst_29 = arith.constant dense<0.000000e+00> : vector<8x16xf32>
    %53 = tpu.matmul %50, %51, %cst_29 {dimension_numbers = #tpu.dot_dimension_numbers<[1], [1], [0], [0], [0, 0, 1, 0], [], []>} : vector<8x32xbf16>, vector<16x32xbf16>, vector<8x16xf32> -> vector<8x16xf32>
    %cst_30 = arith.constant dense<0xFF800000> : vector<8xf32>
    %54 = vector.multi_reduction <maximumf>, %53, %cst_30 [1] : vector<8x16xf32> to vector<8xf32>
    %55 = vector.shape_cast %54 : vector<8xf32> to vector<8x1xf32>
    %56 = vector.broadcast %55 : vector<8x1xf32> to vector<8x16xf32>
    %57 = arith.subf %53, %56 : vector<8x16xf32>
    %58 = math.exp %57 : vector<8x16xf32>
    %cst_31 = arith.constant dense<0.000000e+00> : vector<8xf32>
    %59 = vector.multi_reduction <add>, %58, %cst_31 [1] : vector<8x16xf32> to vector<8xf32>
    %60 = vector.shape_cast %59 : vector<8xf32> to vector<8x1xf32>
    %61 = tpu.reciprocal %60 {approx = true} : vector<8x1xf32> -> vector<8x1xf32>
    %62 = vector.broadcast %61 : vector<8x1xf32> to vector<8x16xf32>
    %63 = arith.mulf %58, %62 : vector<8x16xf32>
    %64 = arith.truncf %63 : vector<8x16xf32> to vector<8x16xbf16>
    %cst_32 = arith.constant dense<0.000000e+00> : vector<8x32xf32>
    %65 = tpu.matmul %64, %52, %cst_32 {dimension_numbers = #tpu.dot_dimension_numbers<[1], [0], [0], [1], [0, 0, 1, 1], [], []>} : vector<8x16xbf16>, vector<16x32xbf16>, vector<8x32xf32> -> vector<8x32xf32>
    %66 = arith.truncf %65 : vector<8x32xf32> to vector<8x32xbf16>
    %c0_33 = arith.constant 0 : index
    %c32_34 = arith.constant 32 : index
    %67 = vector.load %arg23[%c0_33, %c32_34] : memref<8x128xbf16, #tpu.memory_space<vmem>>, vector<8x32xbf16>
    tpu.vector_store %arg23[%c0_33, %c32_34], %66 {strides = array<i32>} : memref<8x128xbf16, #tpu.memory_space<vmem>>, vector<8x32xbf16>,
    %68 = vector.extract_strided_slice %31 {offsets = [0, 64], sizes = [8, 32], strides = [1, 1]} : vector<8x128xbf16> to vector<8x32xbf16>
    %c0_35 = arith.constant 0 : index
    %c64 = arith.constant 64 : index
    %69 = vector.load %arg21[%c0_35, %c64] : memref<16x128xbf16, #tpu.memory_space<vmem>>, vector<16x32xbf16>
    %c0_36 = arith.constant 0 : index
    %c64_37 = arith.constant 64 : index
    %70 = vector.load %arg22[%c0_36, %c64_37] : memref<16x128xbf16, #tpu.memory_space<vmem>>, vector<16x32xbf16>
    %cst_38 = arith.constant dense<0.000000e+00> : vector<8x16xf32>
    %71 = tpu.matmul %68, %69, %cst_38 {dimension_numbers = #tpu.dot_dimension_numbers<[1], [1], [0], [0], [0, 0, 1, 0], [], []>} : vector<8x32xbf16>, vector<16x32xbf16>, vector<8x16xf32> -> vector<8x16xf32>
    %cst_39 = arith.constant dense<0xFF800000> : vector<8xf32>
    %72 = vector.multi_reduction <maximumf>, %71, %cst_39 [1] : vector<8x16xf32> to vector<8xf32>
    %73 = vector.shape_cast %72 : vector<8xf32> to vector<8x1xf32>
    %74 = vector.broadcast %73 : vector<8x1xf32> to vector<8x16xf32>
    %75 = arith.subf %71, %74 : vector<8x16xf32>
    %76 = math.exp %75 : vector<8x16xf32>
    %cst_40 = arith.constant dense<0.000000e+00> : vector<8xf32>
    %77 = vector.multi_reduction <add>, %76, %cst_40 [1] : vector<8x16xf32> to vector<8xf32>
    %78 = vector.shape_cast %77 : vector<8xf32> to vector<8x1xf32>
    %79 = tpu.reciprocal %78 {approx = true} : vector<8x1xf32> -> vector<8x1xf32>
    %80 = vector.broadcast %79 : vector<8x1xf32> to vector<8x16xf32>
    %81 = arith.mulf %76, %80 : vector<8x16xf32>
    %82 = arith.truncf %81 : vector<8x16xf32> to vector<8x16xbf16>
    %cst_41 = arith.constant dense<0.000000e+00> : vector<8x32xf32>
    %83 = tpu.matmul %82, %70, %cst_41 {dimension_numbers = #tpu.dot_dimension_numbers<[1], [0], [0], [1], [0, 0, 1, 1], [], []>} : vector<8x16xbf16>, vector<16x32xbf16>, vector<8x32xf32> -> vector<8x32xf32>
    %84 = arith.truncf %83 : vector<8x32xf32> to vector<8x32xbf16>
    %c0_42 = arith.constant 0 : index
    %c64_43 = arith.constant 64 : index
    %85 = vector.load %arg23[%c0_42, %c64_43] : memref<8x128xbf16, #tpu.memory_space<vmem>>, vector<8x32xbf16>
    tpu.vector_store %arg23[%c0_42, %c64_43], %84 {strides = array<i32>} : memref<8x128xbf16, #tpu.memory_space<vmem>>, vector<8x32xbf16>,
    %86 = vector.extract_strided_slice %31 {offsets = [0, 96], sizes = [8, 32], strides = [1, 1]} : vector<8x128xbf16> to vector<8x32xbf16>
    %c0_44 = arith.constant 0 : index
    %c96 = arith.constant 96 : index
    %87 = vector.load %arg21[%c0_44, %c96] : memref<16x128xbf16, #tpu.memory_space<vmem>>, vector<16x32xbf16>
    %c0_45 = arith.constant 0 : index
    %c96_46 = arith.constant 96 : index
    %88 = vector.load %arg22[%c0_45, %c96_46] : memref<16x128xbf16, #tpu.memory_space<vmem>>, vector<16x32xbf16>
    %cst_47 = arith.constant dense<0.000000e+00> : vector<8x16xf32>
    %89 = tpu.matmul %86, %87, %cst_47 {dimension_numbers = #tpu.dot_dimension_numbers<[1], [1], [0], [0], [0, 0, 1, 0], [], []>} : vector<8x32xbf16>, vector<16x32xbf16>, vector<8x16xf32> -> vector<8x16xf32>
    %cst_48 = arith.constant dense<0xFF800000> : vector<8xf32>
    %90 = vector.multi_reduction <maximumf>, %89, %cst_48 [1] : vector<8x16xf32> to vector<8xf32>
    %91 = vector.shape_cast %90 : vector<8xf32> to vector<8x1xf32>
    %92 = vector.broadcast %91 : vector<8x1xf32> to vector<8x16xf32>
    %93 = arith.subf %89, %92 : vector<8x16xf32>
    %94 = math.exp %93 : vector<8x16xf32>
    %cst_49 = arith.constant dense<0.000000e+00> : vector<8xf32>
    %95 = vector.multi_reduction <add>, %94, %cst_49 [1] : vector<8x16xf32> to vector<8xf32>
    %96 = vector.shape_cast %95 : vector<8xf32> to vector<8x1xf32>
    %97 = tpu.reciprocal %96 {approx = true} : vector<8x1xf32> -> vector<8x1xf32>
    %98 = vector.broadcast %97 : vector<8x1xf32> to vector<8x16xf32>
    %99 = arith.mulf %94, %98 : vector<8x16xf32>
    %100 = arith.truncf %99 : vector<8x16xf32> to vector<8x16xbf16>
    %cst_50 = arith.constant dense<0.000000e+00> : vector<8x32xf32>
    %101 = tpu.matmul %100, %88, %cst_50 {dimension_numbers = #tpu.dot_dimension_numbers<[1], [0], [0], [1], [0, 0, 1, 1], [], []>} : vector<8x16xbf16>, vector<16x32xbf16>, vector<8x32xf32> -> vector<8x32xf32>
    %102 = arith.truncf %101 : vector<8x32xf32> to vector<8x32xbf16>
    %c0_51 = arith.constant 0 : index
    %c96_52 = arith.constant 96 : index
    %103 = vector.load %arg23[%c0_51, %c96_52] : memref<8x128xbf16, #tpu.memory_space<vmem>>, vector<8x32xbf16>
    tpu.vector_store %arg23[%c0_51, %c96_52], %102 {strides = array<i32>} : memref<8x128xbf16, #tpu.memory_space<vmem>>, vector<8x32xbf16>,
    %c0_53 = arith.constant 0 : index
    %c0_54 = arith.constant 0 : index
    %104 = vector.load %arg23[%c0_53, %c0_54] : memref<8x128xbf16, #tpu.memory_space<vmem>>, vector<8x128xbf16>
    %c0_55 = arith.constant 0 : index
    %c0_56 = arith.constant 0 : index
    %105 = vector.load %arg14[%c0_55, %c0_56] : memref<128x128xbf16, #tpu.memory_space<vmem>>, vector<128x128xbf16>
    %cst_57 = arith.constant dense<0.000000e+00> : vector<8x128xf32>
    %106 = tpu.matmul %104, %105, %cst_57 {dimension_numbers = #tpu.dot_dimension_numbers<[1], [0], [0], [1], [0, 0, 1, 1], [], []>} : vector<8x128xbf16>, vector<128x128xbf16>, vector<8x128xf32> -> vector<8x128xf32>
    %107 = arith.addf %4, %106 : vector<8x128xf32>
    %c0_58 = arith.constant 0 : index
    %c0_59 = arith.constant 0 : index
    %108 = vector.load %arg15[%c0_58, %c0_59] : memref<1x128xf32, #tpu.memory_space<vmem>>, vector<1x128xf32>
    %109 = arith.mulf %107, %107 : vector<8x128xf32>
    %cst_60 = arith.constant dense<0.000000e+00> : vector<8xf32>
    %110 = vector.multi_reduction <add>, %109, %cst_60 [1] : vector<8x128xf32> to vector<8xf32>
    %111 = vector.shape_cast %110 : vector<8xf32> to vector<8x1xf32>
    %cst_61 = arith.constant 1.280000e+02 : f32
    %112 = vector.broadcast %cst_61 : f32 to vector<8x1xf32>
    %113 = arith.divf %111, %112 : vector<8x1xf32>
    %cst_62 = arith.constant 1.1920929E-7 : f32
    %114 = vector.broadcast %cst_62 : f32 to vector<8x1xf32>
    %115 = arith.addf %113, %114 : vector<8x1xf32>
    %116 = math.rsqrt %115 : vector<8x1xf32>
    %117 = vector.broadcast %116 : vector<8x1xf32> to vector<8x128xf32>
    %118 = arith.mulf %107, %117 : vector<8x128xf32>
    %119 = vector.broadcast %108 : vector<1x128xf32> to vector<8x128xf32>
    %120 = arith.mulf %118, %119 : vector<8x128xf32>
    %121 = arith.truncf %120 : vector<8x128xf32> to vector<8x128xbf16>
    %c0_63 = arith.constant 0 : index
    %c0_64 = arith.constant 0 : index
    %122 = vector.load %arg16[%c0_63, %c0_64] : memref<128x341xbf16, #tpu.memory_space<vmem>>, vector<128x341xbf16>
    %cst_65 = arith.constant dense<0.000000e+00> : vector<8x341xf32>
    %123 = tpu.matmul %121, %122, %cst_65 {dimension_numbers = #tpu.dot_dimension_numbers<[1], [0], [0], [1], [0, 0, 1, 1], [], []>} : vector<8x128xbf16>, vector<128x341xbf16>, vector<8x341xf32> -> vector<8x341xf32>
    %c0_66 = arith.constant 0 : index
    %c0_67 = arith.constant 0 : index
    %124 = vector.load %arg17[%c0_66, %c0_67] : memref<128x341xbf16, #tpu.memory_space<vmem>>, vector<128x341xbf16>
    %cst_68 = arith.constant dense<0.000000e+00> : vector<8x341xf32>
    %125 = tpu.matmul %121, %124, %cst_68 {dimension_numbers = #tpu.dot_dimension_numbers<[1], [0], [0], [1], [0, 0, 1, 1], [], []>} : vector<8x128xbf16>, vector<128x341xbf16>, vector<8x341xf32> -> vector<8x341xf32>
    %126 = arith.negf %123 : vector<8x341xf32>
    %127 = math.exp %126 : vector<8x341xf32>
    %cst_69 = arith.constant 1.000000e+00 : f32
    %128 = vector.broadcast %cst_69 : f32 to vector<8x341xf32>
    %129 = arith.addf %128, %127 : vector<8x341xf32>
    %130 = arith.divf %128, %129 : vector<8x341xf32>
    %131 = arith.mulf %123, %130 : vector<8x341xf32>
    %132 = arith.mulf %131, %125 : vector<8x341xf32>
    %133 = arith.truncf %132 : vector<8x341xf32> to vector<8x341xbf16>
    %c0_70 = arith.constant 0 : index
    %c0_71 = arith.constant 0 : index
    %134 = vector.load %arg18[%c0_70, %c0_71] : memref<341x128xbf16, #tpu.memory_space<vmem>>, vector<341x128xbf16>
    %cst_72 = arith.constant dense<0.000000e+00> : vector<8x128xf32>
    %135 = tpu.matmul %133, %134, %cst_72 {dimension_numbers = #tpu.dot_dimension_numbers<[1], [0], [0], [1], [0, 0, 1, 1], [], []>} : vector<8x341xbf16>, vector<341x128xbf16>, vector<8x128xf32> -> vector<8x128xf32>
    %136 = arith.addf %107, %135 : vector<8x128xf32>
    %c0_73 = arith.constant 0 : index
    %c0_74 = arith.constant 0 : index
    %c0_75 = arith.constant 0 : index
    %137 = vector.load %arg20[%c0_73, %c0_74, %c0_75] : memref<1x8x128xf32, #tpu.memory_space<vmem>>, vector<1x8x128xf32>
    %138 = vector.shape_cast %137 : vector<1x8x128xf32> to vector<8x128xf32>
    %139 = vector.shape_cast %136 : vector<8x128xf32> to vector<1x8x128xf32>
    tpu.vector_store %arg20[%c0_73, %c0_74, %c0_75], %139 {strides = array<i32>} : memref<1x8x128xf32, #tpu.memory_space<vmem>>, vector<1x8x128xf32>,
    return
  }
  func.func @transform_0(%arg0: i32, %arg1: i32) -> (i32, i32, i32) {
    %c0_i32 = arith.constant 0 : i32
    %c0_i32_0 = arith.constant 0 : i32
    return %arg0, %arg1, %c0_i32 : i32, i32, i32
  }
  func.func @transform_1(%arg0: i32, %arg1: i32) -> (i32, i32, i32) {
    %c0_i32 = arith.constant 0 : i32
    %c0_i32_0 = arith.constant 0 : i32
    %c0_i32_1 = arith.constant 0 : i32
    return %arg0, %c0_i32, %c0_i32_0 : i32, i32, i32
  }
  func.func @transform_2(%arg0: i32, %arg1: i32) -> (i32, i32) {
    %c0_i32 = arith.constant 0 : i32
    %c0_i32_0 = arith.constant 0 : i32
    return %arg1, %c0_i32 : i32, i32
  }
  func.func @transform_3(%arg0: i32, %arg1: i32) -> (i32, i32) {
    %c0_i32 = arith.constant 0 : i32
    %c0_i32_0 = arith.constant 0 : i32
    return %arg1, %c0_i32 : i32, i32
  }
  func.func @transform_4(%arg0: i32, %arg1: i32) -> (i32, i32) {
    %c0_i32 = arith.constant 0 : i32
    %c0_i32_0 = arith.constant 0 : i32
    return %arg1, %c0_i32 : i32, i32
  }
  func.func @transform_5(%arg0: i32, %arg1: i32) -> (i32, i32) {
    %c0_i32 = arith.constant 0 : i32
    %c0_i32_0 = arith.constant 0 : i32
    %c0_i32_1 = arith.constant 0 : i32
    return %c0_i32, %c0_i32_0 : i32, i32
  }
  func.func @transform_6(%arg0: i32, %arg1: i32) -> (i32, i32) {
    %c0_i32 = arith.constant 0 : i32
    %c0_i32_0 = arith.constant 0 : i32
    %c0_i32_1 = arith.constant 0 : i32
    return %c0_i32, %c0_i32_0 : i32, i32
  }
  func.func @transform_7(%arg0: i32, %arg1: i32) -> (i32, i32) {
    %c0_i32 = arith.constant 0 : i32
    %c0_i32_0 = arith.constant 0 : i32
    %c0_i32_1 = arith.constant 0 : i32
    return %c0_i32, %c0_i32_0 : i32, i32
  }
  func.func @transform_8(%arg0: i32, %arg1: i32) -> (i32, i32) {
    %c0_i32 = arith.constant 0 : i32
    %c0_i32_0 = arith.constant 0 : i32
    %c0_i32_1 = arith.constant 0 : i32
    return %c0_i32, %c0_i32_0 : i32, i32
  }
  func.func @transform_9(%arg0: i32, %arg1: i32) -> (i32, i32) {
    %c0_i32 = arith.constant 0 : i32
    %c0_i32_0 = arith.constant 0 : i32
    %c0_i32_1 = arith.constant 0 : i32
    return %c0_i32, %c0_i32_0 : i32, i32
  }
  func.func @transform_10(%arg0: i32, %arg1: i32) -> (i32, i32) {
    %c0_i32 = arith.constant 0 : i32
    %c0_i32_0 = arith.constant 0 : i32
    %c0_i32_1 = arith.constant 0 : i32
    return %c0_i32, %c0_i32_0 : i32, i32
  }
  func.func @transform_11(%arg0: i32, %arg1: i32) -> (i32, i32) {
    %c0_i32 = arith.constant 0 : i32
    %c0_i32_0 = arith.constant 0 : i32
    %c0_i32_1 = arith.constant 0 : i32
    return %c0_i32, %c0_i32_0 : i32, i32
  }
  func.func @transform_12(%arg0: i32, %arg1: i32) -> (i32, i32) {
    %c0_i32 = arith.constant 0 : i32
    %c0_i32_0 = arith.constant 0 : i32
    %c0_i32_1 = arith.constant 0 : i32
    return %c0_i32, %c0_i32_0 : i32, i32
  }
  func.func @transform_13(%arg0: i32, %arg1: i32) -> (i32, i32) {
    %c0_i32 = arith.constant 0 : i32
    %c0_i32_0 = arith.constant 0 : i32
    %c0_i32_1 = arith.constant 0 : i32
    return %c0_i32, %c0_i32_0 : i32, i32
  }
  func.func @transform_14(%arg0: i32, %arg1: i32) -> (i32, i32) {
    %c0_i32 = arith.constant 0 : i32
    %c0_i32_0 = arith.constant 0 : i32
    %c0_i32_1 = arith.constant 0 : i32
    return %c0_i32, %c0_i32_0 : i32, i32
  }
  func.func @transform_15(%arg0: i32, %arg1: i32) -> (i32, i32) {
    %c0_i32 = arith.constant 0 : i32
    %c0_i32_0 = arith.constant 0 : i32
    %c0_i32_1 = arith.constant 0 : i32
    return %c0_i32, %c0_i32_0 : i32, i32
  }
  func.func @transform_16(%arg0: i32, %arg1: i32) -> (i32, i32) {
    %c0_i32 = arith.constant 0 : i32
    %c0_i32_0 = arith.constant 0 : i32
    %c0_i32_1 = arith.constant 0 : i32
    return %c0_i32, %c0_i32_0 : i32, i32
  }
  func.func @transform_17(%arg0: i32, %arg1: i32) -> (i32, i32) {
    %c0_i32 = arith.constant 0 : i32
    %c0_i32_0 = arith.constant 0 : i32
    %c0_i32_1 = arith.constant 0 : i32
    return %c0_i32, %c0_i32_0 : i32, i32
  }
  func.func @transform_18(%arg0: i32, %arg1: i32) -> (i32, i32, i32) {
    %c0_i32 = arith.constant 0 : i32
    %c0_i32_0 = arith.constant 0 : i32
    return %arg0, %arg1, %c0_i32 : i32, i32, i32
  }
}

module attributes {stable_mosaic.version = 11 : i64} {
  func.func @_layer_kernel(%arg0: i32, %arg1: i32, %arg2: memref<1x8x128xf32, #tpu.memory_space<vmem>>, %arg3: memref<1x16x128xf32, #tpu.memory_space<vmem>>, %arg4: memref<8x128xf32, #tpu.memory_space<vmem>>, %arg5: memref<8x128xf32, #tpu.memory_space<vmem>>, %arg6: memref<8x128xf32, #tpu.memory_space<vmem>>, %arg7: memref<16x128xf32, #tpu.memory_space<vmem>>, %arg8: memref<16x128xf32, #tpu.memory_space<vmem>>, %arg9: memref<16x128xf32, #tpu.memory_space<vmem>>, %arg10: memref<1x128xf32, #tpu.memory_space<vmem>>, %arg11: memref<128x128xbf16, #tpu.memory_space<vmem>>, %arg12: memref<128x128xbf16, #tpu.memory_space<vmem>>, %arg13: memref<128x128xbf16, #tpu.memory_space<vmem>>, %arg14: memref<128x128xbf16, #tpu.memory_space<vmem>>, %arg15: memref<1x128xf32, #tpu.memory_space<vmem>>, %arg16: memref<128x341xbf16, #tpu.memory_space<vmem>>, %arg17: memref<128x341xbf16, #tpu.memory_space<vmem>>, %arg18: memref<341x128xbf16, #tpu.memory_space<vmem>>, %arg19: memref<1x128xf32, #tpu.memory_space<vmem>>, %arg20: memref<1x8x128xf32, #tpu.memory_space<vmem>>, %arg21: memref<16x128xbf16, #tpu.memory_space<vmem>>, %arg22: memref<16x128xbf16, #tpu.memory_space<vmem>>, %arg23: memref<8x128xbf16, #tpu.memory_space<vmem>>) attributes {dimension_semantics = [#tpu.dimension_semantics<parallel>, #tpu.dimension_semantics<arbitrary>], iteration_bounds = array<i64: 2, 1>, scalar_prefetch = 0 : i64, scratch_operands = 3 : i64, tpu.core_type = #tpu.core_type<tc>, window_params = [{transform_indices = @transform_0, window_bounds = array<i64: 1, 8, 128>}, {transform_indices = @transform_1, window_bounds = array<i64: 1, 16, 128>}, {transform_indices = @transform_2, window_bounds = array<i64: 8, 128>}, {transform_indices = @transform_3, window_bounds = array<i64: 8, 128>}, {transform_indices = @transform_4, window_bounds = array<i64: 8, 128>}, {pipeline_mode = #tpu.pipeline_mode<synchronous>, transform_indices = @transform_5, window_bounds = array<i64: 16, 128>}, {pipeline_mode = #tpu.pipeline_mode<synchronous>, transform_indices = @transform_6, window_bounds = array<i64: 16, 128>}, {pipeline_mode = #tpu.pipeline_mode<synchronous>, transform_indices = @transform_7, window_bounds = array<i64: 16, 128>}, {pipeline_mode = #tpu.pipeline_mode<synchronous>, transform_indices = @transform_8, window_bounds = array<i64: 1, 128>}, {pipeline_mode = #tpu.pipeline_mode<synchronous>, transform_indices = @transform_9, window_bounds = array<i64: 128, 128>}, {pipeline_mode = #tpu.pipeline_mode<synchronous>, transform_indices = @transform_10, window_bounds = array<i64: 128, 128>}, {pipeline_mode = #tpu.pipeline_mode<synchronous>, transform_indices = @transform_11, window_bounds = array<i64: 128, 128>}, {pipeline_mode = #tpu.pipeline_mode<synchronous>, transform_indices = @transform_12, window_bounds = array<i64: 128, 128>}, {pipeline_mode = #tpu.pipeline_mode<synchronous>, transform_indices = @transform_13, window_bounds = array<i64: 1, 128>}, {pipeline_mode = #tpu.pipeline_mode<synchronous>, transform_indices = @transform_14, window_bounds = array<i64: 128, 341>}, {pipeline_mode = #tpu.pipeline_mode<synchronous>, transform_indices = @transform_15, window_bounds = array<i64: 128, 341>}, {pipeline_mode = #tpu.pipeline_mode<synchronous>, transform_indices = @transform_16, window_bounds = array<i64: 341, 128>}, {pipeline_mode = #tpu.pipeline_mode<synchronous>, transform_indices = @transform_17, window_bounds = array<i64: 1, 128>}, {transform_indices = @transform_18, window_bounds = array<i64: 1, 8, 128>}]} {
    %c0_i32 = arith.constant 0 : i32
    %0 = arith.cmpi eq, %arg1, %c0_i32 : i32
    %1 = arith.extui %0 : i1 to i32
    %c0_i32_0 = arith.constant 0 : i32
    %2 = arith.cmpi ne, %1, %c0_i32_0 : i32
    scf.if %2 {
      %c0_81 = arith.constant 0 : index
      %c0_82 = arith.constant 0 : index
      %c0_83 = arith.constant 0 : index
      %153 = vector.load %arg3[%c0_81, %c0_82, %c0_83] : memref<1x16x128xf32, #tpu.memory_space<vmem>>, vector<1x16x128xf32>
      %154 = vector.shape_cast %153 : vector<1x16x128xf32> to vector<16x128xf32>
      %155 = arith.truncf %154 : vector<16x128xf32> to vector<16x128xbf16>
      %c0_84 = arith.constant 0 : index
      %c0_85 = arith.constant 0 : index
      %156 = vector.load %arg12[%c0_84, %c0_85] : memref<128x128xbf16, #tpu.memory_space<vmem>>, vector<128x128xbf16>
      %cst_86 = arith.constant dense<0.000000e+00> : vector<16x128xf32>
      %157 = tpu.matmul %155, %156, %cst_86 {dimension_numbers = #tpu.dot_dimension_numbers<[1], [0], [0], [1], [0, 0, 1, 1], [], []>} : vector<16x128xbf16>, vector<128x128xbf16>, vector<16x128xf32> -> vector<16x128xf32>
      %c0_87 = arith.constant 0 : index
      %c0_88 = arith.constant 0 : index
      %158 = vector.load %arg13[%c0_87, %c0_88] : memref<128x128xbf16, #tpu.memory_space<vmem>>, vector<128x128xbf16>
      %cst_89 = arith.constant dense<0.000000e+00> : vector<16x128xf32>
      %159 = tpu.matmul %155, %158, %cst_89 {dimension_numbers = #tpu.dot_dimension_numbers<[1], [0], [0], [1], [0, 0, 1, 1], [], []>} : vector<16x128xbf16>, vector<128x128xbf16>, vector<16x128xf32> -> vector<16x128xf32>
      %c0_90 = arith.constant 0 : index
      %c0_91 = arith.constant 0 : index
      %160 = vector.load %arg7[%c0_90, %c0_91] : memref<16x128xf32, #tpu.memory_space<vmem>>, vector<16x128xf32>
      %c0_92 = arith.constant 0 : index
      %c0_93 = arith.constant 0 : index
      %161 = vector.load %arg8[%c0_92, %c0_93] : memref<16x128xf32, #tpu.memory_space<vmem>>, vector<16x128xf32>
      %c0_94 = arith.constant 0 : index
      %c0_95 = arith.constant 0 : index
      %162 = vector.load %arg9[%c0_94, %c0_95] : memref<16x128xf32, #tpu.memory_space<vmem>>, vector<16x128xf32>
      %c127_i32_96 = arith.constant 127 : i32
      %163 = tpu.dynamic_rotate %157 by %c127_i32_96 dim 1 : vector<16x128xf32>, i32 -> vector<16x128xf32>
      %c1_i32_97 = arith.constant 1 : i32
      %164 = tpu.dynamic_rotate %157 by %c1_i32_97 dim 1 : vector<16x128xf32>, i32 -> vector<16x128xf32>
      %165 = arith.mulf %157, %160 : vector<16x128xf32>
      %166 = arith.mulf %163, %161 : vector<16x128xf32>
      %167 = arith.addf %165, %166 : vector<16x128xf32>
      %168 = arith.mulf %164, %162 : vector<16x128xf32>
      %169 = arith.addf %167, %168 : vector<16x128xf32>
      %170 = arith.truncf %169 : vector<16x128xf32> to vector<16x128xbf16>
      %c0_98 = arith.constant 0 : index
      %c0_99 = arith.constant 0 : index
      %171 = vector.load %arg21[%c0_98, %c0_99] : memref<16x128xbf16, #tpu.memory_space<vmem>>, vector<16x128xbf16>
      tpu.vector_store %arg21[%c0_98, %c0_99], %170 {strides = array<i32>} : memref<16x128xbf16, #tpu.memory_space<vmem>>, vector<16x128xbf16>,
      %172 = arith.truncf %159 : vector<16x128xf32> to vector<16x128xbf16>
      %c0_100 = arith.constant 0 : index
      %c0_101 = arith.constant 0 : index
      %173 = vector.load %arg22[%c0_100, %c0_101] : memref<16x128xbf16, #tpu.memory_space<vmem>>, vector<16x128xbf16>
      tpu.vector_store %arg22[%c0_100, %c0_101], %172 {strides = array<i32>} : memref<16x128xbf16, #tpu.memory_space<vmem>>, vector<16x128xbf16>,
    } else {
    }
    %c0 = arith.constant 0 : index
    %c0_1 = arith.constant 0 : index
    %c0_2 = arith.constant 0 : index
    %3 = vector.load %arg2[%c0, %c0_1, %c0_2] : memref<1x8x128xf32, #tpu.memory_space<vmem>>, vector<1x8x128xf32>
    %4 = vector.shape_cast %3 : vector<1x8x128xf32> to vector<8x128xf32>
    %c0_3 = arith.constant 0 : index
    %c0_4 = arith.constant 0 : index
    %5 = vector.load %arg10[%c0_3, %c0_4] : memref<1x128xf32, #tpu.memory_space<vmem>>, vector<1x128xf32>
    %6 = arith.mulf %4, %4 : vector<8x128xf32>
    %cst = arith.constant dense<0.000000e+00> : vector<8xf32>
    %7 = vector.multi_reduction <add>, %6, %cst [1] : vector<8x128xf32> to vector<8xf32>
    %8 = vector.shape_cast %7 : vector<8xf32> to vector<8x1xf32>
    %cst_5 = arith.constant 1.280000e+02 : f32
    %9 = vector.broadcast %cst_5 : f32 to vector<8x1xf32>
    %10 = arith.divf %8, %9 : vector<8x1xf32>
    %cst_6 = arith.constant 1.1920929E-7 : f32
    %11 = vector.broadcast %cst_6 : f32 to vector<8x1xf32>
    %12 = arith.addf %10, %11 : vector<8x1xf32>
    %13 = math.rsqrt %12 : vector<8x1xf32>
    %14 = vector.broadcast %13 : vector<8x1xf32> to vector<8x128xf32>
    %15 = arith.mulf %4, %14 : vector<8x128xf32>
    %16 = vector.broadcast %5 : vector<1x128xf32> to vector<8x128xf32>
    %17 = arith.mulf %15, %16 : vector<8x128xf32>
    %18 = arith.truncf %17 : vector<8x128xf32> to vector<8x128xbf16>
    %c0_7 = arith.constant 0 : index
    %c0_8 = arith.constant 0 : index
    %19 = vector.load %arg11[%c0_7, %c0_8] : memref<128x128xbf16, #tpu.memory_space<vmem>>, vector<128x128xbf16>
    %cst_9 = arith.constant dense<0.000000e+00> : vector<8x128xf32>
    %20 = tpu.matmul %18, %19, %cst_9 {dimension_numbers = #tpu.dot_dimension_numbers<[1], [0], [0], [1], [0, 0, 1, 1], [], []>} : vector<8x128xbf16>, vector<128x128xbf16>, vector<8x128xf32> -> vector<8x128xf32>
    %c0_10 = arith.constant 0 : index
    %c0_11 = arith.constant 0 : index
    %21 = vector.load %arg4[%c0_10, %c0_11] : memref<8x128xf32, #tpu.memory_space<vmem>>, vector<8x128xf32>
    %c0_12 = arith.constant 0 : index
    %c0_13 = arith.constant 0 : index
    %22 = vector.load %arg5[%c0_12, %c0_13] : memref<8x128xf32, #tpu.memory_space<vmem>>, vector<8x128xf32>
    %c0_14 = arith.constant 0 : index
    %c0_15 = arith.constant 0 : index
    %23 = vector.load %arg6[%c0_14, %c0_15] : memref<8x128xf32, #tpu.memory_space<vmem>>, vector<8x128xf32>
    %c127_i32 = arith.constant 127 : i32
    %24 = tpu.dynamic_rotate %20 by %c127_i32 dim 1 : vector<8x128xf32>, i32 -> vector<8x128xf32>
    %c1_i32 = arith.constant 1 : i32
    %25 = tpu.dynamic_rotate %20 by %c1_i32 dim 1 : vector<8x128xf32>, i32 -> vector<8x128xf32>
    %26 = arith.mulf %20, %21 : vector<8x128xf32>
    %27 = arith.mulf %24, %22 : vector<8x128xf32>
    %28 = arith.addf %26, %27 : vector<8x128xf32>
    %29 = arith.mulf %25, %23 : vector<8x128xf32>
    %30 = arith.addf %28, %29 : vector<8x128xf32>
    %31 = arith.truncf %30 : vector<8x128xf32> to vector<8x128xbf16>
    %32 = vector.extract_strided_slice %31 {offsets = [0, 0], sizes = [8, 32], strides = [1, 1]} : vector<8x128xbf16> to vector<8x32xbf16>
    %c0_16 = arith.constant 0 : index
    %c0_17 = arith.constant 0 : index
    %33 = vector.load %arg21[%c0_16, %c0_17] : memref<16x128xbf16, #tpu.memory_space<vmem>>, vector<16x32xbf16>
    %c0_18 = arith.constant 0 : index
    %c0_19 = arith.constant 0 : index
    %34 = vector.load %arg22[%c0_18, %c0_19] : memref<16x128xbf16, #tpu.memory_space<vmem>>, vector<16x32xbf16>
    %cst_20 = arith.constant dense<0.000000e+00> : vector<8x16xf32>
    %35 = tpu.matmul %32, %33, %cst_20 {dimension_numbers = #tpu.dot_dimension_numbers<[1], [1], [0], [0], [0, 0, 1, 0], [], []>} : vector<8x32xbf16>, vector<16x32xbf16>, vector<8x16xf32> -> vector<8x16xf32>
    %cst_21 = arith.constant dense<0xFF800000> : vector<8xf32>
    %36 = vector.multi_reduction <maximumf>, %35, %cst_21 [1] : vector<8x16xf32> to vector<8xf32>
    %37 = vector.shape_cast %36 : vector<8xf32> to vector<8x1xf32>
    %38 = vector.broadcast %37 : vector<8x1xf32> to vector<8x16xf32>
    %39 = arith.subf %35, %38 : vector<8x16xf32>
    %40 = math.exp %39 : vector<8x16xf32>
    %cst_22 = arith.constant dense<0.000000e+00> : vector<8xf32>
    %41 = vector.multi_reduction <add>, %40, %cst_22 [1] : vector<8x16xf32> to vector<8xf32>
    %42 = vector.shape_cast %41 : vector<8xf32> to vector<8x1xf32>
    %43 = tpu.reciprocal %42 {approx = true} : vector<8x1xf32> -> vector<8x1xf32>
    %44 = vector.broadcast %43 : vector<8x1xf32> to vector<8x16xf32>
    %45 = arith.mulf %40, %44 : vector<8x16xf32>
    %46 = arith.truncf %45 : vector<8x16xf32> to vector<8x16xbf16>
    %cst_23 = arith.constant dense<0.000000e+00> : vector<8x32xf32>
    %47 = tpu.matmul %46, %34, %cst_23 {dimension_numbers = #tpu.dot_dimension_numbers<[1], [0], [0], [1], [0, 0, 1, 1], [], []>} : vector<8x16xbf16>, vector<16x32xbf16>, vector<8x32xf32> -> vector<8x32xf32>
    %48 = arith.truncf %47 : vector<8x32xf32> to vector<8x32xbf16>
    %c0_24 = arith.constant 0 : index
    %c0_25 = arith.constant 0 : index
    %49 = vector.load %arg23[%c0_24, %c0_25] : memref<8x128xbf16, #tpu.memory_space<vmem>>, vector<8x32xbf16>
    tpu.vector_store %arg23[%c0_24, %c0_25], %48 {strides = array<i32>} : memref<8x128xbf16, #tpu.memory_space<vmem>>, vector<8x32xbf16>,
    %50 = vector.extract_strided_slice %31 {offsets = [0, 32], sizes = [8, 32], strides = [1, 1]} : vector<8x128xbf16> to vector<8x32xbf16>
    %c0_26 = arith.constant 0 : index
    %c32 = arith.constant 32 : index
    %51 = vector.load %arg21[%c0_26, %c32] : memref<16x128xbf16, #tpu.memory_space<vmem>>, vector<16x32xbf16>
    %c0_27 = arith.constant 0 : index
    %c32_28 = arith.constant 32 : index
    %52 = vector.load %arg22[%c0_27, %c32_28] : memref<16x128xbf16, #tpu.memory_space<vmem>>, vector<16x32xbf16>
    %cst_29 = arith.constant dense<0.000000e+00> : vector<8x16xf32>
    %53 = tpu.matmul %50, %51, %cst_29 {dimension_numbers = #tpu.dot_dimension_numbers<[1], [1], [0], [0], [0, 0, 1, 0], [], []>} : vector<8x32xbf16>, vector<16x32xbf16>, vector<8x16xf32> -> vector<8x16xf32>
    %cst_30 = arith.constant dense<0xFF800000> : vector<8xf32>
    %54 = vector.multi_reduction <maximumf>, %53, %cst_30 [1] : vector<8x16xf32> to vector<8xf32>
    %55 = vector.shape_cast %54 : vector<8xf32> to vector<8x1xf32>
    %56 = vector.broadcast %55 : vector<8x1xf32> to vector<8x16xf32>
    %57 = arith.subf %53, %56 : vector<8x16xf32>
    %58 = math.exp %57 : vector<8x16xf32>
    %cst_31 = arith.constant dense<0.000000e+00> : vector<8xf32>
    %59 = vector.multi_reduction <add>, %58, %cst_31 [1] : vector<8x16xf32> to vector<8xf32>
    %60 = vector.shape_cast %59 : vector<8xf32> to vector<8x1xf32>
    %61 = tpu.reciprocal %60 {approx = true} : vector<8x1xf32> -> vector<8x1xf32>
    %62 = vector.broadcast %61 : vector<8x1xf32> to vector<8x16xf32>
    %63 = arith.mulf %58, %62 : vector<8x16xf32>
    %64 = arith.truncf %63 : vector<8x16xf32> to vector<8x16xbf16>
    %cst_32 = arith.constant dense<0.000000e+00> : vector<8x32xf32>
    %65 = tpu.matmul %64, %52, %cst_32 {dimension_numbers = #tpu.dot_dimension_numbers<[1], [0], [0], [1], [0, 0, 1, 1], [], []>} : vector<8x16xbf16>, vector<16x32xbf16>, vector<8x32xf32> -> vector<8x32xf32>
    %66 = arith.truncf %65 : vector<8x32xf32> to vector<8x32xbf16>
    %c0_33 = arith.constant 0 : index
    %c32_34 = arith.constant 32 : index
    %67 = vector.load %arg23[%c0_33, %c32_34] : memref<8x128xbf16, #tpu.memory_space<vmem>>, vector<8x32xbf16>
    tpu.vector_store %arg23[%c0_33, %c32_34], %66 {strides = array<i32>} : memref<8x128xbf16, #tpu.memory_space<vmem>>, vector<8x32xbf16>,
    %68 = vector.extract_strided_slice %31 {offsets = [0, 64], sizes = [8, 32], strides = [1, 1]} : vector<8x128xbf16> to vector<8x32xbf16>
    %c0_35 = arith.constant 0 : index
    %c64 = arith.constant 64 : index
    %69 = vector.load %arg21[%c0_35, %c64] : memref<16x128xbf16, #tpu.memory_space<vmem>>, vector<16x32xbf16>
    %c0_36 = arith.constant 0 : index
    %c64_37 = arith.constant 64 : index
    %70 = vector.load %arg22[%c0_36, %c64_37] : memref<16x128xbf16, #tpu.memory_space<vmem>>, vector<16x32xbf16>
    %cst_38 = arith.constant dense<0.000000e+00> : vector<8x16xf32>
    %71 = tpu.matmul %68, %69, %cst_38 {dimension_numbers = #tpu.dot_dimension_numbers<[1], [1], [0], [0], [0, 0, 1, 0], [], []>} : vector<8x32xbf16>, vector<16x32xbf16>, vector<8x16xf32> -> vector<8x16xf32>
    %cst_39 = arith.constant dense<0xFF800000> : vector<8xf32>
    %72 = vector.multi_reduction <maximumf>, %71, %cst_39 [1] : vector<8x16xf32> to vector<8xf32>
    %73 = vector.shape_cast %72 : vector<8xf32> to vector<8x1xf32>
    %74 = vector.broadcast %73 : vector<8x1xf32> to vector<8x16xf32>
    %75 = arith.subf %71, %74 : vector<8x16xf32>
    %76 = math.exp %75 : vector<8x16xf32>
    %cst_40 = arith.constant dense<0.000000e+00> : vector<8xf32>
    %77 = vector.multi_reduction <add>, %76, %cst_40 [1] : vector<8x16xf32> to vector<8xf32>
    %78 = vector.shape_cast %77 : vector<8xf32> to vector<8x1xf32>
    %79 = tpu.reciprocal %78 {approx = true} : vector<8x1xf32> -> vector<8x1xf32>
    %80 = vector.broadcast %79 : vector<8x1xf32> to vector<8x16xf32>
    %81 = arith.mulf %76, %80 : vector<8x16xf32>
    %82 = arith.truncf %81 : vector<8x16xf32> to vector<8x16xbf16>
    %cst_41 = arith.constant dense<0.000000e+00> : vector<8x32xf32>
    %83 = tpu.matmul %82, %70, %cst_41 {dimension_numbers = #tpu.dot_dimension_numbers<[1], [0], [0], [1], [0, 0, 1, 1], [], []>} : vector<8x16xbf16>, vector<16x32xbf16>, vector<8x32xf32> -> vector<8x32xf32>
    %84 = arith.truncf %83 : vector<8x32xf32> to vector<8x32xbf16>
    %c0_42 = arith.constant 0 : index
    %c64_43 = arith.constant 64 : index
    %85 = vector.load %arg23[%c0_42, %c64_43] : memref<8x128xbf16, #tpu.memory_space<vmem>>, vector<8x32xbf16>
    tpu.vector_store %arg23[%c0_42, %c64_43], %84 {strides = array<i32>} : memref<8x128xbf16, #tpu.memory_space<vmem>>, vector<8x32xbf16>,
    %86 = vector.extract_strided_slice %31 {offsets = [0, 96], sizes = [8, 32], strides = [1, 1]} : vector<8x128xbf16> to vector<8x32xbf16>
    %c0_44 = arith.constant 0 : index
    %c96 = arith.constant 96 : index
    %87 = vector.load %arg21[%c0_44, %c96] : memref<16x128xbf16, #tpu.memory_space<vmem>>, vector<16x32xbf16>
    %c0_45 = arith.constant 0 : index
    %c96_46 = arith.constant 96 : index
    %88 = vector.load %arg22[%c0_45, %c96_46] : memref<16x128xbf16, #tpu.memory_space<vmem>>, vector<16x32xbf16>
    %cst_47 = arith.constant dense<0.000000e+00> : vector<8x16xf32>
    %89 = tpu.matmul %86, %87, %cst_47 {dimension_numbers = #tpu.dot_dimension_numbers<[1], [1], [0], [0], [0, 0, 1, 0], [], []>} : vector<8x32xbf16>, vector<16x32xbf16>, vector<8x16xf32> -> vector<8x16xf32>
    %cst_48 = arith.constant dense<0xFF800000> : vector<8xf32>
    %90 = vector.multi_reduction <maximumf>, %89, %cst_48 [1] : vector<8x16xf32> to vector<8xf32>
    %91 = vector.shape_cast %90 : vector<8xf32> to vector<8x1xf32>
    %92 = vector.broadcast %91 : vector<8x1xf32> to vector<8x16xf32>
    %93 = arith.subf %89, %92 : vector<8x16xf32>
    %94 = math.exp %93 : vector<8x16xf32>
    %cst_49 = arith.constant dense<0.000000e+00> : vector<8xf32>
    %95 = vector.multi_reduction <add>, %94, %cst_49 [1] : vector<8x16xf32> to vector<8xf32>
    %96 = vector.shape_cast %95 : vector<8xf32> to vector<8x1xf32>
    %97 = tpu.reciprocal %96 {approx = true} : vector<8x1xf32> -> vector<8x1xf32>
    %98 = vector.broadcast %97 : vector<8x1xf32> to vector<8x16xf32>
    %99 = arith.mulf %94, %98 : vector<8x16xf32>
    %100 = arith.truncf %99 : vector<8x16xf32> to vector<8x16xbf16>
    %cst_50 = arith.constant dense<0.000000e+00> : vector<8x32xf32>
    %101 = tpu.matmul %100, %88, %cst_50 {dimension_numbers = #tpu.dot_dimension_numbers<[1], [0], [0], [1], [0, 0, 1, 1], [], []>} : vector<8x16xbf16>, vector<16x32xbf16>, vector<8x32xf32> -> vector<8x32xf32>
    %102 = arith.truncf %101 : vector<8x32xf32> to vector<8x32xbf16>
    %c0_51 = arith.constant 0 : index
    %c96_52 = arith.constant 96 : index
    %103 = vector.load %arg23[%c0_51, %c96_52] : memref<8x128xbf16, #tpu.memory_space<vmem>>, vector<8x32xbf16>
    tpu.vector_store %arg23[%c0_51, %c96_52], %102 {strides = array<i32>} : memref<8x128xbf16, #tpu.memory_space<vmem>>, vector<8x32xbf16>,
    %c0_53 = arith.constant 0 : index
    %c0_54 = arith.constant 0 : index
    %104 = vector.load %arg23[%c0_53, %c0_54] : memref<8x128xbf16, #tpu.memory_space<vmem>>, vector<8x128xbf16>
    %c0_55 = arith.constant 0 : index
    %c0_56 = arith.constant 0 : index
    %105 = vector.load %arg14[%c0_55, %c0_56] : memref<128x128xbf16, #tpu.memory_space<vmem>>, vector<128x128xbf16>
    %cst_57 = arith.constant dense<0.000000e+00> : vector<8x128xf32>
    %106 = tpu.matmul %104, %105, %cst_57 {dimension_numbers = #tpu.dot_dimension_numbers<[1], [0], [0], [1], [0, 0, 1, 1], [], []>} : vector<8x128xbf16>, vector<128x128xbf16>, vector<8x128xf32> -> vector<8x128xf32>
    %107 = arith.addf %4, %106 : vector<8x128xf32>
    %c0_58 = arith.constant 0 : index
    %c0_59 = arith.constant 0 : index
    %108 = vector.load %arg15[%c0_58, %c0_59] : memref<1x128xf32, #tpu.memory_space<vmem>>, vector<1x128xf32>
    %109 = arith.mulf %107, %107 : vector<8x128xf32>
    %cst_60 = arith.constant dense<0.000000e+00> : vector<8xf32>
    %110 = vector.multi_reduction <add>, %109, %cst_60 [1] : vector<8x128xf32> to vector<8xf32>
    %111 = vector.shape_cast %110 : vector<8xf32> to vector<8x1xf32>
    %cst_61 = arith.constant 1.280000e+02 : f32
    %112 = vector.broadcast %cst_61 : f32 to vector<8x1xf32>
    %113 = arith.divf %111, %112 : vector<8x1xf32>
    %cst_62 = arith.constant 1.1920929E-7 : f32
    %114 = vector.broadcast %cst_62 : f32 to vector<8x1xf32>
    %115 = arith.addf %113, %114 : vector<8x1xf32>
    %116 = math.rsqrt %115 : vector<8x1xf32>
    %117 = vector.broadcast %116 : vector<8x1xf32> to vector<8x128xf32>
    %118 = arith.mulf %107, %117 : vector<8x128xf32>
    %119 = vector.broadcast %108 : vector<1x128xf32> to vector<8x128xf32>
    %120 = arith.mulf %118, %119 : vector<8x128xf32>
    %121 = arith.truncf %120 : vector<8x128xf32> to vector<8x128xbf16>
    %c0_63 = arith.constant 0 : index
    %c0_64 = arith.constant 0 : index
    %122 = vector.load %arg16[%c0_63, %c0_64] : memref<128x341xbf16, #tpu.memory_space<vmem>>, vector<128x341xbf16>
    %cst_65 = arith.constant dense<0.000000e+00> : vector<8x341xf32>
    %123 = tpu.matmul %121, %122, %cst_65 {dimension_numbers = #tpu.dot_dimension_numbers<[1], [0], [0], [1], [0, 0, 1, 1], [], []>} : vector<8x128xbf16>, vector<128x341xbf16>, vector<8x341xf32> -> vector<8x341xf32>
    %c0_66 = arith.constant 0 : index
    %c0_67 = arith.constant 0 : index
    %124 = vector.load %arg17[%c0_66, %c0_67] : memref<128x341xbf16, #tpu.memory_space<vmem>>, vector<128x341xbf16>
    %cst_68 = arith.constant dense<0.000000e+00> : vector<8x341xf32>
    %125 = tpu.matmul %121, %124, %cst_68 {dimension_numbers = #tpu.dot_dimension_numbers<[1], [0], [0], [1], [0, 0, 1, 1], [], []>} : vector<8x128xbf16>, vector<128x341xbf16>, vector<8x341xf32> -> vector<8x341xf32>
    %126 = arith.negf %123 : vector<8x341xf32>
    %127 = math.exp %126 : vector<8x341xf32>
    %cst_69 = arith.constant 1.000000e+00 : f32
    %128 = vector.broadcast %cst_69 : f32 to vector<8x341xf32>
    %129 = arith.addf %128, %127 : vector<8x341xf32>
    %130 = arith.divf %128, %129 : vector<8x341xf32>
    %131 = arith.mulf %123, %130 : vector<8x341xf32>
    %132 = arith.mulf %131, %125 : vector<8x341xf32>
    %133 = arith.truncf %132 : vector<8x341xf32> to vector<8x341xbf16>
    %c0_70 = arith.constant 0 : index
    %c0_71 = arith.constant 0 : index
    %134 = vector.load %arg18[%c0_70, %c0_71] : memref<341x128xbf16, #tpu.memory_space<vmem>>, vector<341x128xbf16>
    %cst_72 = arith.constant dense<0.000000e+00> : vector<8x128xf32>
    %135 = tpu.matmul %133, %134, %cst_72 {dimension_numbers = #tpu.dot_dimension_numbers<[1], [0], [0], [1], [0, 0, 1, 1], [], []>} : vector<8x341xbf16>, vector<341x128xbf16>, vector<8x128xf32> -> vector<8x128xf32>
    %136 = arith.addf %107, %135 : vector<8x128xf32>
    %c0_73 = arith.constant 0 : index
    %c0_74 = arith.constant 0 : index
    %137 = vector.load %arg19[%c0_73, %c0_74] : memref<1x128xf32, #tpu.memory_space<vmem>>, vector<1x128xf32>
    %138 = arith.mulf %136, %136 : vector<8x128xf32>
    %cst_75 = arith.constant dense<0.000000e+00> : vector<8xf32>
    %139 = vector.multi_reduction <add>, %138, %cst_75 [1] : vector<8x128xf32> to vector<8xf32>
    %140 = vector.shape_cast %139 : vector<8xf32> to vector<8x1xf32>
    %cst_76 = arith.constant 1.280000e+02 : f32
    %141 = vector.broadcast %cst_76 : f32 to vector<8x1xf32>
    %142 = arith.divf %140, %141 : vector<8x1xf32>
    %cst_77 = arith.constant 1.1920929E-7 : f32
    %143 = vector.broadcast %cst_77 : f32 to vector<8x1xf32>
    %144 = arith.addf %142, %143 : vector<8x1xf32>
    %145 = math.rsqrt %144 : vector<8x1xf32>
    %146 = vector.broadcast %145 : vector<8x1xf32> to vector<8x128xf32>
    %147 = arith.mulf %136, %146 : vector<8x128xf32>
    %148 = vector.broadcast %137 : vector<1x128xf32> to vector<8x128xf32>
    %149 = arith.mulf %147, %148 : vector<8x128xf32>
    %c0_78 = arith.constant 0 : index
    %c0_79 = arith.constant 0 : index
    %c0_80 = arith.constant 0 : index
    %150 = vector.load %arg20[%c0_78, %c0_79, %c0_80] : memref<1x8x128xf32, #tpu.memory_space<vmem>>, vector<1x8x128xf32>
    %151 = vector.shape_cast %150 : vector<1x8x128xf32> to vector<8x128xf32>
    %152 = vector.shape_cast %149 : vector<8x128xf32> to vector<1x8x128xf32>
    tpu.vector_store %arg20[%c0_78, %c0_79, %c0_80], %152 {strides = array<i32>} : memref<1x8x128xf32, #tpu.memory_space<vmem>>, vector<1x8x128xf32>,
    return
  }
  func.func @transform_0(%arg0: i32, %arg1: i32) -> (i32, i32, i32) {
    %c0_i32 = arith.constant 0 : i32
    %c0_i32_0 = arith.constant 0 : i32
    return %arg0, %arg1, %c0_i32 : i32, i32, i32
  }
  func.func @transform_1(%arg0: i32, %arg1: i32) -> (i32, i32, i32) {
    %c0_i32 = arith.constant 0 : i32
    %c0_i32_0 = arith.constant 0 : i32
    %c0_i32_1 = arith.constant 0 : i32
    return %arg0, %c0_i32, %c0_i32_0 : i32, i32, i32
  }
  func.func @transform_2(%arg0: i32, %arg1: i32) -> (i32, i32) {
    %c0_i32 = arith.constant 0 : i32
    %c0_i32_0 = arith.constant 0 : i32
    return %arg1, %c0_i32 : i32, i32
  }
  func.func @transform_3(%arg0: i32, %arg1: i32) -> (i32, i32) {
    %c0_i32 = arith.constant 0 : i32
    %c0_i32_0 = arith.constant 0 : i32
    return %arg1, %c0_i32 : i32, i32
  }
  func.func @transform_4(%arg0: i32, %arg1: i32) -> (i32, i32) {
    %c0_i32 = arith.constant 0 : i32
    %c0_i32_0 = arith.constant 0 : i32
    return %arg1, %c0_i32 : i32, i32
  }
  func.func @transform_5(%arg0: i32, %arg1: i32) -> (i32, i32) {
    %c0_i32 = arith.constant 0 : i32
    %c0_i32_0 = arith.constant 0 : i32
    %c0_i32_1 = arith.constant 0 : i32
    return %c0_i32, %c0_i32_0 : i32, i32
  }
  func.func @transform_6(%arg0: i32, %arg1: i32) -> (i32, i32) {
    %c0_i32 = arith.constant 0 : i32
    %c0_i32_0 = arith.constant 0 : i32
    %c0_i32_1 = arith.constant 0 : i32
    return %c0_i32, %c0_i32_0 : i32, i32
  }
  func.func @transform_7(%arg0: i32, %arg1: i32) -> (i32, i32) {
    %c0_i32 = arith.constant 0 : i32
    %c0_i32_0 = arith.constant 0 : i32
    %c0_i32_1 = arith.constant 0 : i32
    return %c0_i32, %c0_i32_0 : i32, i32
  }
  func.func @transform_8(%arg0: i32, %arg1: i32) -> (i32, i32) {
    %c0_i32 = arith.constant 0 : i32
    %c0_i32_0 = arith.constant 0 : i32
    %c0_i32_1 = arith.constant 0 : i32
    return %c0_i32, %c0_i32_0 : i32, i32
  }
  func.func @transform_9(%arg0: i32, %arg1: i32) -> (i32, i32) {
    %c0_i32 = arith.constant 0 : i32
    %c0_i32_0 = arith.constant 0 : i32
    %c0_i32_1 = arith.constant 0 : i32
    return %c0_i32, %c0_i32_0 : i32, i32
  }
  func.func @transform_10(%arg0: i32, %arg1: i32) -> (i32, i32) {
    %c0_i32 = arith.constant 0 : i32
    %c0_i32_0 = arith.constant 0 : i32
    %c0_i32_1 = arith.constant 0 : i32
    return %c0_i32, %c0_i32_0 : i32, i32
  }
  func.func @transform_11(%arg0: i32, %arg1: i32) -> (i32, i32) {
    %c0_i32 = arith.constant 0 : i32
    %c0_i32_0 = arith.constant 0 : i32
    %c0_i32_1 = arith.constant 0 : i32
    return %c0_i32, %c0_i32_0 : i32, i32
  }
  func.func @transform_12(%arg0: i32, %arg1: i32) -> (i32, i32) {
    %c0_i32 = arith.constant 0 : i32
    %c0_i32_0 = arith.constant 0 : i32
    %c0_i32_1 = arith.constant 0 : i32
    return %c0_i32, %c0_i32_0 : i32, i32
  }
  func.func @transform_13(%arg0: i32, %arg1: i32) -> (i32, i32) {
    %c0_i32 = arith.constant 0 : i32
    %c0_i32_0 = arith.constant 0 : i32
    %c0_i32_1 = arith.constant 0 : i32
    return %c0_i32, %c0_i32_0 : i32, i32
  }
  func.func @transform_14(%arg0: i32, %arg1: i32) -> (i32, i32) {
    %c0_i32 = arith.constant 0 : i32
    %c0_i32_0 = arith.constant 0 : i32
    %c0_i32_1 = arith.constant 0 : i32
    return %c0_i32, %c0_i32_0 : i32, i32
  }
  func.func @transform_15(%arg0: i32, %arg1: i32) -> (i32, i32) {
    %c0_i32 = arith.constant 0 : i32
    %c0_i32_0 = arith.constant 0 : i32
    %c0_i32_1 = arith.constant 0 : i32
    return %c0_i32, %c0_i32_0 : i32, i32
  }
  func.func @transform_16(%arg0: i32, %arg1: i32) -> (i32, i32) {
    %c0_i32 = arith.constant 0 : i32
    %c0_i32_0 = arith.constant 0 : i32
    %c0_i32_1 = arith.constant 0 : i32
    return %c0_i32, %c0_i32_0 : i32, i32
  }
  func.func @transform_17(%arg0: i32, %arg1: i32) -> (i32, i32) {
    %c0_i32 = arith.constant 0 : i32
    %c0_i32_0 = arith.constant 0 : i32
    %c0_i32_1 = arith.constant 0 : i32
    return %c0_i32, %c0_i32_0 : i32, i32
  }
  func.func @transform_18(%arg0: i32, %arg1: i32) -> (i32, i32, i32) {
    %c0_i32 = arith.constant 0 : i32
    %c0_i32_0 = arith.constant 0 : i32
    return %arg0, %arg1, %c0_i32 : i32, i32, i32
  }
}

</mosaic_0001>

<bundles_post_ra>
// kernel: tile.50
= control target key start
LH: loop header
LB: loop body
LE: loop exit
PB: predicated region body
PF: predicated region fallthrough
CT: control target
= control target key end

     0   :  { %vm83_vm0 = vcmask 1047556   ;;  %vm85_vm1 = vcmask 261120   ;;  %s196_s9 = smov 96   ;;  %s197_s14 = smov 32   ;;  %vm104_vm2 = vcmask 1048320   ;;  %vm125_vm3 = vcmask 785920   ;;  %s290_s0 = inlined_call_operand.vmem [shape: f32[16,4,32], index: 0, kind: input, shape index: {}]   ;;  %s291_s1 = inlined_call_operand.vmem [shape: f32[16,128], index: 1, kind: output, shape index: {}]  }
   0x1   :  { %v181_v0 = vld [vmem:[%s290_s0 + $0x1c] sm:$0xf]  ;;  %v182_v1 = vld [vmem:[%s290_s0 + $0x18] sm:$0xf]  ;;  %v183_v2 = vld [vmem:[%s290_s0 + $0x14] sm:$0xf] }
   0x2   :  { %49 = vst [vmem:[#allocation0 + $0x38] sm:$0xf] %v181_v0  ;;  %54 = vst [vmem:[#allocation0 + $0x30] sm:$0xf] %v182_v1  ;;  %v184_v3 = vld [vmem:[%s290_s0 + $0x10] sm:$0xf] }
   0x3   :  { %59 = vst [vmem:[#allocation0 + $0x28] sm:$0xf] %v183_v2  ;;  %v185_v4 = vld [vmem:[%s290_s0 + $0xc] sm:$0xf]  ;;  %v186_v5 = vld [vmem:[%s290_s0 + $0x8] sm:$0xf] }
   0x4   :  { %64 = vst [vmem:[#allocation0 + $0x20] sm:$0xf] %v184_v3  ;;  %69 = vst [vmem:[#allocation0 + $0x18] sm:$0xf] %v185_v4  ;;  %v187_v6 = vld [vmem:[%s290_s0 + $0x4] sm:$0xf] }
   0x5   :  { %74 = vst [vmem:[#allocation0 + $0x10] sm:$0xf] %v186_v5  ;;  %v79_v7 = vld [vmem:[%s290_s0] sm:$0xf]  ;;  %78 = vst [vmem:[#allocation0 + $0x8] sm:$0xf] %v187_v6 }
   0x6   :  { %80 = vst [vmem:[#allocation0] sm:$0xf] %v79_v7  ;;  %v173_v8 = vld [vmem:[%s290_s0 + $0x3c] sm:$0xf]  ;;  %v174_v9 = vld [vmem:[%s290_s0 + $0x38] sm:$0xf] }
   0x7   :  { %9 = vst [vmem:[#allocation0 + $0x78] sm:$0xf] %v173_v8  ;;  %14 = vst [vmem:[#allocation0 + $0x70] sm:$0xf] %v174_v9  ;;  %v175_v10 = vld [vmem:[%s290_s0 + $0x34] sm:$0xf] }
   0x8   :  { %v176_v11 = vld [vmem:[%s290_s0 + $0x30] sm:$0xf]  ;;  %v177_v12 = vld [vmem:[%s290_s0 + $0x2c] sm:$0xf]  ;;  %19 = vst [vmem:[#allocation0 + $0x68] sm:$0xf] %v175_v10 }
   0x9   :  { %24 = vst [vmem:[#allocation0 + $0x60] sm:$0xf] %v176_v11  ;;  %29 = vst [vmem:[#allocation0 + $0x58] sm:$0xf] %v177_v12  ;;  %v178_v13 = vld [vmem:[%s290_s0 + $0x28] sm:$0xf] }
   0xa   :  { %v179_v14 = vld [vmem:[%s290_s0 + $0x24] sm:$0xf]  ;;  %v180_v15 = vld [vmem:[%s290_s0 + $0x20] sm:$0xf]  ;;  %34 = vst [vmem:[#allocation0 + $0x50] sm:$0xf] %v178_v13 }
   0xb   :  { %39 = vst [vmem:[#allocation0 + $0x48] sm:$0xf] %v179_v14  ;;  %44 = vst [vmem:[#allocation0 + $0x40] sm:$0xf] %v180_v15  ;;  %s195_s0 = smov 64   ;;  %vm146_vm4 = vcmask 523520  }
   0xc   :  { %v120_v16 = vld [vmem:[#allocation0 + $0x2] ss:$8 sm:$0xf0]   ;;  %v99_v17 = vld [vmem:[#allocation0 + $0x3] ss:$8 sm:$0xf0]  }
   0xd   :  { %v118_v18 = vld [vmem:[#allocation0 + $0x2] ss:$8 sm:$0xf]   ;;  %v97_v19 = vld [vmem:[#allocation0 + $0x3] ss:$8 sm:$0xf]  }
   0xe   :  { %v122_v20 = vsel %vm83_vm0, %v120_v16, %v118_v18  ;;  %v101_v21 = vsel %vm83_vm0, %v99_v17, %v97_v19  ;;  %v139_v24 = vld [vmem:[#allocation0 + $0x1] ss:$8 sm:$0xf]   ;;  %v81_v32 = vld [vmem:[#allocation0] ss:$8 sm:$0xf]  }
   0xf   :  { %123 = vrot.lane.b32.xlu1 %v122_v20, %s195_s0  ;;  %102 = vrot.lane.b32.xlu0 %v101_v21, %s196_s9  ;;  %v141_v25 = vld [vmem:[#allocation0 + $0x1] ss:$8 sm:$0xf0]   ;;  %v82_v33 = vld [vmem:[#allocation0] ss:$8 sm:$0xf0]  }
  0x10   :  { %v130_v22 = vld [vmem:[#allocation0 + $0x42] ss:$8 sm:$0xf0]   ;;  %v109_v23 = vld [vmem:[#allocation0 + $0x43] ss:$8 sm:$0xf0]   ;;  %v84_v34 = vsel %vm83_vm0, %v82_v33, %v81_v32  ;;  %v143_v38 = vsel %vm83_vm0, %v141_v25, %v139_v24 }
  0x11   :  { %v151_v31 = vld [vmem:[#allocation0 + $0x41] ss:$8 sm:$0xf0]   ;;  %v90_v36 = vld [vmem:[#allocation0 + $0x40] ss:$8 sm:$0xf0]  }
  0x12   :  { %v128_v26 = vld [vmem:[#allocation0 + $0x42] ss:$8 sm:$0xf]   ;;  %v107_v27 = vld [vmem:[#allocation0 + $0x43] ss:$8 sm:$0xf]  }
  0x13   :  { %v132_v28 = vsel %vm83_vm0, %v130_v22, %v128_v26  ;;  %v111_v29 = vsel %vm83_vm0, %v109_v23, %v107_v27  ;;  %v149_v30 = vld [vmem:[#allocation0 + $0x41] ss:$8 sm:$0xf]   ;;  %v88_v35 = vld [vmem:[#allocation0 + $0x40] ss:$8 sm:$0xf]  }
  0x14   :  { %133 = vrot.lane.b32.xlu1 %v132_v28, %s195_s0  ;;  %112 = vrot.lane.b32.xlu0 %v111_v29, %s196_s9  ;;  %v153_v37 = vsel %vm83_vm0, %v151_v31, %v149_v30  ;;  %86 = vst.msk [vmem:[%s291_s1] sm:$0xff] %vm85_vm1, %v84_v34   ;;  %v92_v39 = vsel %vm83_vm0, %v90_v36, %v88_v35 }
  0x15   :  { %188 = vst.msk [vmem:[%s291_s1 + $0x8] sm:$0xff] %vm85_vm1, %v92_v39  }
  0x18   :  { %154 = vrot.lane.b32.xlu1 %v153_v37, %s197_s14  ;;  %144 = vrot.lane.b32.xlu0 %v143_v38, %s197_s14 }
  0x81   :  { %v124_v40 = vpop.permute.xlu1 %123   ;;  %v103_v41 = vpop.permute.xlu0 %102  }
  0x82   :  { %105 = vst.msk [vmem:[%s291_s1] sm:$0xff] %vm104_vm2, %v103_v41  }
  0x83   :  { %126 = vst.msk [vmem:[%s291_s1] sm:$0xff] %vm125_vm3, %v124_v40  }
  0x86   :  { %v134_v42 = vpop.permute.xlu1 %133   ;;  %v113_v43 = vpop.permute.xlu0 %112  }
  0x87   :  { %189 = vst.msk [vmem:[%s291_s1 + $0x8] sm:$0xff] %vm104_vm2, %v113_v43  }
  0x88   :  { %190 = vst.msk [vmem:[%s291_s1 + $0x8] sm:$0xff] %vm125_vm3, %v134_v42  }
  0x8a   :  { %v155_v44 = vpop.permute.xlu1 %154   ;;  %v145_v45 = vpop.permute.xlu0 %144  }
  0x8b   :  { %191 = vst.msk [vmem:[%s291_s1 + $0x8] sm:$0xff] %vm146_vm4, %v155_v44   ;;  %147 = vst.msk [vmem:[%s291_s1] sm:$0xff] %vm146_vm4, %v145_v45  }

// kernel: tile.36
= control target key start
LH: loop header
LB: loop body
LE: loop exit
PB: predicated region body
PF: predicated region fallthrough
CT: control target
= control target key end

     0   :  { %vm43_vm0 = vcmask 1047556   ;;  %vm45_vm1 = vcmask 261120   ;;  %s94_s22 = smov 32   ;;  %s95_s25 = smov 64   ;;  %vm55_vm2 = vcmask 1048320   ;;  %vm65_vm3 = vcmask 785920   ;;  %s147_s0 = inlined_call_operand.vmem [shape: f32[8,4,32], index: 0, kind: input, shape index: {}]   ;;  %s148_s1 = inlined_call_operand.vmem [shape: f32[8,128], index: 1, kind: output, shape index: {}]  }
   0x1   :  { %v83_v0 = vld [vmem:[%s147_s0 + $0x1c] sm:$0xf]  ;;  %v84_v1 = vld [vmem:[%s147_s0 + $0x18] sm:$0xf]  ;;  %v85_v2 = vld [vmem:[%s147_s0 + $0x14] sm:$0xf] }
   0x2   :  { %9 = vst [vmem:[#allocation0 + $0x38] sm:$0xf] %v83_v0  ;;  %14 = vst [vmem:[#allocation0 + $0x30] sm:$0xf] %v84_v1  ;;  %v86_v3 = vld [vmem:[%s147_s0 + $0x10] sm:$0xf] }
   0x3   :  { %19 = vst [vmem:[#allocation0 + $0x28] sm:$0xf] %v85_v2  ;;  %v87_v4 = vld [vmem:[%s147_s0 + $0xc] sm:$0xf]  ;;  %v88_v5 = vld [vmem:[%s147_s0 + $0x8] sm:$0xf] }
   0x4   :  { %24 = vst [vmem:[#allocation0 + $0x20] sm:$0xf] %v86_v3  ;;  %29 = vst [vmem:[#allocation0 + $0x18] sm:$0xf] %v87_v4  ;;  %v89_v6 = vld [vmem:[%s147_s0 + $0x4] sm:$0xf] }
   0x5   :  { %34 = vst [vmem:[#allocation0 + $0x10] sm:$0xf] %v88_v5  ;;  %v39_v7 = vld [vmem:[%s147_s0] sm:$0xf]  ;;  %38 = vst [vmem:[#allocation0 + $0x8] sm:$0xf] %v89_v6 }
   0x6   :  { %40 = vst [vmem:[#allocation0] sm:$0xf] %v39_v7  ;;  %s93_s0 = smov 96   ;;  %vm75_vm4 = vcmask 523520  }
   0xb   :  { %v50_v8 = vld [vmem:[#allocation0 + $0x3] ss:$8 sm:$0xf0]   ;;  %v60_v9 = vld [vmem:[#allocation0 + $0x2] ss:$8 sm:$0xf0]  }
   0xc   :  { %v70_v14 = vld [vmem:[#allocation0 + $0x1] ss:$8 sm:$0xf0]   ;;  %v42_v17 = vld [vmem:[#allocation0] ss:$8 sm:$0xf0]  }
   0xd   :  { %v48_v10 = vld [vmem:[#allocation0 + $0x3] ss:$8 sm:$0xf]   ;;  %v58_v11 = vld [vmem:[#allocation0 + $0x2] ss:$8 sm:$0xf]  }
   0xe   :  { %v52_v12 = vsel %vm43_vm0, %v50_v8, %v48_v10  ;;  %v68_v13 = vld [vmem:[#allocation0 + $0x1] ss:$8 sm:$0xf]   ;;  %v41_v16 = vld [vmem:[#allocation0] ss:$8 sm:$0xf]   ;;  %v62_v18 = vsel %vm43_vm0, %v60_v9, %v58_v11 }
   0xf   :  { %53 = vrot.lane.b32.xlu0 %v52_v12, %s93_s0  ;;  %v72_v15 = vsel %vm43_vm0, %v70_v14, %v68_v13  ;;  %v44_v19 = vsel %vm43_vm0, %v42_v17, %v41_v16 }
  0x10   :  { %73 = vrot.lane.b32.xlu1 %v72_v15, %s94_s22  ;;  %46 = vst.msk [vmem:[%s148_s1] sm:$0xff] %vm45_vm1, %v44_v19  }
  0x13   :  { %63 = vrot.lane.b32.xlu0 %v62_v18, %s95_s25 }
  0x81   :  { %v54_v20 = vpop.permute.xlu0 %53  }
  0x82   :  { %56 = vst.msk [vmem:[%s148_s1] sm:$0xff] %vm55_vm2, %v54_v20   ;;  %v74_v21 = vpop.permute.xlu1 %73  }
  0x85   :  { %v64_v22 = vpop.permute.xlu0 %63  }
  0x86   :  { %66 = vst.msk [vmem:[%s148_s1] sm:$0xff] %vm65_vm3, %v64_v22  }
  0x87   :  { %76 = vst.msk [vmem:[%s148_s1] sm:$0xff] %vm75_vm4, %v74_v21  }

// kernel: waveform_spectrogram_cross_encoder.3
= control target key start
LH: loop header
LB: loop body
LE: loop exit
PB: predicated region body
PF: predicated region fallthrough
CT: control target
= control target key end

     0   :  { %s276_s9 = smov 0   ;;  %s296_s0 = inlined_call_operand.vmem [shape: f32[2,16,128], index: 0, kind: input, shape index: {}]   ;;  %s297_s1 = inlined_call_operand.vmem [shape: f32[1,128], index: 1, kind: input, shape index: {}]   ;;  %s298_s2 = inlined_call_operand.vmem [shape: f32[2,16,128], index: 2, kind: output, shape index: {}]  }
   0x1 LB: > { %s227_s10 = sadd.s32 4294967295, %s259_s9   ;;  %p231_p0 = scmp.ge.s32.totalorder %s259_s9, 1  ;;  %s259_s9 = sphi %s276_s9, %s12_s9  }
   0x2   : > { %p112_p1 = scmp.lt.s32.totalorder %s259_s9, 3 }
   0x4   : > { %p113_p2 = pnand %p231_p0, %p112_p1 }
   0x5   : > { %p134_p3 = scmp.lt.s32.totalorder (!%p113_p2), %s227_s10, 1 }
   0x6   : > { %116 = sbr.rel (%p113_p2) target bundleno = 182 (0xb6), region = 28 }
   0xb   : > { %s300_s10 = smov (!%p134_p3, %s227_s10), 1  ;;  %v236_v11 = vld [vmem:[%s297_s1] ss:$0 sm:$0xff] }
   0xc   : > { %s239_s11 = sshll.u32 %s300_s10, 4 }
   0xd   : > { %s138_s14 = scalar_lea.vmem %s296_s0, %s239_s11  ;;  %s143_s19 = scalar_lea.vmem %s298_s2, %s239_s11 }
   0xe   : > { %v144_v0 = vld [vmem:[%s138_s14] sm:$0xff]  ;;  %v145_v1 = vld [vmem:[%s138_s14 + $0x8] sm:$0xff] }
   0xf   : > { %v146_v2 = vmul.f32 %v144_v0, %v144_v0  ;;  %v147_v3 = vmul.f32 %v145_v1, %v145_v1 }
  0x11   : > { %148 = vadd.xlane.f32.xlu0 %v146_v2 }
  0x15   : > { %150 = vadd.xlane.f32.xlu0 %v147_v3 }
  0x9a   : > { %v149_v4 = vpop.xlane.xlu0 %148 }
  0x9b   : > { %v153_v5 = vmul.f32 0.0078125, %v149_v4 }
  0x9d   : > { %v155_v6 = vadd.f32 1.1920929e-07, %v153_v5 }
  0x9e   : > { %v151_v7 = vpop.xlane.xlu0 %150 }
  0x9f   : > { %249 = vrsqrt.f32 %v155_v6  ;;  %v154_v8 = vmul.f32 0.0078125, %v151_v7 }
  0xa1   : > { %v156_v9 = vadd.f32 1.1920929e-07, %v154_v8 }
  0xa3   : > { %251 = vrsqrt.f32 %v156_v9 }
  0xac   : > { %v250_v10 = vpop.eup %249 }
  0xad   : > { %v159_v12 = vmul.f32 %v250_v10, %v144_v0 }
  0xaf   : > { %v168_v13 = vmul.f32 %v236_v11, %v159_v12 }
  0xb0   : > { %v252_v14 = vpop.eup %251 }
  0xb1   : > { %170 = vst [vmem:[%s143_s19] sm:$0xff] %v168_v13  ;;  %v160_v15 = vmul.f32 %v252_v14, %v145_v1 }
  0xb3   : > { %v169_v16 = vmul.f32 %v236_v11, %v160_v15 }
  0xb5   : > { %171 = vst [vmem:[%s143_s19 + $0x8] sm:$0xff] %v169_v16 }
  0xb6 PF: > { %s12_s9 = sadd.s32 1, %s259_s9  }
  0xb7   : > { %p9_p4 = scmp.ge.s32.totalorder %s12_s9, 4  }
  0xb9   :  { %11 = sbr.rel (!%p9_p4) target bundleno = 1 (0x1), region = 58 }

// kernel: waveform_spectrogram_cross_encoder.4
= control target key start
LH: loop header
LB: loop body
LE: loop exit
PB: predicated region body
PF: predicated region fallthrough
CT: control target
= control target key end

     0   :  { %s3379_s27 = smov 0   ;;  %s3381_s28 = smov 0   ;;  %s3917_s0 = inlined_call_operand.vmem [shape: f32[2,8,128], index: 0, kind: input, shape index: {}]   ;;  %s3918_s1 = inlined_call_operand.vmem [shape: f32[2,16,128], index: 1, kind: input, shape index: {}]   ;;  %s3919_s2 = inlined_call_operand.vmem [shape: f32[8,128], index: 2, kind: input, shape index: {}]   ;;  %s3920_s3 = inlined_call_operand.vmem [shape: f32[8,128], index: 3, kind: input, shape index: {}]   ;;  %s3921_s4 = inlined_call_operand.vmem [shape: f32[8,128], index: 4, kind: input, shape index: {}]   ;;  %s3922_s5 = inlined_call_operand.vmem [shape: f32[16,128], index: 5, kind: input, shape index: {}]   ;;  %s3923_s6 = inlined_call_operand.vmem [shape: f32[16,128], index: 6, kind: input, shape index: {}]   ;;  %s3924_s7 = inlined_call_operand.vmem [shape: f32[16,128], index: 7, kind: input, shape index: {}]   ;;  %s3925_s8 = inlined_call_operand.vmem [shape: f32[1,128], index: 8, kind: input, shape index: {}]   ;;  %s3926_s9 = inlined_call_operand.vmem [shape: bf16[128,128], index: 9, kind: input, shape index: {}]   ;;  %s3927_s10 = inlined_call_operand.vmem [shape: bf16[128,128], index: 10, kind: input, shape index: {}]   ;;  %s3928_s11 = inlined_call_operand.vmem [shape: bf16[128,128], index: 11, kind: input, shape index: {}]   ;;  %s3929_s12 = inlined_call_operand.vmem [shape: bf16[128,128], index: 12, kind: input, shape index: {}]   ;;  %s3930_s13 = inlined_call_operand.vmem [shape: f32[1,128], index: 13, kind: input, shape index: {}]   ;;  %s3931_s14 = inlined_call_operand.vmem [shape: bf16[128,341], index: 14, kind: input, shape index: {}]   ;;  %s3932_s15 = inlined_call_operand.vmem [shape: bf16[128,341], index: 15, kind: input, shape index: {}]   ;;  %s3933_s16 = inlined_call_operand.vmem [shape: bf16[341,128], index: 16, kind: input, shape index: {}]   ;;  %s3934_s17 = inlined_call_operand.vmem [shape: f32[1,128], index: 17, kind: input, shape index: {}]   ;;  %s3935_s18 = inlined_call_operand.vmem [shape: f32[2,8,128], index: 18, kind: output, shape index: {}]  }
   0x1   :  { %3938 = sst [smem:[#allocation5_spill]] %s3917_s0  ;;  %s3383_s29 = smov 0  }
   0x2   :  { %3939 = sst [smem:[#allocation6_spill]] %s3918_s1 }
   0x3   :  { %3940 = sst [smem:[#allocation7_spill]] %s3919_s2 }
   0x4 LB: > { %s40_s17 = sadd.s32 1, %s3269_s28  ;;  %p2620_p0 = scmp.ge.s32.totalorder %s3273_s29, 1  ;;  %s3273_s29 = sphi %s3383_s29, %s28_s29   ;;  %s3269_s28 = sphi %s3381_s28, %s3947_s28   ;;  %s3265_s27 = sphi %s3379_s27, %s3946_s27  }
   0x5   : > { %p42_p1 = scmp.ge.s32.totalorder %s40_s17, 2  ;;  %p567_p2 = scmp.lt.s32.totalorder %s3273_s29, 3 }
   0x7   : > { %s3949_s17 = smov (%p42_p1, %s40_s17), 0  ;;  %p568_p3 = pnand %p2620_p0, %p567_p2 }
   0x8   : > { %p642_p4 = scmp.lt.s32.totalorder (!%p568_p3), %s3265_s27, 1  ;;  %s3941_s2 = sld [smem:[#allocation5_spill]] (!%p568_p3) }
   0x9   : > { %571 = sbr.rel (%p568_p3) target bundleno = 3158 (0xc56), region = 92  ;;  %s3942_s30 = sld [smem:[#allocation6_spill]] (!%p568_p3) }
   0xa   : > { %s3944_s19 = sld [smem:[#allocation7_spill]] (!%p568_p3) }
   0xe   : > { %v3092_v0 = vld [vmem:[%s3927_s10 + $0x38] sm:$0xff]   ;;  %v3275_v1 = vmov 0.0   ;;  %v3093_v2 = vld [vmem:[%s3927_s10 + $0x30] sm:$0xff]   ;;  %s3951_s27 = smov (!%p642_p4, %s3265_s27), 1  ;;  %vm3276_vm0 = vmmov 0   ;;  %v3094_v3 = vld [vmem:[%s3927_s10 + $0x28] sm:$0xff]  }
   0xf   : > { %2875 = vmatprep.subr.bf16.mxu0 %v3275_v1  ;;  %2895 = vmatprep.subr.bf16.mxu1 %v3275_v1  ;;  %s3936_s20 = sshll.u32 %s3951_s27, 3  ;;  %v3095_v6 = vld [vmem:[%s3927_s10 + $0x20] sm:$0xff]   ;;  %v3096_v7 = vld [vmem:[%s3927_s10 + $0x18] sm:$0xff]   ;;  %v3097_v8 = vld [vmem:[%s3927_s10 + $0x10] sm:$0xff]   ;;  %s2758_s22 = sshll.u32 %s3951_s27, 4  ;;  %vm1079_vm1 = vcmask 261120  }
  0x10   : > { %2876 = vmatpush3.bf16.msra.mxu0 %v3092_v0  ;;  %2891 = vmatprep.mubr.msk.bf16.mxu0 %vm3276_vm0, %v3275_v1  ;;  %s3418_s23 = scalar_lea.vmem %s3941_s2, %s3936_s20  ;;  %v3098_v9 = vld [vmem:[%s3927_s10 + $0x8] sm:$0xff]   ;;  %s653_s0 = scalar_lea.vmem %s3942_s30, %s2758_s22  ;;  %v3099_v10 = vld [vmem:[%s3927_s10] sm:$0xff]   ;;  %v3100_v13 = vld [vmem:[%s3926_s9 + $0x38] sm:$0xff]   ;;  %vm1126_vm2 = vcmask 130048   ;;  %vm1189_vm3 = vcmask 257024   ;;  %vm1321_vm4 = vcmask 519424  }
  0x11   : > { %2877 = vmatprep.subr.bf16.mxu0 %v3275_v1  ;;  %2911 = vmatprep.mubr.msk.bf16.mxu1 %vm3276_vm0, %v3275_v1  ;;  %v3424_v4 = vld [vmem:[%s3418_s23] sm:$0xff]  ;;  %v679_v12 = vld [vmem:[%s653_s0 + $0x8] sm:$0xff]  ;;  %v3101_v15 = vld [vmem:[%s3926_s9 + $0x30] sm:$0xff]   ;;  %s3937_s30 = smov 1   ;;  %s3279_s22 = smov 96   ;;  %vm1452_vm5 = vcmask 781824  }
  0x12   : > { %v937_v5 = vmul.f32 %v3424_v4, %v3424_v4  ;;  %v678_v11 = vld [vmem:[%s653_s0] sm:$0xff]  ;;  %v3102_v16 = vld [vmem:[%s3926_s9 + $0x28] sm:$0xff]   ;;  %v3104_v18 = vld [vmem:[%s3926_s9 + $0x18] sm:$0xff]   ;;  %s3278_s0 = smov 127   ;;  %s3280_s2 = smov 64   ;;  %vm1583_vm6 = vcmask 1044224  }
  0x13   : > { %v3456_v14 = vpack.c.bf16 %v679_v12, %v678_v11  ;;  %v3103_v17 = vld [vmem:[%s3926_s9 + $0x20] sm:$0xff]   ;;  %v3105_v19 = vld [vmem:[%s3926_s9 + $0x10] sm:$0xff]   ;;  %v3106_v20 = vld [vmem:[%s3926_s9 + $0x8] sm:$0xff]   ;;  %s3281_s20 = smov 32   ;;  %vm2392_vm7 = vcmask 1041408   ;;  %vm2393_vm8 = vcmask 1042432  }
  0x14   : > { %2878 = vmatpush3.bf16.msra.mxu0 %v3093_v2  ;;  %938 = vadd.xlane.f32.xlu0 %v937_v5  ;;  %v3107_v21 = vld [vmem:[%s3926_s9] sm:$0xff]   ;;  %v3108_v22 = vld [vmem:[%s3928_s11 + $0x38] sm:$0xff]   ;;  %v3109_v23 = vld [vmem:[%s3928_s11 + $0x30] sm:$0xff]   ;;  %vm2388_vm9 = vcmask 695296   ;;  %s3945_s1 = sshll.u32 %s3951_s27, 3 }
  0x15   : > { %2879 = vmatprep.subr.bf16.mxu0 %v3275_v1  ;;  %2896 = vmatpush3.bf16.msra.mxu1 %v3108_v22  ;;  %v2645_v28 = vld [vmem:[%s3925_s8] ss:$0 sm:$0xff]  ;;  %v3110_v32 = vld [vmem:[%s3928_s11 + $0x28] sm:$0xff]   ;;  %v3112_v34 = vld [vmem:[%s3928_s11 + $0x18] sm:$0xff]  }
  0x16   : > { %2897 = vmatprep.subr.bf16.mxu1 %v3275_v1  ;;  %v3111_v33 = vld [vmem:[%s3928_s11 + $0x20] sm:$0xff]   ;;  %v3113_v35 = vld [vmem:[%s3928_s11 + $0x10] sm:$0xff]   ;;  %v3114_v38 = vld [vmem:[%s3928_s11 + $0x8] sm:$0xff]  }
  0x17   : > { %v3115_v41 = vld [vmem:[%s3928_s11] sm:$0xff]   ;;  %v894_v46 = vld [vmem:[%s3923_s6 + $0x8] sm:$0xff] }
  0x18   : > { %2880 = vmatpush3.bf16.msra.mxu0 %v3094_v3  ;;  %v893_v43 = vld [vmem:[%s3923_s6] sm:$0xff]  ;;  %v892_v48 = vld [vmem:[%s3922_s5 + $0x8] sm:$0xff] }
  0x19   : > { %2881 = vmatprep.subr.bf16.mxu0 %v3275_v1  ;;  %2898 = vmatpush3.bf16.msra.mxu1 %v3109_v23  ;;  %v891_v45 = vld [vmem:[%s3922_s5] sm:$0xff]  ;;  %v896_v53 = vld [vmem:[%s3924_s7 + $0x8] sm:$0xff] }
  0x1a   : > { %2899 = vmatprep.subr.bf16.mxu1 %v3275_v1  ;;  %v895_v49 = vld [vmem:[%s3924_s7] sm:$0xff] }
  0x1b   : > { %v1058_v11 = vld [vmem:[%s3920_s3] sm:$0xff] }
  0x1c   : > { %2882 = vmatpush3.bf16.msra.mxu0 %v3095_v6  ;;  %v1057_v12 = vld [vmem:[%s3944_s19] sm:$0xff] }
  0x1d   : > { %2883 = vmatprep.subr.bf16.mxu0 %v3275_v1  ;;  %2900 = vmatpush3.bf16.msra.mxu1 %v3110_v32 }
  0x1e   : > { %2901 = vmatprep.subr.bf16.mxu1 %v3275_v1 }
  0x20   : > { %2884 = vmatpush3.bf16.msra.mxu0 %v3096_v7 }
  0x21   : > { %2885 = vmatprep.subr.bf16.mxu0 %v3275_v1  ;;  %2902 = vmatpush3.bf16.msra.mxu1 %v3111_v33 }
  0x22   : > { %2903 = vmatprep.subr.bf16.mxu1 %v3275_v1 }
  0x24   : > { %2886 = vmatpush3.bf16.msra.mxu0 %v3097_v8 }
  0x25   : > { %2887 = vmatprep.subr.bf16.mxu0 %v3275_v1  ;;  %2904 = vmatpush3.bf16.msra.mxu1 %v3112_v34 }
  0x26   : > { %2905 = vmatprep.subr.bf16.mxu1 %v3275_v1 }
  0x28   : > { %2888 = vmatpush3.bf16.msra.mxu0 %v3098_v9 }
  0x29   : > { %2889 = vmatprep.subr.bf16.mxu0 %v3275_v1  ;;  %2906 = vmatpush3.bf16.msra.mxu1 %v3113_v35 }
  0x2a   : > { %2907 = vmatprep.subr.bf16.mxu1 %v3275_v1 }
  0x2c   : > { %2890 = vmatpush3.bf16.msra.mxu0 %v3099_v10 }
  0x2d   : > { %2915 = vmatprep.subr.bf16.mxu0 %v3275_v1  ;;  %2908 = vmatpush3.bf16.msra.mxu1 %v3114_v38 }
  0x2e   : > { %2909 = vmatprep.subr.bf16.mxu1 %v3275_v1 }
  0x2f   : > { %2892 = vmatmul.mubr.bf16.vlgmr.msra.gmra.mxu0 %v3456_v14 }
  0x30   : > { %2916 = vmatpush3.bf16.msra.mxu0 %v3100_v13  ;;  %2931 = vmatprep.mubr.msk.bf16.mxu0 %vm3276_vm0, %v3275_v1 }
  0x31   : > { %2917 = vmatprep.subr.bf16.mxu0 %v3275_v1  ;;  %2910 = vmatpush3.bf16.msra.mxu1 %v3115_v41 }
  0x32   : > { %2935 = vmatprep.subr.bf16.mxu1 %v3275_v1 }
  0x34   : > { %2918 = vmatpush3.bf16.msra.mxu0 %v3101_v15  ;;  %2912 = vmatmul.mubr.bf16.vlgmr.msra.gmra.mxu1 %v3456_v14  ;;  %v1059_v15 = vld [vmem:[%s3921_s4] sm:$0xff] }
  0x35   : > { %2919 = vmatprep.subr.bf16.mxu0 %v3275_v1  ;;  %2937 = vmatprep.mubr.msk.bf16.mxu1 %vm3276_vm0, %v3275_v1 }
  0x38   : > { %2920 = vmatpush3.bf16.msra.mxu0 %v3102_v16 }
  0x39   : > { %2921 = vmatprep.subr.bf16.mxu0 %v3275_v1 }
  0x3c   : > { %2922 = vmatpush3.bf16.msra.mxu0 %v3103_v17 }
  0x3d   : > { %2923 = vmatprep.subr.bf16.mxu0 %v3275_v1 }
  0x40   : > { %2924 = vmatpush3.bf16.msra.mxu0 %v3104_v18 }
  0x41   : > { %2925 = vmatprep.subr.bf16.mxu0 %v3275_v1 }
  0x44   : > { %2926 = vmatpush3.bf16.msra.mxu0 %v3105_v19 }
  0x45   : > { %2927 = vmatprep.subr.bf16.mxu0 %v3275_v1 }
  0x48   : > { %2928 = vmatpush3.bf16.msra.mxu0 %v3106_v20 }
  0x49   : > { %2929 = vmatprep.subr.bf16.mxu0 %v3275_v1 }
  0x4c   : > { %2930 = vmatpush3.bf16.msra.mxu0 %v3107_v21 }
  0x4d   : > { %2971 = vmatprep.subr.bf16.mxu0 %v3275_v1 }
  0x9d   : > { %v939_v24 = vpop.xlane.xlu0 %938 }
  0x9e   : > { %v941_v25 = vmul.f32 0.0078125, %v939_v24 }
  0xa0   : > { %v942_v26 = vadd.f32 1.1920929e-07, %v941_v25 }
  0xa2   : > { %3218 = vrsqrt.f32 %v942_v26 }
  0xaf   : > { %v3219_v27 = vpop.eup %3218 }
  0xb0   : > { %v944_v29 = vmul.f32 %v3219_v27, %v3424_v4 }
  0xb2   : > { %v951_v30 = vmul.f32 %v2645_v28, %v944_v29 }
  0xb4   : > { %v952_v31 = vpack.c.bf16 %v951_v30, %v951_v30 }
  0xb6   : > { %2932 = vmatmul.mubr.bf16.vlgmr.msra.gmra.mxu0 %v952_v31 }
  0xb7   : > { %2973 = vmatprep.mubr.msk.bf16.mxu0 %vm3276_vm0, %v3275_v1 }
  0xef   : > { %v779_v36 = vpop.f32.mrf.mxu0 }
  0xf0   : > { %901 = vrot.lane.b32.xlu1 %v779_v36, %s3937_s30  ;;  %897 = vrot.lane.b32.xlu0 %v779_v36, %s3278_s0  ;;  %v905_v51 = vmul.f32 %v891_v45, %v779_v36 }
  0xf1   : > { %v2893_v37 = vpop.f32.mrf.mxu0 }
  0xf3   : > { %v782_v39 = vpop.f32.mrf.mxu0 }
  0xf4   : > { %899 = vrot.lane.b32.xlu1 %v782_v39, %s3278_s0  ;;  %v906_v54 = vmul.f32 %v892_v48, %v782_v39  ;;  %v884_v6 = vpop.f32.mrf.mxu1 }
  0xf5   : > { %v2894_v40 = vpop.f32.mrf.mxu0 }
  0xf6   : > { %v2913_v7 = vpop.f32.mrf.mxu1 }
  0xf8   : > { %903 = vrot.lane.b32.xlu1 %v782_v39, %s3937_s30  ;;  %s3943_s30 = smov 1   ;;  %v887_v8 = vpop.f32.mrf.mxu1 }
  0xf9   : > { %v2774_v9 = vpack.c.bf16 %v887_v8, %v884_v6 }
  0xfa   : > { %v2914_v10 = vpop.f32.mrf.mxu1 }
  0xfb   : > { %2775 = vst [vmem:[#allocation3] sm:$0xff] %v2774_v9  }
 0x102   : > { %v3117_v22 = vld [vmem:[#allocation3] sm:$0xff]  }
 0x162   : > { %v902_v42 = vpop.permute.xlu1 %901  ;;  %v898_v44 = vpop.permute.xlu0 %897 }
 0x163   : > { %v907_v47 = vmul.f32 %v898_v44, %v893_v43  ;;  %v911_v55 = vmul.f32 %v902_v42, %v895_v49 }
 0x165   : > { %v909_v56 = vadd.f32 %v907_v47, %v905_v51  ;;  %v3119_v51 = vld [vmem:[#allocation3] sm:$0xff]  }
 0x166   : > { %v900_v50 = vpop.permute.xlu1 %899 }
 0x167   : > { %v908_v52 = vmul.f32 %v900_v50, %v894_v46  ;;  %v913_v60 = vadd.f32 %v911_v55, %v909_v56 }
 0x169   : > { %v910_v58 = vadd.f32 %v908_v52, %v906_v54 }
 0x16a   : > { %v904_v57 = vpop.permute.xlu1 %903 }
 0x16b   : > { %v912_v59 = vmul.f32 %v904_v57, %v896_v53 }
 0x16d   : > { %v914_v61 = vadd.f32 %v912_v59, %v910_v58 }
 0x16f   : > { %v2769_v62 = vpack.c.bf16 %v914_v61, %v913_v60 }
 0x171   : > { %2770 = vst [vmem:[#allocation2] sm:$0xff] %v2769_v62  }
 0x176   : > { %v1051_v0 = vpop.f32.mrf.mxu0 }
 0x177   : > { %1060 = vrot.lane.b32.xlu1 %v1051_v0, %s3278_s0  ;;  %v1064_v16 = vmul.f32 %v1057_v12, %v1051_v0 }
 0x178   : > { %v3116_v63 = vld [vmem:[#allocation2] sm:$0xff]   ;;  %v2933_v3 = vpop.f32.mrf.mxu0 }
 0x179   : > { %v1084_v2 = vsel %vm1079_vm1, %v3116_v63, 0  ;;  %v3118_v28 = vld [vmem:[#allocation2] sm:$0xff]  }
 0x17a   : > { %2936 = vmatpush3.bf16.xpose.msra.mxu1 %v1084_v2  ;;  %v1054_v4 = vpop.f32.mrf.mxu0  ;;  %v3120_v52 = vld [vmem:[#allocation2] sm:$0xff]  }
 0x17b   : > { %2941 = vmatprep.subr.bf16.mxu1 %v3275_v1  ;;  %1062 = vrot.lane.b32.xlu1 %v1051_v0, %s3943_s30  ;;  %v3121_v62 = vld [vmem:[#allocation2] sm:$0xff]  }
 0x17c   : > { %v2934_v5 = vpop.f32.mrf.mxu0 }
 0x1e9   : > { %v1061_v13 = vpop.permute.xlu1 %1060 }
 0x1ea   : > { %v1065_v14 = vmul.f32 %v1061_v13, %v1058_v11 }
 0x1ec   : > { %v1066_v18 = vadd.f32 %v1065_v14, %v1064_v16 }
 0x1ed   : > { %v1063_v17 = vpop.permute.xlu1 %1062 }
 0x1ee   : > { %v1067_v19 = vmul.f32 %v1063_v17, %v1059_v15 }
 0x1f0   : > { %v1068_v20 = vadd.f32 %v1067_v19, %v1066_v18 }
 0x1f2   : > { %v3567_v21 = vpack.c.bf16 %v1068_v20, %v1068_v20 }
 0x1f4   : > { %2938 = vmatmul.mubr.msk.bf16.vlgmr.msra.gmra.mxu1 %vm1079_vm1, %v3567_v21 }
 0x1f5   : > { %2943 = vmatprep.mubr.msk.bf16.mxu1 %vm3276_vm0, %v3275_v1  ;;  %2942 = vmatpush3.bf16.msra.mxu1 %v3117_v22 }
 0x1f6   : > { %2947 = vmatprep.subr.bf16.mxu1 %v3275_v1 }
 0x2b4   : > { %v1120_v23 = vpop.f32.mrf.mxu1 }
 0x2b5   : > { %v1127_v24 = vsel %vm1126_vm2, %v1120_v23, -inf }
 0x2b6   : > { %1128 = vmax.xlane.f32.xlu1 %v1127_v24  ;;  %v2939_v25 = vpop.f32.mrf.mxu1 }
 0x2b8   : > { %v1123_v26 = vpop.f32.mrf.mxu1 }
 0x2ba   : > { %v2940_v27 = vpop.f32.mrf.mxu1 }
 0x2c7   : > { %1203 = vrot.lane.b32.xlu1 %v3118_v28, %s3279_s22 }
 0x33f   : > { %v1129_v29 = vpop.xlane.xlu1 %1128 }
 0x340   : > { %v1130_v30 = vsub.f32 %v1120_v23, %v1129_v29  ;;  %v3122_v29 = vld [vmem:[#allocation3] sm:$0xff]  }
 0x342   : > { %v1131_v31 = vmul.f32 1.442695, %v1130_v30 }
 0x343   : > { %v1204_v37 = vpop.permute.xlu1 %1203 }
 0x344   : > { %3220 = vpow2.f32 %v1131_v31  ;;  %v1209_v39 = vsel %vm1079_vm1, %v1204_v37, 0 }
 0x351   : > { %v3221_v32 = vpop.eup %3220 }
 0x352   : > { %v1133_v33 = vsel %vm1126_vm2, %v3221_v32, 0.0 }
 0x353   : > { %1134 = vadd.xlane.f32.xlu0 %v1133_v33  ;;  %v3123_v33 = vld [vmem:[#allocation3] sm:$0xff]  }
 0x369   : > { %1196 = vrot.lane.b32.xlu0 %v3567_v21, %s3279_s22 }
 0x3dc   : > { %v1135_v34 = vpop.xlane.xlu0 %1134 }
 0x3dd   : > { %3222 = vrcp.f32 %v1135_v34 }
 0x3e0   : > { %v1197_v40 = vpop.permute.xlu0 %1196 }
 0x3ea   : > { %v3223_v35 = vpop.eup %3222 }
 0x3eb   : > { %v1137_v36 = vmul.f32 %v3223_v35, %v3221_v32 }
 0x3ed   : > { %v1138_v38 = vpack.c.bf16 %v1137_v36, %v1137_v36 }
 0x3ef   : > { %2944 = vmatmul.mubr.msk.bf16.vlgmr.msra.gmra.mxu1 %vm1126_vm2, %v1138_v38 }
 0x3f0   : > { %2948 = vmatpush3.bf16.xpose.msra.mxu1 %v1209_v39  ;;  %2949 = vmatprep.mubr.msk.bf16.mxu1 %vm3276_vm0, %v3275_v1 }
 0x3f1   : > { %2953 = vmatprep.subr.bf16.mxu1 %v3275_v1 }
 0x3f7   : > { %2950 = vmatmul.mubr.msk.bf16.vlgmr.msra.gmra.mxu1 %vm1079_vm1, %v1197_v40 }
 0x3f8   : > { %2955 = vmatprep.mubr.msk.bf16.mxu1 %vm3276_vm0, %v3275_v1 }
 0x4af   : > { %v1182_v41 = vpop.f32.mrf.mxu1 }
 0x4b0   : > { %v1188_v42 = vpack.c.bf16 %v1182_v41, %v1182_v41 }
 0x4b1   : > { %v2945_v43 = vpop.f32.mrf.mxu1 }
 0x4b2   : > { %1190 = vst.msk [vmem:[#allocation4] sm:$0xf] %vm1189_vm3, %v1188_v42 }
 0x4b3   : > { %v1185_v44 = vpop.f32.mrf.mxu1 }
 0x4b5   : > { %v2946_v45 = vpop.f32.mrf.mxu1 }
 0x4b6   : > { %v3124_v45 = vld [vmem:[%s3929_s12 + $0x38] sm:$0xff]  }
 0x4b7   : > { %v1245_v46 = vpop.f32.mrf.mxu1 }
 0x4b8   : > { %v1251_v47 = vsel %vm1126_vm2, %v1245_v46, -inf }
 0x4b9   : > { %1252 = vmax.xlane.f32.xlu1 %v1251_v47  ;;  %v2951_v48 = vpop.f32.mrf.mxu1  ;;  %v3126_v47 = vld [vmem:[%s3929_s12 + $0x28] sm:$0xff]  }
 0x4ba   : > { %v3127_v48 = vld [vmem:[%s3929_s12 + $0x20] sm:$0xff]  }
 0x4bb   : > { %v1248_v49 = vpop.f32.mrf.mxu1 }
 0x4bc   : > { %v3128_v49 = vld [vmem:[%s3929_s12 + $0x18] sm:$0xff]  }
 0x4bd   : > { %v2952_v50 = vpop.f32.mrf.mxu1 }
 0x4be   : > { %v3129_v50 = vld [vmem:[%s3929_s12 + $0x10] sm:$0xff]  }
 0x4ca   : > { %1268 = vrot.lane.b32.xlu1 %v3119_v51, %s3279_s22  ;;  %v3130_v51 = vld [vmem:[%s3929_s12 + $0x8] sm:$0xff]  }
 0x4ce   : > { %1327 = vrot.lane.b32.xlu1 %v3567_v21, %s3280_s2 }
 0x4d2   : > { %1465 = vrot.lane.b32.xlu1 %v3120_v52, %s3281_s20 }
 0x542   : > { %v1253_v53 = vpop.xlane.xlu1 %1252 }
 0x543   : > { %v1254_v54 = vsub.f32 %v1245_v46, %v1253_v53  ;;  %v3125_v46 = vld [vmem:[%s3929_s12 + $0x30] sm:$0xff]   ;;  %v3131_v53 = vld [vmem:[%s3929_s12] sm:$0xff]  }
 0x545   : > { %v1255_v55 = vmul.f32 1.442695, %v1254_v54 }
 0x546   : > { %v1269_v56 = vpop.permute.xlu1 %1268 }
 0x547   : > { %3224 = vpow2.f32 %v1255_v55  ;;  %2954 = vmatpush3.bf16.msra.mxu1 %v1269_v56 }
 0x548   : > { %2959 = vmatprep.subr.bf16.mxu1 %v3275_v1 }
 0x54a   : > { %v1328_v57 = vpop.permute.xlu1 %1327 }
 0x54e   : > { %v1466_v58 = vpop.permute.xlu1 %1465 }
 0x54f   : > { %v1471_v59 = vsel %vm1079_vm1, %v1466_v58, 0 }
 0x550   : > { %2972 = vmatpush3.bf16.xpose.msra.mxu0 %v1471_v59 }
 0x551   : > { %2983 = vmatprep.subr.bf16.mxu0 %v3275_v1 }
 0x554   : > { %v3225_v60 = vpop.eup %3224 }
 0x555   : > { %v1257_v61 = vsel %vm1126_vm2, %v3225_v60, 0.0 }
 0x556   : > { %1258 = vadd.xlane.f32.xlu0 %v1257_v61 }
 0x56c   : > { %1334 = vrot.lane.b32.xlu0 %v3121_v62, %s3280_s2 }
 0x570   : > { %1458 = vrot.lane.b32.xlu0 %v3567_v21, %s3281_s20 }
 0x5df   : > { %v1259_v63 = vpop.xlane.xlu0 %1258 }
 0x5e0   : > { %3226 = vrcp.f32 %v1259_v63 }
 0x5e3   : > { %v1335_v0 = vpop.permute.xlu0 %1334 }
 0x5e4   : > { %v1340_v6 = vsel %vm1079_vm1, %v1335_v0, 0 }
 0x5e7   : > { %v1459_v2 = vpop.permute.xlu0 %1458 }
 0x5e8   : > { %2974 = vmatmul.mubr.msk.bf16.vlgmr.msra.gmra.mxu0 %vm1079_vm1, %v1459_v2 }
 0x5e9   : > { %2999 = vmatprep.mubr.msk.bf16.mxu0 %vm3276_vm0, %v3275_v1  ;;  %2984 = vmatpush3.bf16.msra.mxu0 %v3124_v45 }
 0x5ea   : > { %2985 = vmatprep.subr.bf16.mxu0 %v3275_v1 }
 0x5ed   : > { %v3227_v3 = vpop.eup %3226  ;;  %2986 = vmatpush3.bf16.msra.mxu0 %v3125_v46  ;;  %v3170_v46 = vld [vmem:[%s3932_s15 + $0x94] ss:$12 sps:$4 sm:$0xff]  }
 0x5ee   : > { %v1261_v4 = vmul.f32 %v3227_v3, %v3225_v60  ;;  %2987 = vmatprep.subr.bf16.mxu0 %v3275_v1  ;;  %v3132_v3 = vld [vmem:[%s3931_s14 + $0xa8] ss:$12 sps:$4 sm:$0xff]  }
 0x5f0   : > { %v1262_v5 = vpack.c.bf16 %v1261_v4, %v1261_v4  ;;  %v3134_v4 = vld [vmem:[%s3931_s14 + $0xac] ss:$12 sps:$4 sm:$0xff]  }
 0x5f1   : > { %2988 = vmatpush3.bf16.msra.mxu0 %v3126_v47  ;;  %v3168_v47 = vld [vmem:[%s3932_s15 + $0x90] ss:$12 sps:$4 sm:$0xff]  }
 0x5f2   : > { %2956 = vmatmul.mubr.msk.bf16.vlgmr.msra.gmra.mxu1 %vm1126_vm2, %v1262_v5  ;;  %2989 = vmatprep.subr.bf16.mxu0 %v3275_v1  ;;  %v3135_v5 = vld [vmem:[%s3931_s14 + $0xb0] ss:$12 sps:$4 sm:$0xff]  }
 0x5f3   : > { %2960 = vmatpush3.bf16.xpose.msra.mxu1 %v1340_v6  ;;  %2961 = vmatprep.mubr.msk.bf16.mxu1 %vm3276_vm0, %v3275_v1  ;;  %v3138_v6 = vld [vmem:[%s3931_s14 + $0x94] ss:$12 sps:$4 sm:$0xff]  }
 0x5f4   : > { %2965 = vmatprep.subr.bf16.mxu1 %v3275_v1 }
 0x5f5   : > { %2990 = vmatpush3.bf16.msra.mxu0 %v3127_v48  ;;  %v3171_v48 = vld [vmem:[%s3932_s15 + $0x98] ss:$12 sps:$4 sm:$0xff]  }
 0x5f6   : > { %2991 = vmatprep.subr.bf16.mxu0 %v3275_v1 }
 0x5f9   : > { %2992 = vmatpush3.bf16.msra.mxu0 %v3128_v49  ;;  %v3174_v49 = vld [vmem:[%s3932_s15 + $0x7c] ss:$12 sps:$4 sm:$0xff]  }
 0x5fa   : > { %2962 = vmatmul.mubr.msk.bf16.vlgmr.msra.gmra.mxu1 %vm1079_vm1, %v1328_v57  ;;  %2993 = vmatprep.subr.bf16.mxu0 %v3275_v1 }
 0x5fb   : > { %2967 = vmatprep.mubr.msk.bf16.mxu1 %vm3276_vm0, %v3275_v1 }
 0x5fd   : > { %2994 = vmatpush3.bf16.msra.mxu0 %v3129_v50  ;;  %v3172_v50 = vld [vmem:[%s3932_s15 + $0x78] ss:$12 sps:$4 sm:$0xff]  }
 0x5fe   : > { %2995 = vmatprep.subr.bf16.mxu0 %v3275_v1 }
 0x601   : > { %2996 = vmatpush3.bf16.msra.mxu0 %v3130_v51  ;;  %v3175_v51 = vld [vmem:[%s3932_s15 + $0x80] ss:$12 sps:$4 sm:$0xff]  }
 0x602   : > { %2997 = vmatprep.subr.bf16.mxu0 %v3275_v1 }
 0x605   : > { %2998 = vmatpush3.bf16.msra.mxu0 %v3131_v53  ;;  %v3176_v53 = vld [vmem:[%s3932_s15 + $0x60] ss:$12 sps:$4 sm:$0xff]  }
 0x606   : > { %3003 = vmatprep.subr.bf16.mxu0 %v3275_v1 }
 0x6a8   : > { %v1507_v7 = vpop.f32.mrf.mxu0 }
 0x6a9   : > { %v1513_v8 = vsel %vm1126_vm2, %v1507_v7, -inf }
 0x6aa   : > { %1514 = vmax.xlane.f32.xlu0 %v1513_v8  ;;  %v2975_v9 = vpop.f32.mrf.mxu0  ;;  %v3136_v8 = vld [vmem:[%s3931_s14 + $0x90] ss:$12 sps:$4 sm:$0xff]  }
 0x6ab   : > { %v3142_v9 = vld [vmem:[%s3931_s14 + $0x7c] ss:$12 sps:$4 sm:$0xff]  }
 0x6ac   : > { %v1510_v10 = vpop.f32.mrf.mxu0 }
 0x6ad   : > { %v3140_v10 = vld [vmem:[%s3931_s14 + $0x78] ss:$12 sps:$4 sm:$0xff]  }
 0x6ae   : > { %v2976_v11 = vpop.f32.mrf.mxu0 }
 0x6b2   : > { %v1308_v12 = vpop.f32.mrf.mxu1 }
 0x6b3   : > { %v2763_v32 = vpack.c.bf16 %v1308_v12, %v1308_v12  ;;  %v3250_v12 = vld [vmem:[%s3418_s23] sm:$0xff] }
 0x6b4   : > { %v2957_v13 = vpop.f32.mrf.mxu1 }
 0x6b6   : > { %v1311_v14 = vpop.f32.mrf.mxu1 }
 0x6b8   : > { %v2958_v15 = vpop.f32.mrf.mxu1 }
 0x6ba   : > { %v1376_v16 = vpop.f32.mrf.mxu1 }
 0x6bb   : > { %v1382_v17 = vsel %vm1126_vm2, %v1376_v16, -inf }
 0x6bc   : > { %1383 = vmax.xlane.f32.xlu1 %v1382_v17  ;;  %v2963_v18 = vpop.f32.mrf.mxu1 }
 0x6bd   : > { %v3143_v18 = vld [vmem:[%s3931_s14 + $0x80] ss:$12 sps:$4 sm:$0xff]  }
 0x6be   : > { %v1379_v19 = vpop.f32.mrf.mxu1 }
 0x6bf   : > { %v3146_v19 = vld [vmem:[%s3931_s14 + $0x64] ss:$12 sps:$4 sm:$0xff]  }
 0x6c0   : > { %v2964_v20 = vpop.f32.mrf.mxu1 }
 0x6c1   : > { %v3144_v20 = vld [vmem:[%s3931_s14 + $0x60] ss:$12 sps:$4 sm:$0xff]  }
 0x733   : > { %v1515_v21 = vpop.xlane.xlu0 %1514 }
 0x734   : > { %v1516_v22 = vsub.f32 %v1507_v7, %v1515_v21  ;;  %v3139_v7 = vld [vmem:[%s3931_s14 + $0x98] ss:$12 sps:$4 sm:$0xff]   ;;  %v3147_v21 = vld [vmem:[%s3931_s14 + $0x68] ss:$12 sps:$4 sm:$0xff]  }
 0x736   : > { %v1517_v23 = vmul.f32 1.442695, %v1516_v22  ;;  %v3150_v22 = vld [vmem:[%s3931_s14 + $0x4c] ss:$12 sps:$4 sm:$0xff]  }
 0x738   : > { %3228 = vpow2.f32 %v1517_v23  ;;  %v3148_v23 = vld [vmem:[%s3931_s14 + $0x48] ss:$12 sps:$4 sm:$0xff]  }
 0x745   : > { %v3229_v24 = vpop.eup %3228  ;;  %v1384_v25 = vpop.xlane.xlu1 %1383 }
 0x746   : > { %v1385_v26 = vsub.f32 %v1376_v16, %v1384_v25  ;;  %v1519_v27 = vsel %vm1126_vm2, %v3229_v24, 0.0  ;;  %v3154_v25 = vld [vmem:[%s3931_s14 + $0x34] ss:$12 sps:$4 sm:$0xff]  }
 0x747   : > { %1520 = vadd.xlane.f32.xlu1 %v1519_v27  ;;  %v3152_v27 = vld [vmem:[%s3931_s14 + $0x30] ss:$12 sps:$4 sm:$0xff]  }
 0x748   : > { %v1386_v28 = vmul.f32 1.442695, %v1385_v26  ;;  %v3282_v26 = vmov 0  }
 0x74a   : > { %3230 = vpow2.f32 %v1386_v28  ;;  %v3155_v28 = vld [vmem:[%s3931_s14 + $0x38] ss:$12 sps:$4 sm:$0xff]  }
 0x757   : > { %v3231_v30 = vpop.eup %3230 }
 0x758   : > { %1530 = vrot.lane.b32.xlu1 %v3122_v29, %s3281_s20  ;;  %v1388_v31 = vsel %vm1126_vm2, %v3231_v30, 0.0  ;;  %v3158_v29 = vld [vmem:[%s3931_s14 + $0x1c] ss:$12 sps:$4 sm:$0xff]  }
 0x759   : > { %1389 = vadd.xlane.f32.xlu0 %v1388_v31  ;;  %v3159_v31 = vld [vmem:[%s3931_s14 + $0x20] ss:$12 sps:$4 sm:$0xff]  }
 0x75c   : > { %1318 = vrot.lane.b32.xlu1 %v2763_v32, %s3281_s20  ;;  %v3162_v32 = vld [vmem:[%s3931_s14 + $0x4] ss:$12 sps:$4 sm:$0xff]   ;;  %s672_s20 = scalar_lea.vmem %s3935_s18, %s3945_s1 }
 0x76f   : > { %1399 = vrot.lane.b32.xlu0 %v3123_v33, %s3280_s2  ;;  %v3160_v33 = vld [vmem:[%s3931_s14] ss:$12 sps:$4 sm:$0xff]  }
 0x7d0   : > { %v1521_v34 = vpop.xlane.xlu1 %1520 }
 0x7d4   : > { %v1531_v35 = vpop.permute.xlu1 %1530 }
 0x7d8   : > { %v1319_v36 = vpop.permute.xlu1 %1318 }
 0x7d9   : > { %1322 = vst.msk [vmem:[#allocation4] sm:$0xf] %vm1321_vm4, %v1319_v36 }
 0x7e2   : > { %v1390_v37 = vpop.xlane.xlu0 %1389 }
 0x7e3   : > { %3232 = vrcp.f32 %v1390_v37 }
 0x7e4   : > { %3234 = vrcp.f32 %v1521_v34  ;;  %v3163_v34 = vld [vmem:[%s3931_s14 + $0x8] ss:$12 sps:$4 sm:$0xff]  }
 0x7e6   : > { %v1400_v38 = vpop.permute.xlu0 %1399 }
 0x7e7   : > { %2966 = vmatpush3.bf16.msra.mxu1 %v1400_v38 }
 0x7e8   : > { %2977 = vmatprep.subr.bf16.mxu1 %v3275_v1 }
 0x7f0   : > { %v3233_v39 = vpop.eup %3232 }
 0x7f1   : > { %v1392_v40 = vmul.f32 %v3233_v39, %v3231_v30  ;;  %v3235_v42 = vpop.eup %3234  ;;  %v3156_v30 = vld [vmem:[%s3931_s14 + $0x18] ss:$12 sps:$4 sm:$0xff]  }
 0x7f2   : > { %v1523_v43 = vmul.f32 %v3235_v42, %v3229_v24  ;;  %v3151_v24 = vld [vmem:[%s3931_s14 + $0x50] ss:$12 sps:$4 sm:$0xff]  }
 0x7f3   : > { %v1393_v41 = vpack.c.bf16 %v1392_v40, %v1392_v40  ;;  %v2681_v40 = vld [vmem:[%s3930_s13] ss:$0 sm:$0xff] }
 0x7f4   : > { %v1524_v44 = vpack.c.bf16 %v1523_v43, %v1523_v43  ;;  %v3164_v43 = vld [vmem:[%s3932_s15 + $0xa8] ss:$12 sps:$4 sm:$0xff]  }
 0x7f5   : > { %2968 = vmatmul.mubr.msk.bf16.vlgmr.msra.gmra.mxu1 %vm1126_vm2, %v1393_v41 }
 0x7f6   : > { %2978 = vmatpush3.bf16.msra.mxu1 %v1531_v35  ;;  %2979 = vmatprep.mubr.msk.bf16.mxu1 %vm3276_vm0, %v3275_v1  ;;  %v3166_v35 = vld [vmem:[%s3932_s15 + $0xac] ss:$12 sps:$4 sm:$0xff]  }
 0x7f7   : > { %1867 = vmatprep.subr.bf16.mxu1 %v3134_v4  ;;  %v3196_v4 = vld [vmem:[%s3933_s16 + $0x78] sm:$0xff]  }
 0x7fd   : > { %2980 = vmatmul.mubr.msk.bf16.vlgmr.msra.gmra.mxu1 %vm1126_vm2, %v1524_v44  ;;  %v3167_v44 = vld [vmem:[%s3932_s15 + $0xb0] ss:$12 sps:$4 sm:$0xff]  }
 0x7fe   : > { %1868 = vmatpush1.bf16.msra.mxu1 %v3132_v3  ;;  %1899 = vmatprep.mubr.bf16.mxu1 %v3282_v26  ;;  %v3195_v3 = vld [vmem:[%s3932_s15 + $0x8] ss:$12 sps:$4 sm:$0xff]  }
 0x7ff   : > { %1869 = vmatprep.subr.bf16.mxu1 %v3138_v6  ;;  %v3198_v6 = vld [vmem:[%s3933_s16 + $0x70] sm:$0xff]  }
 0x802   : > { %1870 = vmatpush1.bf16.msra.mxu1 %v3136_v8  ;;  %v3283_v8 = vmov 65535  }
 0x803   : > { %1871 = vmatprep.subr.bf16.mxu1 %v3142_v9  ;;  %v2394_v9 = vsel %vm2392_vm7, 4294967295, %v3283_v8 }
 0x806   : > { %1872 = vmatpush1.bf16.msra.mxu1 %v3140_v10  ;;  %v3199_v10 = vld [vmem:[%s3933_s16 + $0x30] sm:$0xff]  }
 0x807   : > { %1873 = vmatprep.subr.bf16.mxu1 %v3146_v19  ;;  %v3206_v19 = vld [vmem:[%s3933_s16 + $0x98] sm:$0xff]  }
 0x80a   : > { %1874 = vmatpush1.bf16.msra.mxu1 %v3144_v20  ;;  %v3207_v20 = vld [vmem:[%s3933_s16 + $0x58] sm:$0xff]  }
 0x80b   : > { %1875 = vmatprep.subr.bf16.mxu1 %v3150_v22  ;;  %v3209_v22 = vld [vmem:[%s3933_s16 + $0x90] sm:$0xff]  }
 0x80e   : > { %1876 = vmatpush1.bf16.msra.mxu1 %v3148_v23  ;;  %v3210_v23 = vld [vmem:[%s3933_s16 + $0x50] sm:$0xff]  }
 0x80f   : > { %1877 = vmatprep.subr.bf16.mxu1 %v3154_v25  ;;  %v3212_v25 = vld [vmem:[%s3933_s16 + $0x88] sm:$0xff]  }
 0x812   : > { %1878 = vmatpush1.bf16.msra.mxu1 %v3152_v27  ;;  %v3214_v27 = vld [vmem:[%s3933_s16 + $0x8] sm:$0xff]  }
 0x813   : > { %1879 = vmatprep.subr.bf16.mxu1 %v3158_v29  ;;  %v3216_v29 = vld [vmem:[%s3933_s16 + $0x40] sm:$0xff]  }
 0x816   : > { %1880 = vmatpush1.bf16.msra.mxu1 %v3156_v30  ;;  %v3217_v30 = vld [vmem:[%s3933_s16] sm:$0xff]  }
 0x817   : > { %1881 = vmatprep.subr.bf16.mxu1 %v3162_v32 }
 0x81a   : > { %1882 = vmatpush1.bf16.msra.mxu1 %v3160_v33 }
 0x81b   : > { %2108 = vmatprep.subr.bf16.mxu1 %v3166_v35 }
 0x8b5   : > { %v1439_v52 = vpop.f32.mrf.mxu1 }
 0x8b6   : > { %v2764_v54 = vpack.c.bf16 %v1439_v52, %v1439_v52  ;;  %v3178_v52 = vld [vmem:[%s3932_s15 + $0x64] ss:$12 sps:$4 sm:$0xff]  }
 0x8b7   : > { %v2969_v55 = vpop.f32.mrf.mxu1 }
 0x8b8   : > { %1449 = vrot.lane.b32.xlu0 %v2764_v54, %s3280_s2  ;;  %v3179_v54 = vld [vmem:[%s3932_s15 + $0x68] ss:$12 sps:$4 sm:$0xff]   ;;  %v3182_v55 = vld [vmem:[%s3932_s15 + $0x4c] ss:$12 sps:$4 sm:$0xff]  }
 0x8b9   : > { %v1442_v56 = vpop.f32.mrf.mxu1 }
 0x8ba   : > { %v3180_v56 = vld [vmem:[%s3932_s15 + $0x48] ss:$12 sps:$4 sm:$0xff]  }
 0x8bb   : > { %v2970_v57 = vpop.f32.mrf.mxu1 }
 0x8bc   : > { %v3183_v57 = vld [vmem:[%s3932_s15 + $0x50] ss:$12 sps:$4 sm:$0xff]  }
 0x8bd   : > { %v1570_v58 = vpop.f32.mrf.mxu1 }
 0x8be   : > { %v2765_v59 = vpack.c.bf16 %v1570_v58, %v1570_v58  ;;  %v3186_v58 = vld [vmem:[%s3932_s15 + $0x34] ss:$12 sps:$4 sm:$0xff]  }
 0x8bf   : > { %v2981_v60 = vpop.f32.mrf.mxu1 }
 0x8c0   : > { %1580 = vrot.lane.b32.xlu1 %v2765_v59, %s3279_s22  ;;  %v3184_v59 = vld [vmem:[%s3932_s15 + $0x30] ss:$12 sps:$4 sm:$0xff]   ;;  %v3187_v60 = vld [vmem:[%s3932_s15 + $0x38] ss:$12 sps:$4 sm:$0xff]  }
 0x8c1   : > { %v1573_v61 = vpop.f32.mrf.mxu1 }
 0x8c2   : > { %v3190_v61 = vld [vmem:[%s3932_s15 + $0x1c] ss:$12 sps:$4 sm:$0xff]  }
 0x8c3   : > { %v2982_v62 = vpop.f32.mrf.mxu1 }
 0x8c4   : > { %v3188_v62 = vld [vmem:[%s3932_s15 + $0x18] ss:$12 sps:$4 sm:$0xff]  }
 0x92a   : > { %v1450_v63 = vpop.permute.xlu0 %1449 }
 0x92b   : > { %1453 = vst.msk [vmem:[#allocation4] sm:$0xf] %vm1452_vm5, %v1450_v63  ;;  %v3191_v63 = vld [vmem:[%s3932_s15 + $0x20] ss:$12 sps:$4 sm:$0xff]  }
 0x932   : > { %v1581_v0 = vpop.permute.xlu1 %1580 }
 0x933   : > { %1584 = vst.msk [vmem:[#allocation4] sm:$0xf] %vm1583_vm6, %v1581_v0  ;;  %v3194_v0 = vld [vmem:[%s3932_s15 + $0x4] ss:$12 sps:$4 sm:$0xff]  }
 0x93a   : > { %v1585_v2 = vld [vmem:[#allocation4] sm:$0xf] }
 0x93b   : > { %3000 = vmatmul.mubr.bf16.vlgmr.msra.gmra.mxu0 %v1585_v2  ;;  %v3192_v2 = vld [vmem:[%s3932_s15] ss:$12 sps:$4 sm:$0xff]  }
 0x93c   : > { %3019 = vmatprep.mubr.msk.bf16.mxu0 %vm3276_vm0, %v3275_v1  ;;  %3004 = vmatpush3.bf16.msra.mxu0 %v3135_v5  ;;  %v3197_v5 = vld [vmem:[%s3933_s16 + $0x38] sm:$0xff]  }
 0x93d   : > { %3005 = vmatprep.subr.bf16.mxu0 %v3275_v1 }
 0x940   : > { %3006 = vmatpush3.bf16.msra.mxu0 %v3139_v7  ;;  %v3200_v7 = vld [vmem:[%s3933_s16 + $0xa8] ss:$0 sps:$4 sm:$0x77]  }
 0x941   : > { %3007 = vmatprep.subr.bf16.mxu0 %v3275_v1 }
 0x944   : > { %3008 = vmatpush3.bf16.msra.mxu0 %v3143_v18  ;;  %v3205_v18 = vld [vmem:[%s3933_s16 + $0x20] sm:$0xff]  }
 0x945   : > { %3009 = vmatprep.subr.bf16.mxu0 %v3275_v1 }
 0x948   : > { %3010 = vmatpush3.bf16.msra.mxu0 %v3147_v21  ;;  %v3208_v21 = vld [vmem:[%s3933_s16 + $0x18] sm:$0xff]  }
 0x949   : > { %3011 = vmatprep.subr.bf16.mxu0 %v3275_v1 }
 0x94c   : > { %3012 = vmatpush3.bf16.msra.mxu0 %v3151_v24  ;;  %v3211_v24 = vld [vmem:[%s3933_s16 + $0x10] sm:$0xff]  }
 0x94d   : > { %3013 = vmatprep.subr.bf16.mxu0 %v3275_v1 }
 0x950   : > { %3014 = vmatpush3.bf16.msra.mxu0 %v3155_v28  ;;  %v3215_v28 = vld [vmem:[%s3933_s16 + $0x80] sm:$0xff]  }
 0x951   : > { %3015 = vmatprep.subr.bf16.mxu0 %v3275_v1 }
 0x954   : > { %3016 = vmatpush3.bf16.msra.mxu0 %v3159_v31 }
 0x955   : > { %3017 = vmatprep.subr.bf16.mxu0 %v3275_v1 }
 0x958   : > { %3018 = vmatpush3.bf16.msra.mxu0 %v3163_v34 }
 0x959   : > { %3023 = vmatprep.subr.bf16.mxu0 %v3275_v1 }
 0x9fb   : > { %v1684_v11 = vpop.f32.mrf.mxu0 }
 0x9fc   : > { %v3685_v13 = vadd.f32 %v3250_v12, %v1684_v11  ;;  %v2395_v11 = vsel %vm2393_vm8, %v2394_v9, 0 }
 0x9fd   : > { %v3001_v14 = vpop.f32.mrf.mxu0  ;;  %v2397_v12 = vand.u32 %v3200_v7, %v2395_v11 }
 0x9fe   : > { %v1692_v15 = vmul.f32 %v3685_v13, %v3685_v13  ;;  %v3201_v14 = vld [vmem:[%s3933_s16 + $0x68] sm:$0xff]  }
 0x9ff   : > { %v1687_v16 = vpop.f32.mrf.mxu0 }
 0xa00   : > { %1693 = vadd.xlane.f32.xlu0 %v1692_v15  ;;  %v3202_v15 = vld [vmem:[%s3933_s16 + $0x28] sm:$0xff]   ;;  %v3203_v16 = vld [vmem:[%s3933_s16 + $0xa0] sm:$0xff]  }
 0xa01   : > { %v3002_v17 = vpop.f32.mrf.mxu0 }
 0xa02   : > { %v3204_v17 = vld [vmem:[%s3933_s16 + $0x60] sm:$0xff]  }
 0xa89   : > { %v1694_v36 = vpop.xlane.xlu0 %1693 }
 0xa8a   : > { %v1695_v37 = vmul.f32 0.0078125, %v1694_v36 }
 0xa8c   : > { %v1696_v38 = vadd.f32 1.1920929e-07, %v1695_v37 }
 0xa8e   : > { %3236 = vrsqrt.f32 %v1696_v38 }
 0xa9b   : > { %v3237_v39 = vpop.eup %3236 }
 0xa9c   : > { %v1698_v41 = vmul.f32 %v3237_v39, %v3685_v13 }
 0xa9e   : > { %v1705_v42 = vmul.f32 %v2681_v40, %v1698_v41 }
 0xaa0   : > { %v1706_v45 = vpack.c.bf16 %v1705_v42, %v1705_v42 }
 0xaa2   : > { %1900 = vmatmul.mubr.bf16.vlgmr.msra.gmra.mxu1 %v1706_v45  ;;  %3020 = vmatmul.mubr.bf16.vlgmr.msra.gmra.mxu0 %v1706_v45 }
 0xaa3   : > { %2109 = vmatpush1.bf16.msra.mxu1 %v3164_v43  ;;  %3024 = vmatpush3.bf16.msra.mxu0 %v3167_v44 }
 0xaa4   : > { %2110 = vmatprep.subr.bf16.mxu1 %v3170_v46  ;;  %3025 = vmatprep.subr.bf16.mxu0 %v3275_v1 }
 0xaa5   : > { %2140 = vmatprep.mubr.bf16.mxu1 %v3282_v26  ;;  %3039 = vmatprep.mubr.msk.bf16.mxu0 %vm3276_vm0, %v3275_v1  ;;  %v3213_v26 = vld [vmem:[%s3933_s16 + $0x48] sm:$0xff]  }
 0xaa7   : > { %2111 = vmatpush1.bf16.msra.mxu1 %v3168_v47  ;;  %3026 = vmatpush3.bf16.msra.mxu0 %v3171_v48 }
 0xaa8   : > { %2112 = vmatprep.subr.bf16.mxu1 %v3174_v49  ;;  %3027 = vmatprep.subr.bf16.mxu0 %v3275_v1 }
 0xaab   : > { %2113 = vmatpush1.bf16.msra.mxu1 %v3172_v50  ;;  %3028 = vmatpush3.bf16.msra.mxu0 %v3175_v51 }
 0xaac   : > { %2114 = vmatprep.subr.bf16.mxu1 %v3178_v52  ;;  %3029 = vmatprep.subr.bf16.mxu0 %v3275_v1 }
 0xaaf   : > { %2115 = vmatpush1.bf16.msra.mxu1 %v3176_v53  ;;  %3030 = vmatpush3.bf16.msra.mxu0 %v3179_v54 }
 0xab0   : > { %2116 = vmatprep.subr.bf16.mxu1 %v3182_v55  ;;  %3031 = vmatprep.subr.bf16.mxu0 %v3275_v1 }
 0xab3   : > { %2117 = vmatpush1.bf16.msra.mxu1 %v3180_v56  ;;  %3032 = vmatpush3.bf16.msra.mxu0 %v3183_v57 }
 0xab4   : > { %2118 = vmatprep.subr.bf16.mxu1 %v3186_v58  ;;  %3033 = vmatprep.subr.bf16.mxu0 %v3275_v1 }
 0xab7   : > { %2119 = vmatpush1.bf16.msra.mxu1 %v3184_v59  ;;  %3034 = vmatpush3.bf16.msra.mxu0 %v3187_v60 }
 0xab8   : > { %2120 = vmatprep.subr.bf16.mxu1 %v3190_v61  ;;  %3035 = vmatprep.subr.bf16.mxu0 %v3275_v1 }
 0xabb   : > { %2121 = vmatpush1.bf16.msra.mxu1 %v3188_v62  ;;  %3036 = vmatpush3.bf16.msra.mxu0 %v3191_v63 }
 0xabc   : > { %2122 = vmatprep.subr.bf16.mxu1 %v3194_v0  ;;  %3037 = vmatprep.subr.bf16.mxu0 %v3275_v1 }
 0xabf   : > { %2123 = vmatpush1.bf16.msra.mxu1 %v3192_v2  ;;  %3038 = vmatpush3.bf16.msra.mxu0 %v3195_v3 }
 0xac0   : > { %3043 = vmatprep.subr.bf16.mxu0 %v3275_v1  ;;  %2846 = vmatprep.subr.bf16.mxu1 %v3196_v4 }
 0xac2   : > { %2141 = vmatmul.mubr.bf16.vlgmr.msra.gmra.mxu1 %v1706_v45  ;;  %3040 = vmatmul.mubr.bf16.vlgmr.msra.gmra.mxu0 %v1706_v45 }
 0xac3   : > { %3055 = vmatprep.mubr.msk.bf16.mxu0 %vm3276_vm0, %v3275_v1  ;;  %2847 = vmatpush3.bf16.msra.mxu1 %v3197_v5 }
 0xac4   : > { %2848 = vmatprep.subr.bf16.mxu1 %v3198_v6  ;;  %3044 = vmatpush3.bf16.msra.mxu0 %v2397_v12 }
 0xac5   : > { %3045 = vmatprep.subr.bf16.mxu0 %v3275_v1 }
 0xac7   : > { %2849 = vmatpush3.bf16.msra.mxu1 %v3199_v10 }
 0xac8   : > { %2850 = vmatprep.subr.bf16.mxu1 %v3201_v14  ;;  %3046 = vmatpush3.bf16.msra.mxu0 %v3203_v16 }
 0xac9   : > { %3047 = vmatprep.subr.bf16.mxu0 %v3275_v1 }
 0xacb   : > { %2851 = vmatpush3.bf16.msra.mxu1 %v3202_v15 }
 0xacc   : > { %2852 = vmatprep.subr.bf16.mxu1 %v3204_v17  ;;  %3048 = vmatpush3.bf16.msra.mxu0 %v3206_v19 }
 0xacd   : > { %3049 = vmatprep.subr.bf16.mxu0 %v3275_v1 }
 0xacf   : > { %2853 = vmatpush3.bf16.msra.mxu1 %v3205_v18 }
 0xad0   : > { %2854 = vmatprep.subr.bf16.mxu1 %v3207_v20  ;;  %3050 = vmatpush3.bf16.msra.mxu0 %v3209_v22 }
 0xad1   : > { %3051 = vmatprep.subr.bf16.mxu0 %v3275_v1 }
 0xad3   : > { %2855 = vmatpush3.bf16.msra.mxu1 %v3208_v21 }
 0xad4   : > { %2856 = vmatprep.subr.bf16.mxu1 %v3210_v23  ;;  %3052 = vmatpush3.bf16.msra.mxu0 %v3212_v25 }
 0xad5   : > { %3053 = vmatprep.subr.bf16.mxu0 %v3275_v1 }
 0xad7   : > { %2857 = vmatpush3.bf16.msra.mxu1 %v3211_v24 }
 0xad8   : > { %2858 = vmatprep.subr.bf16.mxu1 %v3213_v26  ;;  %3054 = vmatpush3.bf16.msra.mxu0 %v3215_v28 }
 0xadb   : > { %2859 = vmatpush3.bf16.msra.mxu1 %v3214_v27 }
 0xadc   : > { %2860 = vmatprep.subr.bf16.mxu1 %v3216_v29 }
 0xadf   : > { %2861 = vmatpush3.bf16.msra.mxu1 %v3217_v30 }
 0xb62   : > { %v1901_v31 = vpop.f32.mrf.mxu1  ;;  %v1942_v32 = vpop.f32.mrf.mxu0 }
 0xb63   : > { %v2730_v1 = vmul.f32 -1.442695, %v1901_v31  ;;  %v2732_v33 = vmul.f32 -1.442695, %v1942_v32 }
 0xb64   : > { %v1903_v34 = vpop.f32.mrf.mxu1  ;;  %v3021_v35 = vpop.f32.mrf.mxu0 }
 0xb65   : > { %3238 = vpow2.f32 %v2730_v1  ;;  %v2731_v36 = vmul.f32 -1.442695, %v1903_v34 }
 0xb66   : > { %3240 = vpow2.f32 %v2732_v33  ;;  %v1905_v37 = vpop.f32.mrf.mxu1  ;;  %v1945_v38 = vpop.f32.mrf.mxu0 }
 0xb67   : > { %3242 = vpow2.f32 %v2731_v36 }
 0xb68   : > { %v1906_v39 = vpop.f32.mrf.mxu1  ;;  %v3022_v40 = vpop.f32.mrf.mxu0 }
 0xb72   : > { %v3239_v41 = vpop.eup %3238 }
 0xb73   : > { %v3241_v42 = vpop.eup %3240  ;;  %v2198_v43 = vadd.f32 1.0, %v3239_v41 }
 0xb74   : > { %v3243_v44 = vpop.eup %3242  ;;  %v2200_v45 = vadd.f32 1.0, %v3241_v42 }
 0xb75   : > { %3244 = vrcp.f32 %v2198_v43  ;;  %v2199_v46 = vadd.f32 1.0, %v3243_v44 }
 0xb76   : > { %3246 = vrcp.f32 %v2200_v45 }
 0xb77   : > { %3248 = vrcp.f32 %v2199_v46 }
 0xb82   : > { %v3245_v47 = vpop.eup %3244  ;;  %v2142_v48 = vpop.f32.mrf.mxu1 }
 0xb83   : > { %v2183_v49 = vpop.f32.mrf.mxu0  ;;  %v3247_v50 = vpop.eup %3246  ;;  %v2207_v51 = vmul.f32 %v3245_v47, %v1901_v31 }
 0xb84   : > { %v3249_v52 = vpop.eup %3248  ;;  %v2209_v53 = vmul.f32 %v3247_v50, %v1942_v32  ;;  %v2144_v54 = vpop.f32.mrf.mxu1 }
 0xb85   : > { %v3041_v55 = vpop.f32.mrf.mxu0  ;;  %v2208_v56 = vmul.f32 %v3249_v52, %v1903_v34  ;;  %v2210_v57 = vmul.f32 %v2207_v51, %v2142_v48 }
 0xb86   : > { %v2212_v58 = vmul.f32 %v2209_v53, %v2183_v49  ;;  %v2146_v59 = vpop.f32.mrf.mxu1 }
 0xb87   : > { %v2186_v60 = vpop.f32.mrf.mxu0  ;;  %v2211_v61 = vmul.f32 %v2208_v56, %v2144_v54  ;;  %v2213_v3 = vpack.c.bf16 %v2210_v57, %v2210_v57 }
 0xb88   : > { %v2215_v62 = vpack.c.bf16 %v2212_v58, %v2212_v58  ;;  %v2147_v63 = vpop.f32.mrf.mxu1 }
 0xb89   : > { %v3042_v0 = vpop.f32.mrf.mxu0  ;;  %v2214_v2 = vpack.c.bf16 %v2211_v61, %v2211_v61 }
 0xb8a   : > { %3056 = vmatmul.mubr.msk.bf16.vlgmr.msra.gmra.mxu0 %vm2388_vm9, %v2215_v62 }
 0xb8b   : > { %2431 = vmatprep.mubr.bf16.mxu1 %v2214_v2 }
 0xb8c   : > { %2432 = vmatmul.mubr.bf16.vlgmr.msra.gmra.mxu1 %v2213_v3 }
 0xc4a   : > { %v2473_v4 = vpop.f32.mrf.mxu0 }
 0xc4c   : > { %v3057_v5 = vpop.f32.mrf.mxu0  ;;  %v2862_v6 = vpop.f32.mrf.mxu1 }
 0xc4e   : > { %v2476_v7 = vpop.f32.mrf.mxu0  ;;  %v2863_v8 = vpop.f32.mrf.mxu1 }
 0xc4f   : > { %v2864_v9 = vadd.f32 %v2863_v8, %v2862_v6 }
 0xc50   : > { %v3058_v10 = vpop.f32.mrf.mxu0  ;;  %v2865_v11 = vpop.f32.mrf.mxu1 }
 0xc51   : > { %v2474_v12 = vadd.f32 %v2864_v9, %v2473_v4 }
 0xc52   : > { %v2866_v14 = vpop.f32.mrf.mxu1 }
 0xc53   : > { %v2479_v15 = vadd.f32 %v2474_v12, %v3685_v13 }
 0xc55   : > { %2480 = vst [vmem:[%s672_s20] sm:$0xff] %v2479_v15 }
 0xc56 PF: > { %s28_s29 = sadd.s32 1, %s3273_s29   ;;  %s3946_s27 = smov %s3269_s28 }
 0xc57   : > { %p25_p5 = scmp.ge.s32.totalorder %s28_s29, 4   ;;  %s3947_s28 = smov %s3949_s17 }
 0xc59   :  { %27 = sbr.rel (!%p25_p5) target bundleno = 4 (0x4), region = 138 }

// kernel: waveform_spectrogram_cross_encoder.5
= control target key start
LH: loop header
LB: loop body
LE: loop exit
PB: predicated region body
PF: predicated region fallthrough
CT: control target
= control target key end

     0   :  { %s4089_s0 = inlined_call_operand.vmem [shape: f32[2,8,128], index: 0, kind: input, shape index: {}]   ;;  %s4090_s1 = inlined_call_operand.vmem [shape: f32[2,16,128], index: 1, kind: input, shape index: {}]   ;;  %s4091_s2 = inlined_call_operand.vmem [shape: f32[8,128], index: 2, kind: input, shape index: {}]   ;;  %s4092_s3 = inlined_call_operand.vmem [shape: f32[8,128], index: 3, kind: input, shape index: {}]   ;;  %s4093_s4 = inlined_call_operand.vmem [shape: f32[8,128], index: 4, kind: input, shape index: {}]   ;;  %s4094_s5 = inlined_call_operand.vmem [shape: f32[16,128], index: 5, kind: input, shape index: {}]   ;;  %s4095_s6 = inlined_call_operand.vmem [shape: f32[16,128], index: 6, kind: input, shape index: {}]   ;;  %s4096_s7 = inlined_call_operand.vmem [shape: f32[16,128], index: 7, kind: input, shape index: {}]   ;;  %s4097_s8 = inlined_call_operand.vmem [shape: f32[1,128], index: 8, kind: input, shape index: {}]   ;;  %s4098_s9 = inlined_call_operand.vmem [shape: bf16[128,128], index: 9, kind: input, shape index: {}]   ;;  %s4099_s10 = inlined_call_operand.vmem [shape: bf16[128,128], index: 10, kind: input, shape index: {}]   ;;  %s4100_s11 = inlined_call_operand.vmem [shape: bf16[128,128], index: 11, kind: input, shape index: {}]   ;;  %s4101_s12 = inlined_call_operand.vmem [shape: bf16[128,128], index: 12, kind: input, shape index: {}]   ;;  %s4102_s13 = inlined_call_operand.vmem [shape: f32[1,128], index: 13, kind: input, shape index: {}]   ;;  %s4103_s14 = inlined_call_operand.vmem [shape: bf16[128,341], index: 14, kind: input, shape index: {}]   ;;  %s4104_s15 = inlined_call_operand.vmem [shape: bf16[128,341], index: 15, kind: input, shape index: {}]   ;;  %s4105_s16 = inlined_call_operand.vmem [shape: bf16[341,128], index: 16, kind: input, shape index: {}]   ;;  %s4106_s17 = inlined_call_operand.vmem [shape: f32[1,128], index: 17, kind: input, shape index: {}]   ;;  %s4107_s18 = inlined_call_operand.hbm [shape: f32[2,8,128], index: 18, kind: output, shape index: {}]  }
   0x1   :  { %4116 = sst [smem:[#allocation15_spill]] %s4089_s0 }
   0x2   :  { %4117 = sst [smem:[#allocation16_spill]] %s4090_s1 }
   0x3   :  { %4118 = sst [smem:[#allocation17_spill]] %s4091_s2 }
   0x4   :  { %4119 = sst [smem:[#allocation18_spill]] %s4092_s3 }
   0x5   :  { %4120 = sst [smem:[#allocation19_spill]] %s4093_s4 }
   0x6   :  { %4121 = sst [smem:[#allocation20_spill]] %s4107_s18 }
   0x7   :  { %23 = vsyncpa [#allocation6], 0 }
   0x8   :  { %25 = vsyncpa [#allocation6 + $0x1], 0  ;;  %s3490_s27 = smov 0   ;;  %s3492_s28 = smov 0  }
   0x9   :  { %s3494_s29 = smov 0   ;;  %s3496_s30 = smov 0  }
   0xa   :  { %s3498_s0 = smov 0   ;;  %s3500_s19 = smov 0  }
   0xb LB: > { %4122 = sst [smem:[#allocation8_spill]] %s3363_s27  ;;  %s2633_s1 = sadd.s32 4294967295, %s3383_s19   ;;  %s3383_s19 = sphi %s3500_s19, %s31_s19   ;;  %s3379_s0 = sphi %s3498_s0, %s4144_s0   ;;  %s3375_s30 = sphi %s3496_s30, %s4147_s30   ;;  %s3371_s29 = sphi %s3494_s29, %s4142_s29   ;;  %s3367_s28 = sphi %s3492_s28, %s4146_s28   ;;  %s3363_s27 = sphi %s3490_s27, %s4145_s27  }
   0xc   : > { %4123 = sst [smem:[#allocation9_spill]] %s3371_s29  ;;  %s2634_s20 = sadd.s32 4294967294, %s3383_s19  }
   0xd   : > { %4124 = sst [smem:[#allocation10_spill]] %s3379_s0  ;;  %s43_s21 = sadd.s32 1, %s3379_s0 }
   0xe   : > { %4125 = sst [smem:[#allocation11_spill]] %s3383_s19  ;;  %s457_s22 = sadd.s32 1, %s3371_s29 }
   0xf   : > { %p45_p0 = scmp.ge.s32.totalorder %s43_s21, 2  ;;  %p467_p1 = scmp.ne.s32.totalorder %s3371_s29, %s3367_s28 }
  0x10   : > { %p468_p2 = scmp.eq.s32.totalorder %s2633_s1, 1  ;;  %p473_p3 = scmp.ne.s32.totalorder %s3367_s28, %s3363_s27 }
  0x11   : > { %s4149_s21 = smov (%p45_p0, %s43_s21), 0  ;;  %p474_p5 = scmp.eq.s32.totalorder %s2634_s20, 1 }
  0x12   : > { %4126 = sst [smem:[#allocation12_spill]] %s4149_s21  ;;  %p3530_p4 = por %p468_p2, %p467_p1 }
  0x13   : > { %s452_s23 = ssub.s32 %s3379_s0, %s4149_s21  ;;  %p2640_p6 = scmp.ge.s32.totalorder %s3383_s19, 1 }
  0x14   : > { %p455_p7 = scmp.eq.s32.totalorder %s452_s23, 0  ;;  %p3537_p8 = por %p474_p5, %p473_p3 }
  0x15   : > { %p570_p9 = scmp.lt.s32.totalorder %s3383_s19, 3 }
  0x16   : > { %s4128_s24 = scalar_select %p3537_p8, 1, 0 }
  0x17   : > { %s3543_s25 = scalar_select %p455_p7, %s3371_s29, %s457_s22  }
  0x18   : > { %4129 = sst [smem:[#allocation13_spill]] %s4128_s24  ;;  %p571_p10 = pnand %p2640_p6, %p570_p9 }
  0x19   : > { %4130 = sst [smem:[#allocation14_spill]] %s3543_s25  ;;  %p643_p11 = scmp.lt.s32.totalorder (!%p571_p10), %s3375_s30, 1 }
  0x1a   : > { %574 = sbr.rel (%p571_p10) target bundleno = 3350 (0xd16), region = 92  ;;  %s4131_s0 = sld [smem:[#allocation15_spill]] (!%p571_p10) }
  0x1b   : > { %s3388_s20 = smov (!%p571_p10), 127   ;;  %s4133_s3 = sld [smem:[#allocation18_spill]] (!%p571_p10) }
  0x1c   : > { %s4134_s19 = sld [smem:[#allocation17_spill]] (!%p571_p10) }
  0x1d   : > { %s4135_s4 = sld [smem:[#allocation19_spill]] (!%p571_p10) }
  0x1e   : > { %s4136_s27 = sld [smem:[#allocation20_spill]] (!%p571_p10) }
  0x1f   : > { %v3146_v0 = vld [vmem:[%s4099_s10 + $0x38] sm:$0xff]   ;;  %v3385_v1 = vmov 0.0   ;;  %v3147_v2 = vld [vmem:[%s4099_s10 + $0x30] sm:$0xff]   ;;  %s644_s22 = scalar_select %p643_p11, %s3375_s30, 1  ;;  %vm3386_vm0 = vmmov 0   ;;  %v3148_v3 = vld [vmem:[%s4099_s10 + $0x28] sm:$0xff]  }
  0x20   : > { %2898 = vmatprep.subr.bf16.mxu0 %v3385_v1  ;;  %2918 = vmatprep.subr.bf16.mxu1 %v3385_v1  ;;  %v3149_v6 = vld [vmem:[%s4099_s10 + $0x20] sm:$0xff]   ;;  %v3150_v7 = vld [vmem:[%s4099_s10 + $0x18] sm:$0xff]   ;;  %v3151_v8 = vld [vmem:[%s4099_s10 + $0x10] sm:$0xff]   ;;  %vm1073_vm1 = vcmask 261120   ;;  %vm1120_vm2 = vcmask 130048   ;;  %vm1183_vm3 = vcmask 257024  }
  0x21   : > { %2899 = vmatpush3.bf16.msra.mxu0 %v3146_v0  ;;  %2914 = vmatprep.mubr.msk.bf16.mxu0 %vm3386_vm0, %v3385_v1  ;;  %s2642_s26 = sshll.u32 %s644_s22, 3  ;;  %s2781_s1 = sshll.u32 %s644_s22, 4  ;;  %v3152_v9 = vld [vmem:[%s4099_s10 + $0x8] sm:$0xff]   ;;  %v3153_v10 = vld [vmem:[%s4099_s10] sm:$0xff]   ;;  %v3154_v13 = vld [vmem:[%s4098_s9 + $0x38] sm:$0xff]   ;;  %vm1315_vm4 = vcmask 519424  }
  0x22   : > { %2900 = vmatprep.subr.bf16.mxu0 %v3385_v1  ;;  %2934 = vmatprep.mubr.msk.bf16.mxu1 %vm3386_vm0, %v3385_v1  ;;  %s3563_s25 = scalar_lea.vmem %s4131_s0, %s2642_s26  ;;  %s4132_s0 = sld [smem:[#allocation16_spill]]  ;;  %v3155_v15 = vld [vmem:[%s4098_s9 + $0x30] sm:$0xff]   ;;  %v3156_v16 = vld [vmem:[%s4098_s9 + $0x28] sm:$0xff]   ;;  %v3157_v17 = vld [vmem:[%s4098_s9 + $0x20] sm:$0xff]   ;;  %vm1446_vm5 = vcmask 781824   ;;  %vm1577_vm6 = vcmask 1044224  }
  0x23   : > { %v3569_v4 = vld [vmem:[%s3563_s25] sm:$0xff]  ;;  %v3158_v18 = vld [vmem:[%s4098_s9 + $0x18] sm:$0xff]   ;;  %v3159_v19 = vld [vmem:[%s4098_s9 + $0x10] sm:$0xff]   ;;  %vm2386_vm7 = vcmask 1041408   ;;  %vm2387_vm8 = vcmask 1042432   ;;  %vm2382_vm9 = vcmask 695296  }
  0x24   : > { %v931_v5 = vmul.f32 %v3569_v4, %v3569_v4  ;;  %v3160_v20 = vld [vmem:[%s4098_s9 + $0x8] sm:$0xff]   ;;  %v3161_v21 = vld [vmem:[%s4098_s9] sm:$0xff]   ;;  %v3162_v22 = vld [vmem:[%s4100_s11 + $0x38] sm:$0xff]   ;;  %s4137_s26 = smov %s4136_s27 }
  0x25   : > { %2901 = vmatpush3.bf16.msra.mxu0 %v3147_v2  ;;  %2919 = vmatpush3.bf16.msra.mxu1 %v3162_v22  ;;  %v3163_v23 = vld [vmem:[%s4100_s11 + $0x30] sm:$0xff]   ;;  %v2665_v28 = vld [vmem:[%s4097_s8] ss:$0 sm:$0xff]  ;;  %v3164_v32 = vld [vmem:[%s4100_s11 + $0x28] sm:$0xff]  }
  0x26   : > { %2902 = vmatprep.subr.bf16.mxu0 %v3385_v1  ;;  %932 = vadd.xlane.f32.xlu0 %v931_v5  ;;  %v3165_v33 = vld [vmem:[%s4100_s11 + $0x20] sm:$0xff]   ;;  %v3166_v34 = vld [vmem:[%s4100_s11 + $0x18] sm:$0xff]   ;;  %v3167_v35 = vld [vmem:[%s4100_s11 + $0x10] sm:$0xff]  }
  0x27   : > { %2920 = vmatprep.subr.bf16.mxu1 %v3385_v1  ;;  %v3168_v38 = vld [vmem:[%s4100_s11 + $0x8] sm:$0xff]   ;;  %v3169_v41 = vld [vmem:[%s4100_s11] sm:$0xff]  }
  0x28   : > { %s654_s21 = scalar_lea.vmem %s4132_s0, %s2781_s1  ;;  %s3387_s1 = smov 1   ;;  %v887_v43 = vld [vmem:[%s4095_s6] sm:$0xff]  ;;  %v888_v46 = vld [vmem:[%s4095_s6 + $0x8] sm:$0xff] }
  0x29   : > { %2903 = vmatpush3.bf16.msra.mxu0 %v3148_v3  ;;  %v672_v11 = vld [vmem:[%s654_s21] sm:$0xff]  ;;  %v673_v12 = vld [vmem:[%s654_s21 + $0x8] sm:$0xff]  ;;  %2921 = vmatpush3.bf16.msra.mxu1 %v3163_v23  ;;  %s3390_s0 = smov 64   ;;  %s3391_s21 = smov 32  }
  0x2a   : > { %2904 = vmatprep.subr.bf16.mxu0 %v3385_v1  ;;  %v3600_v14 = vpack.c.bf16 %v673_v12, %v672_v11  ;;  %2922 = vmatprep.subr.bf16.mxu1 %v3385_v1  ;;  %v885_v45 = vld [vmem:[%s4094_s5] sm:$0xff]  ;;  %v886_v48 = vld [vmem:[%s4094_s5 + $0x8] sm:$0xff] }
  0x2b   : > { %v889_v49 = vld [vmem:[%s4096_s7] sm:$0xff]  ;;  %v890_v53 = vld [vmem:[%s4096_s7 + $0x8] sm:$0xff] }
  0x2c   : > { %v1052_v11 = vld [vmem:[%s4133_s3] sm:$0xff] }
  0x2d   : > { %2905 = vmatpush3.bf16.msra.mxu0 %v3149_v6  ;;  %2923 = vmatpush3.bf16.msra.mxu1 %v3164_v32  ;;  %v1051_v12 = vld [vmem:[%s4134_s19] sm:$0xff] }
  0x2e   : > { %2906 = vmatprep.subr.bf16.mxu0 %v3385_v1  ;;  %2924 = vmatprep.subr.bf16.mxu1 %v3385_v1 }
  0x31   : > { %2907 = vmatpush3.bf16.msra.mxu0 %v3150_v7  ;;  %2925 = vmatpush3.bf16.msra.mxu1 %v3165_v33 }
  0x32   : > { %2908 = vmatprep.subr.bf16.mxu0 %v3385_v1  ;;  %2926 = vmatprep.subr.bf16.mxu1 %v3385_v1 }
  0x35   : > { %2909 = vmatpush3.bf16.msra.mxu0 %v3151_v8  ;;  %2927 = vmatpush3.bf16.msra.mxu1 %v3166_v34 }
  0x36   : > { %2910 = vmatprep.subr.bf16.mxu0 %v3385_v1  ;;  %2928 = vmatprep.subr.bf16.mxu1 %v3385_v1 }
  0x39   : > { %2911 = vmatpush3.bf16.msra.mxu0 %v3152_v9  ;;  %2929 = vmatpush3.bf16.msra.mxu1 %v3167_v35 }
  0x3a   : > { %2912 = vmatprep.subr.bf16.mxu0 %v3385_v1  ;;  %2930 = vmatprep.subr.bf16.mxu1 %v3385_v1 }
  0x3d   : > { %2913 = vmatpush3.bf16.msra.mxu0 %v3153_v10  ;;  %2931 = vmatpush3.bf16.msra.mxu1 %v3168_v38 }
  0x3e   : > { %2938 = vmatprep.subr.bf16.mxu0 %v3385_v1  ;;  %2932 = vmatprep.subr.bf16.mxu1 %v3385_v1 }
  0x40   : > { %2915 = vmatmul.mubr.bf16.vlgmr.msra.gmra.mxu0 %v3600_v14 }
  0x41   : > { %2939 = vmatpush3.bf16.msra.mxu0 %v3154_v13  ;;  %2954 = vmatprep.mubr.msk.bf16.mxu0 %vm3386_vm0, %v3385_v1 }
  0x42   : > { %2940 = vmatprep.subr.bf16.mxu0 %v3385_v1  ;;  %2933 = vmatpush3.bf16.msra.mxu1 %v3169_v41 }
  0x43   : > { %2958 = vmatprep.subr.bf16.mxu1 %v3385_v1 }
  0x45   : > { %2941 = vmatpush3.bf16.msra.mxu0 %v3155_v15  ;;  %2935 = vmatmul.mubr.bf16.vlgmr.msra.gmra.mxu1 %v3600_v14  ;;  %v1053_v15 = vld [vmem:[%s4135_s4] sm:$0xff]  ;;  %s3394_s4 = smov [#allocation5]  }
  0x46   : > { %2942 = vmatprep.subr.bf16.mxu0 %v3385_v1  ;;  %2960 = vmatprep.mubr.msk.bf16.mxu1 %vm3386_vm0, %v3385_v1  ;;  %s3311_s24 = sshll.u32 %s3394_s4, 4  ;;  %s3312_s24 = int_to_ptr.vmem [resolvable:$false] %s3311_s24 }
  0x49   : > { %2943 = vmatpush3.bf16.msra.mxu0 %v3156_v16 }
  0x4a   : > { %2944 = vmatprep.subr.bf16.mxu0 %v3385_v1 }
  0x4d   : > { %2945 = vmatpush3.bf16.msra.mxu0 %v3157_v17 }
  0x4e   : > { %2946 = vmatprep.subr.bf16.mxu0 %v3385_v1 }
  0x51   : > { %2947 = vmatpush3.bf16.msra.mxu0 %v3158_v18 }
  0x52   : > { %2948 = vmatprep.subr.bf16.mxu0 %v3385_v1 }
  0x55   : > { %2949 = vmatpush3.bf16.msra.mxu0 %v3159_v19 }
  0x56   : > { %2950 = vmatprep.subr.bf16.mxu0 %v3385_v1 }
  0x59   : > { %2951 = vmatpush3.bf16.msra.mxu0 %v3160_v20 }
  0x5a   : > { %2952 = vmatprep.subr.bf16.mxu0 %v3385_v1 }
  0x5d   : > { %2953 = vmatpush3.bf16.msra.mxu0 %v3161_v21 }
  0x5e   : > { %2994 = vmatprep.subr.bf16.mxu0 %v3385_v1 }
  0xaf   : > { %v933_v24 = vpop.xlane.xlu0 %932 }
  0xb0   : > { %v935_v25 = vmul.f32 0.0078125, %v933_v24 }
  0xb2   : > { %v936_v26 = vadd.f32 1.1920929e-07, %v935_v25 }
  0xb4   : > { %3272 = vrsqrt.f32 %v936_v26 }
  0xc1   : > { %v3273_v27 = vpop.eup %3272 }
  0xc2   : > { %v938_v29 = vmul.f32 %v3273_v27, %v3569_v4 }
  0xc4   : > { %v945_v30 = vmul.f32 %v2665_v28, %v938_v29 }
  0xc6   : > { %v946_v31 = vpack.c.bf16 %v945_v30, %v945_v30 }
  0xc8   : > { %2955 = vmatmul.mubr.bf16.vlgmr.msra.gmra.mxu0 %v946_v31 }
  0xc9   : > { %2996 = vmatprep.mubr.msk.bf16.mxu0 %vm3386_vm0, %v3385_v1 }
 0x100   : > { %v773_v36 = vpop.f32.mrf.mxu0 }
 0x101   : > { %895 = vrot.lane.b32.xlu1 %v773_v36, %s3387_s1  ;;  %891 = vrot.lane.b32.xlu0 %v773_v36, %s3388_s20  ;;  %v899_v51 = vmul.f32 %v885_v45, %v773_v36 }
 0x102   : > { %v2916_v37 = vpop.f32.mrf.mxu0 }
 0x104   : > { %v776_v39 = vpop.f32.mrf.mxu0 }
 0x105   : > { %893 = vrot.lane.b32.xlu1 %v776_v39, %s3388_s20  ;;  %v900_v54 = vmul.f32 %v886_v48, %v776_v39  ;;  %v878_v6 = vpop.f32.mrf.mxu1 }
 0x106   : > { %v2917_v40 = vpop.f32.mrf.mxu0 }
 0x107   : > { %v2936_v7 = vpop.f32.mrf.mxu1 }
 0x109   : > { %897 = vrot.lane.b32.xlu1 %v776_v39, %s3387_s1  ;;  %v881_v8 = vpop.f32.mrf.mxu1 }
 0x10a   : > { %v2797_v9 = vpack.c.bf16 %v881_v8, %v878_v6 }
 0x10b   : > { %v2937_v10 = vpop.f32.mrf.mxu1 }
 0x10c   : > { %2798 = vst [vmem:[#allocation3] sm:$0xff] %v2797_v9  }
 0x113   : > { %v3171_v22 = vld [vmem:[#allocation3] sm:$0xff]  }
 0x173   : > { %v896_v42 = vpop.permute.xlu1 %895  ;;  %v892_v44 = vpop.permute.xlu0 %891 }
 0x174   : > { %v901_v47 = vmul.f32 %v892_v44, %v887_v43  ;;  %v905_v55 = vmul.f32 %v896_v42, %v889_v49 }
 0x176   : > { %v903_v56 = vadd.f32 %v901_v47, %v899_v51  ;;  %v3173_v51 = vld [vmem:[#allocation3] sm:$0xff]  }
 0x177   : > { %v894_v50 = vpop.permute.xlu1 %893 }
 0x178   : > { %v902_v52 = vmul.f32 %v894_v50, %v888_v46  ;;  %v907_v60 = vadd.f32 %v905_v55, %v903_v56 }
 0x17a   : > { %v904_v58 = vadd.f32 %v902_v52, %v900_v54 }
 0x17b   : > { %v898_v57 = vpop.permute.xlu1 %897 }
 0x17c   : > { %v906_v59 = vmul.f32 %v898_v57, %v890_v53 }
 0x17e   : > { %v908_v61 = vadd.f32 %v906_v59, %v904_v58 }
 0x180   : > { %v2792_v62 = vpack.c.bf16 %v908_v61, %v907_v60 }
 0x182   : > { %2793 = vst [vmem:[#allocation2] sm:$0xff] %v2792_v62  }
 0x188   : > { %v1045_v0 = vpop.f32.mrf.mxu0 }
 0x189   : > { %v3170_v63 = vld [vmem:[#allocation2] sm:$0xff]   ;;  %1054 = vrot.lane.b32.xlu1 %v1045_v0, %s3388_s20  ;;  %v1058_v16 = vmul.f32 %v1051_v12, %v1045_v0 }
 0x18a   : > { %v1078_v2 = vsel %vm1073_vm1, %v3170_v63, 0  ;;  %v2956_v3 = vpop.f32.mrf.mxu0  ;;  %v3172_v28 = vld [vmem:[#allocation2] sm:$0xff]  }
 0x18b   : > { %2959 = vmatpush3.bf16.xpose.msra.mxu1 %v1078_v2  ;;  %v3174_v52 = vld [vmem:[#allocation2] sm:$0xff]  }
 0x18c   : > { %2964 = vmatprep.subr.bf16.mxu1 %v3385_v1  ;;  %v1048_v4 = vpop.f32.mrf.mxu0  ;;  %v3175_v62 = vld [vmem:[#allocation2] sm:$0xff]  }
 0x18d   : > { %1056 = vrot.lane.b32.xlu1 %v1045_v0, %s3387_s1  ;;  %s3389_s1 = smov 96  }
 0x18e   : > { %v2957_v5 = vpop.f32.mrf.mxu0 }
 0x1fb   : > { %v1055_v13 = vpop.permute.xlu1 %1054 }
 0x1fc   : > { %v1059_v14 = vmul.f32 %v1055_v13, %v1052_v11 }
 0x1fe   : > { %v1060_v18 = vadd.f32 %v1059_v14, %v1058_v16 }
 0x1ff   : > { %v1057_v17 = vpop.permute.xlu1 %1056 }
 0x200   : > { %v1061_v19 = vmul.f32 %v1057_v17, %v1053_v15 }
 0x202   : > { %v1062_v20 = vadd.f32 %v1061_v19, %v1060_v18 }
 0x204   : > { %v3711_v21 = vpack.c.bf16 %v1062_v20, %v1062_v20 }
 0x206   : > { %2961 = vmatmul.mubr.msk.bf16.vlgmr.msra.gmra.mxu1 %vm1073_vm1, %v3711_v21 }
 0x207   : > { %2966 = vmatprep.mubr.msk.bf16.mxu1 %vm3386_vm0, %v3385_v1  ;;  %2965 = vmatpush3.bf16.msra.mxu1 %v3171_v22 }
 0x208   : > { %2970 = vmatprep.subr.bf16.mxu1 %v3385_v1 }
 0x2c6   : > { %v1114_v23 = vpop.f32.mrf.mxu1 }
 0x2c7   : > { %v1121_v24 = vsel %vm1120_vm2, %v1114_v23, -inf }
 0x2c8   : > { %1122 = vmax.xlane.f32.xlu1 %v1121_v24  ;;  %v2962_v25 = vpop.f32.mrf.mxu1 }
 0x2ca   : > { %v1117_v26 = vpop.f32.mrf.mxu1 }
 0x2cc   : > { %v2963_v27 = vpop.f32.mrf.mxu1 }
 0x2d9   : > { %1197 = vrot.lane.b32.xlu1 %v3172_v28, %s3389_s1 }
 0x351   : > { %v1123_v29 = vpop.xlane.xlu1 %1122 }
 0x352   : > { %v1124_v30 = vsub.f32 %v1114_v23, %v1123_v29  ;;  %v3176_v29 = vld [vmem:[#allocation3] sm:$0xff]  }
 0x354   : > { %v1125_v31 = vmul.f32 1.442695, %v1124_v30 }
 0x355   : > { %v1198_v37 = vpop.permute.xlu1 %1197 }
 0x356   : > { %3274 = vpow2.f32 %v1125_v31  ;;  %v1203_v39 = vsel %vm1073_vm1, %v1198_v37, 0 }
 0x363   : > { %v3275_v32 = vpop.eup %3274 }
 0x364   : > { %v1127_v33 = vsel %vm1120_vm2, %v3275_v32, 0.0 }
 0x365   : > { %1128 = vadd.xlane.f32.xlu0 %v1127_v33  ;;  %v3177_v33 = vld [vmem:[#allocation3] sm:$0xff]  }
 0x37b   : > { %1190 = vrot.lane.b32.xlu0 %v3711_v21, %s3389_s1 }
 0x3ee   : > { %v1129_v34 = vpop.xlane.xlu0 %1128 }
 0x3ef   : > { %3276 = vrcp.f32 %v1129_v34 }
 0x3f2   : > { %v1191_v40 = vpop.permute.xlu0 %1190 }
 0x3fc   : > { %v3277_v35 = vpop.eup %3276 }
 0x3fd   : > { %v1131_v36 = vmul.f32 %v3277_v35, %v3275_v32 }
 0x3ff   : > { %v1132_v38 = vpack.c.bf16 %v1131_v36, %v1131_v36 }
 0x401   : > { %2967 = vmatmul.mubr.msk.bf16.vlgmr.msra.gmra.mxu1 %vm1120_vm2, %v1132_v38 }
 0x402   : > { %2971 = vmatpush3.bf16.xpose.msra.mxu1 %v1203_v39  ;;  %2972 = vmatprep.mubr.msk.bf16.mxu1 %vm3386_vm0, %v3385_v1 }
 0x403   : > { %2976 = vmatprep.subr.bf16.mxu1 %v3385_v1 }
 0x409   : > { %2973 = vmatmul.mubr.msk.bf16.vlgmr.msra.gmra.mxu1 %vm1073_vm1, %v1191_v40 }
 0x40a   : > { %2978 = vmatprep.mubr.msk.bf16.mxu1 %vm3386_vm0, %v3385_v1 }
 0x4c1   : > { %v1176_v41 = vpop.f32.mrf.mxu1 }
 0x4c2   : > { %v1182_v42 = vpack.c.bf16 %v1176_v41, %v1176_v41 }
 0x4c3   : > { %v2968_v43 = vpop.f32.mrf.mxu1 }
 0x4c4   : > { %1184 = vst.msk [vmem:[#allocation4] sm:$0xf] %vm1183_vm3, %v1182_v42 }
 0x4c5   : > { %v1179_v44 = vpop.f32.mrf.mxu1 }
 0x4c7   : > { %v2969_v45 = vpop.f32.mrf.mxu1 }
 0x4c8   : > { %v3178_v45 = vld [vmem:[%s4101_s12 + $0x38] sm:$0xff]  }
 0x4c9   : > { %v1239_v46 = vpop.f32.mrf.mxu1 }
 0x4ca   : > { %v1245_v47 = vsel %vm1120_vm2, %v1239_v46, -inf }
 0x4cb   : > { %1246 = vmax.xlane.f32.xlu1 %v1245_v47  ;;  %v2974_v48 = vpop.f32.mrf.mxu1  ;;  %v3180_v47 = vld [vmem:[%s4101_s12 + $0x28] sm:$0xff]  }
 0x4cc   : > { %v3181_v48 = vld [vmem:[%s4101_s12 + $0x20] sm:$0xff]  }
 0x4cd   : > { %v1242_v49 = vpop.f32.mrf.mxu1 }
 0x4ce   : > { %v3182_v49 = vld [vmem:[%s4101_s12 + $0x18] sm:$0xff]  }
 0x4cf   : > { %v2975_v50 = vpop.f32.mrf.mxu1 }
 0x4d0   : > { %v3183_v50 = vld [vmem:[%s4101_s12 + $0x10] sm:$0xff]  }
 0x4dc   : > { %1262 = vrot.lane.b32.xlu1 %v3173_v51, %s3389_s1  ;;  %v3184_v51 = vld [vmem:[%s4101_s12 + $0x8] sm:$0xff]  }
 0x4e0   : > { %1321 = vrot.lane.b32.xlu1 %v3711_v21, %s3390_s0 }
 0x4e4   : > { %1459 = vrot.lane.b32.xlu1 %v3174_v52, %s3391_s21 }
 0x554   : > { %v1247_v53 = vpop.xlane.xlu1 %1246 }
 0x555   : > { %v1248_v54 = vsub.f32 %v1239_v46, %v1247_v53  ;;  %v3179_v46 = vld [vmem:[%s4101_s12 + $0x30] sm:$0xff]   ;;  %v3185_v53 = vld [vmem:[%s4101_s12] sm:$0xff]  }
 0x557   : > { %v1249_v55 = vmul.f32 1.442695, %v1248_v54 }
 0x558   : > { %v1263_v56 = vpop.permute.xlu1 %1262 }
 0x559   : > { %3278 = vpow2.f32 %v1249_v55  ;;  %2977 = vmatpush3.bf16.msra.mxu1 %v1263_v56 }
 0x55a   : > { %2982 = vmatprep.subr.bf16.mxu1 %v3385_v1 }
 0x55c   : > { %v1322_v57 = vpop.permute.xlu1 %1321 }
 0x560   : > { %v1460_v58 = vpop.permute.xlu1 %1459 }
 0x561   : > { %v1465_v59 = vsel %vm1073_vm1, %v1460_v58, 0 }
 0x562   : > { %2995 = vmatpush3.bf16.xpose.msra.mxu0 %v1465_v59 }
 0x563   : > { %3006 = vmatprep.subr.bf16.mxu0 %v3385_v1 }
 0x566   : > { %v3279_v60 = vpop.eup %3278 }
 0x567   : > { %v1251_v61 = vsel %vm1120_vm2, %v3279_v60, 0.0 }
 0x568   : > { %1252 = vadd.xlane.f32.xlu0 %v1251_v61 }
 0x57e   : > { %1328 = vrot.lane.b32.xlu0 %v3175_v62, %s3390_s0 }
 0x582   : > { %1452 = vrot.lane.b32.xlu0 %v3711_v21, %s3391_s21 }
 0x5f1   : > { %v1253_v63 = vpop.xlane.xlu0 %1252 }
 0x5f2   : > { %3280 = vrcp.f32 %v1253_v63 }
 0x5f5   : > { %v1329_v0 = vpop.permute.xlu0 %1328 }
 0x5f6   : > { %v1334_v6 = vsel %vm1073_vm1, %v1329_v0, 0 }
 0x5f9   : > { %v1453_v2 = vpop.permute.xlu0 %1452 }
 0x5fa   : > { %2997 = vmatmul.mubr.msk.bf16.vlgmr.msra.gmra.mxu0 %vm1073_vm1, %v1453_v2 }
 0x5fb   : > { %3022 = vmatprep.mubr.msk.bf16.mxu0 %vm3386_vm0, %v3385_v1  ;;  %3007 = vmatpush3.bf16.msra.mxu0 %v3178_v45 }
 0x5fc   : > { %3008 = vmatprep.subr.bf16.mxu0 %v3385_v1 }
 0x5ff   : > { %v3281_v3 = vpop.eup %3280  ;;  %3009 = vmatpush3.bf16.msra.mxu0 %v3179_v46  ;;  %v3224_v46 = vld [vmem:[%s4104_s15 + $0x94] ss:$12 sps:$4 sm:$0xff]  }
 0x600   : > { %v1255_v4 = vmul.f32 %v3281_v3, %v3279_v60  ;;  %3010 = vmatprep.subr.bf16.mxu0 %v3385_v1  ;;  %v3186_v3 = vld [vmem:[%s4103_s14 + $0xa8] ss:$12 sps:$4 sm:$0xff]  }
 0x602   : > { %v1256_v5 = vpack.c.bf16 %v1255_v4, %v1255_v4  ;;  %v3188_v4 = vld [vmem:[%s4103_s14 + $0xac] ss:$12 sps:$4 sm:$0xff]  }
 0x603   : > { %3011 = vmatpush3.bf16.msra.mxu0 %v3180_v47  ;;  %v3222_v47 = vld [vmem:[%s4104_s15 + $0x90] ss:$12 sps:$4 sm:$0xff]  }
 0x604   : > { %2979 = vmatmul.mubr.msk.bf16.vlgmr.msra.gmra.mxu1 %vm1120_vm2, %v1256_v5  ;;  %3012 = vmatprep.subr.bf16.mxu0 %v3385_v1  ;;  %v3189_v5 = vld [vmem:[%s4103_s14 + $0xb0] ss:$12 sps:$4 sm:$0xff]  }
 0x605   : > { %2983 = vmatpush3.bf16.xpose.msra.mxu1 %v1334_v6  ;;  %2984 = vmatprep.mubr.msk.bf16.mxu1 %vm3386_vm0, %v3385_v1  ;;  %v3192_v6 = vld [vmem:[%s4103_s14 + $0x94] ss:$12 sps:$4 sm:$0xff]  }
 0x606   : > { %2988 = vmatprep.subr.bf16.mxu1 %v3385_v1 }
 0x607   : > { %3013 = vmatpush3.bf16.msra.mxu0 %v3181_v48  ;;  %v3225_v48 = vld [vmem:[%s4104_s15 + $0x98] ss:$12 sps:$4 sm:$0xff]  }
 0x608   : > { %3014 = vmatprep.subr.bf16.mxu0 %v3385_v1 }
 0x60b   : > { %3015 = vmatpush3.bf16.msra.mxu0 %v3182_v49  ;;  %v3228_v49 = vld [vmem:[%s4104_s15 + $0x7c] ss:$12 sps:$4 sm:$0xff]  }
 0x60c   : > { %2985 = vmatmul.mubr.msk.bf16.vlgmr.msra.gmra.mxu1 %vm1073_vm1, %v1322_v57  ;;  %3016 = vmatprep.subr.bf16.mxu0 %v3385_v1 }
 0x60d   : > { %2990 = vmatprep.mubr.msk.bf16.mxu1 %vm3386_vm0, %v3385_v1 }
 0x60f   : > { %3017 = vmatpush3.bf16.msra.mxu0 %v3183_v50  ;;  %v3226_v50 = vld [vmem:[%s4104_s15 + $0x78] ss:$12 sps:$4 sm:$0xff]  }
 0x610   : > { %3018 = vmatprep.subr.bf16.mxu0 %v3385_v1 }
 0x613   : > { %3019 = vmatpush3.bf16.msra.mxu0 %v3184_v51  ;;  %v3229_v51 = vld [vmem:[%s4104_s15 + $0x80] ss:$12 sps:$4 sm:$0xff]  }
 0x614   : > { %3020 = vmatprep.subr.bf16.mxu0 %v3385_v1 }
 0x617   : > { %3021 = vmatpush3.bf16.msra.mxu0 %v3185_v53  ;;  %v3230_v53 = vld [vmem:[%s4104_s15 + $0x60] ss:$12 sps:$4 sm:$0xff]  }
 0x618   : > { %3026 = vmatprep.subr.bf16.mxu0 %v3385_v1 }
 0x6ba   : > { %v1501_v7 = vpop.f32.mrf.mxu0 }
 0x6bb   : > { %v1507_v8 = vsel %vm1120_vm2, %v1501_v7, -inf }
 0x6bc   : > { %1508 = vmax.xlane.f32.xlu0 %v1507_v8  ;;  %v2998_v9 = vpop.f32.mrf.mxu0  ;;  %v3190_v8 = vld [vmem:[%s4103_s14 + $0x90] ss:$12 sps:$4 sm:$0xff]  }
 0x6bd   : > { %v3196_v9 = vld [vmem:[%s4103_s14 + $0x7c] ss:$12 sps:$4 sm:$0xff]  }
 0x6be   : > { %v1504_v10 = vpop.f32.mrf.mxu0 }
 0x6bf   : > { %v3194_v10 = vld [vmem:[%s4103_s14 + $0x78] ss:$12 sps:$4 sm:$0xff]  }
 0x6c0   : > { %v2999_v11 = vpop.f32.mrf.mxu0 }
 0x6c4   : > { %v1302_v12 = vpop.f32.mrf.mxu1 }
 0x6c5   : > { %v2786_v32 = vpack.c.bf16 %v1302_v12, %v1302_v12  ;;  %v3306_v12 = vld [vmem:[%s3563_s25] sm:$0xff] }
 0x6c6   : > { %v2980_v13 = vpop.f32.mrf.mxu1 }
 0x6c8   : > { %v1305_v14 = vpop.f32.mrf.mxu1 }
 0x6ca   : > { %v2981_v15 = vpop.f32.mrf.mxu1 }
 0x6cc   : > { %v1370_v16 = vpop.f32.mrf.mxu1 }
 0x6cd   : > { %v1376_v17 = vsel %vm1120_vm2, %v1370_v16, -inf }
 0x6ce   : > { %1377 = vmax.xlane.f32.xlu1 %v1376_v17  ;;  %v2986_v18 = vpop.f32.mrf.mxu1 }
 0x6cf   : > { %v3197_v18 = vld [vmem:[%s4103_s14 + $0x80] ss:$12 sps:$4 sm:$0xff]  }
 0x6d0   : > { %v1373_v19 = vpop.f32.mrf.mxu1 }
 0x6d1   : > { %v3200_v19 = vld [vmem:[%s4103_s14 + $0x64] ss:$12 sps:$4 sm:$0xff]  }
 0x6d2   : > { %v2987_v20 = vpop.f32.mrf.mxu1 }
 0x6d3   : > { %v3198_v20 = vld [vmem:[%s4103_s14 + $0x60] ss:$12 sps:$4 sm:$0xff]  }
 0x745   : > { %v1509_v21 = vpop.xlane.xlu0 %1508 }
 0x746   : > { %v1510_v22 = vsub.f32 %v1501_v7, %v1509_v21  ;;  %v3193_v7 = vld [vmem:[%s4103_s14 + $0x98] ss:$12 sps:$4 sm:$0xff]   ;;  %v3201_v21 = vld [vmem:[%s4103_s14 + $0x68] ss:$12 sps:$4 sm:$0xff]  }
 0x748   : > { %v1511_v23 = vmul.f32 1.442695, %v1510_v22  ;;  %v3204_v22 = vld [vmem:[%s4103_s14 + $0x4c] ss:$12 sps:$4 sm:$0xff]  }
 0x74a   : > { %3282 = vpow2.f32 %v1511_v23  ;;  %v3202_v23 = vld [vmem:[%s4103_s14 + $0x48] ss:$12 sps:$4 sm:$0xff]  }
 0x757   : > { %v3283_v24 = vpop.eup %3282  ;;  %v1378_v25 = vpop.xlane.xlu1 %1377 }
 0x758   : > { %v1379_v26 = vsub.f32 %v1370_v16, %v1378_v25  ;;  %v1513_v27 = vsel %vm1120_vm2, %v3283_v24, 0.0  ;;  %v3208_v25 = vld [vmem:[%s4103_s14 + $0x34] ss:$12 sps:$4 sm:$0xff]  }
 0x759   : > { %1514 = vadd.xlane.f32.xlu1 %v1513_v27  ;;  %v3206_v27 = vld [vmem:[%s4103_s14 + $0x30] ss:$12 sps:$4 sm:$0xff]  }
 0x75a   : > { %v1380_v28 = vmul.f32 1.442695, %v1379_v26  ;;  %v3392_v26 = vmov 0  }
 0x75c   : > { %3284 = vpow2.f32 %v1380_v28  ;;  %v3209_v28 = vld [vmem:[%s4103_s14 + $0x38] ss:$12 sps:$4 sm:$0xff]  }
 0x769   : > { %v3285_v30 = vpop.eup %3284 }
 0x76a   : > { %1524 = vrot.lane.b32.xlu1 %v3176_v29, %s3391_s21  ;;  %v1382_v31 = vsel %vm1120_vm2, %v3285_v30, 0.0  ;;  %v3212_v29 = vld [vmem:[%s4103_s14 + $0x1c] ss:$12 sps:$4 sm:$0xff]  }
 0x76b   : > { %1383 = vadd.xlane.f32.xlu0 %v1382_v31  ;;  %v3213_v31 = vld [vmem:[%s4103_s14 + $0x20] ss:$12 sps:$4 sm:$0xff]  }
 0x76e   : > { %1312 = vrot.lane.b32.xlu1 %v2786_v32, %s3391_s21  ;;  %v3216_v32 = vld [vmem:[%s4103_s14 + $0x4] ss:$12 sps:$4 sm:$0xff]  }
 0x781   : > { %1393 = vrot.lane.b32.xlu0 %v3177_v33, %s3390_s0  ;;  %v3214_v33 = vld [vmem:[%s4103_s14] ss:$12 sps:$4 sm:$0xff]  }
 0x7e2   : > { %v1515_v34 = vpop.xlane.xlu1 %1514 }
 0x7e6   : > { %v1525_v35 = vpop.permute.xlu1 %1524 }
 0x7ea   : > { %v1313_v36 = vpop.permute.xlu1 %1312 }
 0x7eb   : > { %1316 = vst.msk [vmem:[#allocation4] sm:$0xf] %vm1315_vm4, %v1313_v36 }
 0x7f4   : > { %v1384_v37 = vpop.xlane.xlu0 %1383 }
 0x7f5   : > { %3286 = vrcp.f32 %v1384_v37 }
 0x7f6   : > { %3288 = vrcp.f32 %v1515_v34  ;;  %v3217_v34 = vld [vmem:[%s4103_s14 + $0x8] ss:$12 sps:$4 sm:$0xff]  }
 0x7f8   : > { %v1394_v38 = vpop.permute.xlu0 %1393 }
 0x7f9   : > { %2989 = vmatpush3.bf16.msra.mxu1 %v1394_v38 }
 0x7fa   : > { %3000 = vmatprep.subr.bf16.mxu1 %v3385_v1 }
 0x802   : > { %v3287_v39 = vpop.eup %3286 }
 0x803   : > { %v1386_v40 = vmul.f32 %v3287_v39, %v3285_v30  ;;  %v3289_v42 = vpop.eup %3288  ;;  %v3210_v30 = vld [vmem:[%s4103_s14 + $0x18] ss:$12 sps:$4 sm:$0xff]  }
 0x804   : > { %v1517_v43 = vmul.f32 %v3289_v42, %v3283_v24  ;;  %v3205_v24 = vld [vmem:[%s4103_s14 + $0x50] ss:$12 sps:$4 sm:$0xff]  }
 0x805   : > { %v1387_v41 = vpack.c.bf16 %v1386_v40, %v1386_v40  ;;  %v2701_v40 = vld [vmem:[%s4102_s13] ss:$0 sm:$0xff] }
 0x806   : > { %v1518_v44 = vpack.c.bf16 %v1517_v43, %v1517_v43  ;;  %v3218_v43 = vld [vmem:[%s4104_s15 + $0xa8] ss:$12 sps:$4 sm:$0xff]  }
 0x807   : > { %2991 = vmatmul.mubr.msk.bf16.vlgmr.msra.gmra.mxu1 %vm1120_vm2, %v1387_v41 }
 0x808   : > { %3001 = vmatpush3.bf16.msra.mxu1 %v1525_v35  ;;  %3002 = vmatprep.mubr.msk.bf16.mxu1 %vm3386_vm0, %v3385_v1  ;;  %v3220_v35 = vld [vmem:[%s4104_s15 + $0xac] ss:$12 sps:$4 sm:$0xff]  }
 0x809   : > { %1861 = vmatprep.subr.bf16.mxu1 %v3188_v4  ;;  %v3250_v4 = vld [vmem:[%s4105_s16 + $0x78] sm:$0xff]  }
 0x80f   : > { %3003 = vmatmul.mubr.msk.bf16.vlgmr.msra.gmra.mxu1 %vm1120_vm2, %v1518_v44  ;;  %v3221_v44 = vld [vmem:[%s4104_s15 + $0xb0] ss:$12 sps:$4 sm:$0xff]  }
 0x810   : > { %1862 = vmatpush1.bf16.msra.mxu1 %v3186_v3  ;;  %1893 = vmatprep.mubr.bf16.mxu1 %v3392_v26  ;;  %v3249_v3 = vld [vmem:[%s4104_s15 + $0x8] ss:$12 sps:$4 sm:$0xff]  }
 0x811   : > { %1863 = vmatprep.subr.bf16.mxu1 %v3192_v6  ;;  %v3252_v6 = vld [vmem:[%s4105_s16 + $0x70] sm:$0xff]  }
 0x814   : > { %1864 = vmatpush1.bf16.msra.mxu1 %v3190_v8  ;;  %v3393_v8 = vmov 65535  }
 0x815   : > { %1865 = vmatprep.subr.bf16.mxu1 %v3196_v9  ;;  %v2388_v9 = vsel %vm2386_vm7, 4294967295, %v3393_v8 }
 0x818   : > { %1866 = vmatpush1.bf16.msra.mxu1 %v3194_v10  ;;  %v3253_v10 = vld [vmem:[%s4105_s16 + $0x30] sm:$0xff]  }
 0x819   : > { %1867 = vmatprep.subr.bf16.mxu1 %v3200_v19  ;;  %v3260_v19 = vld [vmem:[%s4105_s16 + $0x98] sm:$0xff]  }
 0x81c   : > { %1868 = vmatpush1.bf16.msra.mxu1 %v3198_v20  ;;  %v3261_v20 = vld [vmem:[%s4105_s16 + $0x58] sm:$0xff]  }
 0x81d   : > { %1869 = vmatprep.subr.bf16.mxu1 %v3204_v22  ;;  %v3263_v22 = vld [vmem:[%s4105_s16 + $0x90] sm:$0xff]  }
 0x820   : > { %1870 = vmatpush1.bf16.msra.mxu1 %v3202_v23  ;;  %v3264_v23 = vld [vmem:[%s4105_s16 + $0x50] sm:$0xff]  }
 0x821   : > { %1871 = vmatprep.subr.bf16.mxu1 %v3208_v25  ;;  %v3266_v25 = vld [vmem:[%s4105_s16 + $0x88] sm:$0xff]  }
 0x824   : > { %1872 = vmatpush1.bf16.msra.mxu1 %v3206_v27  ;;  %v3268_v27 = vld [vmem:[%s4105_s16 + $0x8] sm:$0xff]  }
 0x825   : > { %1873 = vmatprep.subr.bf16.mxu1 %v3212_v29  ;;  %v3270_v29 = vld [vmem:[%s4105_s16 + $0x40] sm:$0xff]  }
 0x828   : > { %1874 = vmatpush1.bf16.msra.mxu1 %v3210_v30  ;;  %v3271_v30 = vld [vmem:[%s4105_s16] sm:$0xff]  }
 0x829   : > { %1875 = vmatprep.subr.bf16.mxu1 %v3216_v32 }
 0x82c   : > { %1876 = vmatpush1.bf16.msra.mxu1 %v3214_v33 }
 0x82d   : > { %2102 = vmatprep.subr.bf16.mxu1 %v3220_v35 }
 0x8c7   : > { %v1433_v52 = vpop.f32.mrf.mxu1 }
 0x8c8   : > { %v2787_v54 = vpack.c.bf16 %v1433_v52, %v1433_v52  ;;  %v3232_v52 = vld [vmem:[%s4104_s15 + $0x64] ss:$12 sps:$4 sm:$0xff]  }
 0x8c9   : > { %v2992_v55 = vpop.f32.mrf.mxu1 }
 0x8ca   : > { %1443 = vrot.lane.b32.xlu0 %v2787_v54, %s3390_s0  ;;  %v3233_v54 = vld [vmem:[%s4104_s15 + $0x68] ss:$12 sps:$4 sm:$0xff]   ;;  %v3236_v55 = vld [vmem:[%s4104_s15 + $0x4c] ss:$12 sps:$4 sm:$0xff]   ;;  %s640_s0 = sand.u32 1, %s3367_s28  }
 0x8cb   : > { %v1436_v56 = vpop.f32.mrf.mxu1  ;;  %s2641_s19 = sshll.u32 %s640_s0, 3  ;;  %s2491_s20 = scalar_lea.sflag [#allocation6], %s640_s0 }
 0x8cc   : > { %v3234_v56 = vld [vmem:[%s4104_s15 + $0x48] ss:$12 sps:$4 sm:$0xff]   ;;  %s642_s21 = scalar_lea.vmem [#allocation5], %s2641_s19 }
 0x8cd   : > { %v2993_v57 = vpop.f32.mrf.mxu1  ;;  %s2505_s22 = sshll.u32 %s642_s21, 4  ;;  %s2506_s22 = int_to_ptr.vmem [resolvable:$true] %s2505_s22 }
 0x8ce   : > { %v3237_v57 = vld [vmem:[%s4104_s15 + $0x50] ss:$12 sps:$4 sm:$0xff]   ;;  %s3307_s3 = scalar_lea.vmem %s2506_s22, 128  ;;  %p3314_p1 = scmp.lt.s32.totalorder %s2506_s22, %s3312_s24 }
 0x8cf   : > { %v1564_v58 = vpop.f32.mrf.mxu1  ;;  %p3308_p12 = scmp.ne.s32.totalorder %s2506_s22, %s3307_s3 }
 0x8d0   : > { %v2788_v59 = vpack.c.bf16 %v1564_v58, %v1564_v58  ;;  %v3240_v58 = vld [vmem:[%s4104_s15 + $0x34] ss:$12 sps:$4 sm:$0xff]  }
 0x8d1   : > { %v3004_v60 = vpop.f32.mrf.mxu1  ;;  %p3309_p13 = pnand %p3308_p12, %p3530_p4 }
 0x8d2   : > { %1574 = vrot.lane.b32.xlu1 %v2788_v59, %s3389_s1  ;;  %v3238_v59 = vld [vmem:[%s4104_s15 + $0x30] ss:$12 sps:$4 sm:$0xff]   ;;  %v3241_v60 = vld [vmem:[%s4104_s15 + $0x38] ss:$12 sps:$4 sm:$0xff]   ;;  %s2778_s1 = sshll.u32 %s3375_s30, 7  ;;  %s3313_s30 = scalar_lea.vmem %s3312_s24, 256 }
 0x8d3   : > { %v1567_v61 = vpop.f32.mrf.mxu1  ;;  %s2503_s18 = scalar_lea.hbm %s4136_s27, %s2778_s1  ;;  %p3310_p0 = pneg %p3309_p13 }
 0x8d4   : > { %v3244_v61 = vld [vmem:[%s4104_s15 + $0x1c] ss:$12 sps:$4 sm:$0xff]   ;;  %p3315_p2 = scmp.lt.s32.totalorder %s3313_s30, %s3307_s3 }
 0x8d5   : > { %v3005_v62 = vpop.f32.mrf.mxu1 }
 0x8d6   : > { %v3242_v62 = vld [vmem:[%s4104_s15 + $0x18] ss:$12 sps:$4 sm:$0xff]   ;;  %p3316_p3 = por %p3315_p2, %p3314_p1 }
 0x8d8   : > { %p3317_p5 = pnand %p3316_p3, %p3310_p0 }
 0x93c   : > { %v1444_v63 = vpop.permute.xlu0 %1443 }
 0x93d   : > { %1447 = vst.msk [vmem:[#allocation4] sm:$0xf] %vm1446_vm5, %v1444_v63  ;;  %v3245_v63 = vld [vmem:[%s4104_s15 + $0x20] ss:$12 sps:$4 sm:$0xff]  }
 0x944   : > { %v1575_v0 = vpop.permute.xlu1 %1574 }
 0x945   : > { %1578 = vst.msk [vmem:[#allocation4] sm:$0xf] %vm1577_vm6, %v1575_v0  ;;  %v3248_v0 = vld [vmem:[%s4104_s15 + $0x4] ss:$12 sps:$4 sm:$0xff]  }
 0x94c   : > { %v1579_v2 = vld [vmem:[#allocation4] sm:$0xf] }
 0x94d   : > { %3023 = vmatmul.mubr.bf16.vlgmr.msra.gmra.mxu0 %v1579_v2  ;;  %v3246_v2 = vld [vmem:[%s4104_s15] ss:$12 sps:$4 sm:$0xff]  }
 0x94e   : > { %3042 = vmatprep.mubr.msk.bf16.mxu0 %vm3386_vm0, %v3385_v1  ;;  %3027 = vmatpush3.bf16.msra.mxu0 %v3189_v5  ;;  %v3251_v5 = vld [vmem:[%s4105_s16 + $0x38] sm:$0xff]  }
 0x94f   : > { %3028 = vmatprep.subr.bf16.mxu0 %v3385_v1 }
 0x952   : > { %3029 = vmatpush3.bf16.msra.mxu0 %v3193_v7  ;;  %v3254_v7 = vld [vmem:[%s4105_s16 + $0xa8] ss:$0 sps:$4 sm:$0x77]  }
 0x953   : > { %3030 = vmatprep.subr.bf16.mxu0 %v3385_v1 }
 0x956   : > { %3031 = vmatpush3.bf16.msra.mxu0 %v3197_v18  ;;  %v3259_v18 = vld [vmem:[%s4105_s16 + $0x20] sm:$0xff]  }
 0x957   : > { %3032 = vmatprep.subr.bf16.mxu0 %v3385_v1 }
 0x95a   : > { %3033 = vmatpush3.bf16.msra.mxu0 %v3201_v21  ;;  %v3262_v21 = vld [vmem:[%s4105_s16 + $0x18] sm:$0xff]  }
 0x95b   : > { %3034 = vmatprep.subr.bf16.mxu0 %v3385_v1 }
 0x95e   : > { %3035 = vmatpush3.bf16.msra.mxu0 %v3205_v24  ;;  %v3265_v24 = vld [vmem:[%s4105_s16 + $0x10] sm:$0xff]  }
 0x95f   : > { %3036 = vmatprep.subr.bf16.mxu0 %v3385_v1 }
 0x962   : > { %3037 = vmatpush3.bf16.msra.mxu0 %v3209_v28  ;;  %v3269_v28 = vld [vmem:[%s4105_s16 + $0x80] sm:$0xff]  }
 0x963   : > { %3038 = vmatprep.subr.bf16.mxu0 %v3385_v1 }
 0x966   : > { %3039 = vmatpush3.bf16.msra.mxu0 %v3213_v31 }
 0x967   : > { %3040 = vmatprep.subr.bf16.mxu0 %v3385_v1 }
 0x96a   : > { %3041 = vmatpush3.bf16.msra.mxu0 %v3217_v34 }
 0x96b   : > { %3046 = vmatprep.subr.bf16.mxu0 %v3385_v1 }
 0xa0d   : > { %v1678_v11 = vpop.f32.mrf.mxu0 }
 0xa0e   : > { %v3829_v13 = vadd.f32 %v3306_v12, %v1678_v11  ;;  %v2389_v11 = vsel %vm2387_vm8, %v2388_v9, 0 }
 0xa0f   : > { %v3024_v14 = vpop.f32.mrf.mxu0  ;;  %v2391_v12 = vand.u32 %v3254_v7, %v2389_v11 }
 0xa10   : > { %v1686_v15 = vmul.f32 %v3829_v13, %v3829_v13  ;;  %v3255_v14 = vld [vmem:[%s4105_s16 + $0x68] sm:$0xff]  }
 0xa11   : > { %v1681_v16 = vpop.f32.mrf.mxu0 }
 0xa12   : > { %1687 = vadd.xlane.f32.xlu0 %v1686_v15  ;;  %v3256_v15 = vld [vmem:[%s4105_s16 + $0x28] sm:$0xff]   ;;  %v3257_v16 = vld [vmem:[%s4105_s16 + $0xa0] sm:$0xff]  }
 0xa13   : > { %v3025_v17 = vpop.f32.mrf.mxu0 }
 0xa14   : > { %v3258_v17 = vld [vmem:[%s4105_s16 + $0x60] sm:$0xff]  }
 0xa9b   : > { %v1688_v36 = vpop.xlane.xlu0 %1687 }
 0xa9c   : > { %v1689_v37 = vmul.f32 0.0078125, %v1688_v36 }
 0xa9e   : > { %v1690_v38 = vadd.f32 1.1920929e-07, %v1689_v37 }
 0xaa0   : > { %3290 = vrsqrt.f32 %v1690_v38 }
 0xaad   : > { %v3291_v39 = vpop.eup %3290 }
 0xaae   : > { %v1692_v41 = vmul.f32 %v3291_v39, %v3829_v13 }
 0xab0   : > { %v1699_v42 = vmul.f32 %v2701_v40, %v1692_v41 }
 0xab2   : > { %v1700_v45 = vpack.c.bf16 %v1699_v42, %v1699_v42 }
 0xab4   : > { %1894 = vmatmul.mubr.bf16.vlgmr.msra.gmra.mxu1 %v1700_v45  ;;  %3043 = vmatmul.mubr.bf16.vlgmr.msra.gmra.mxu0 %v1700_v45 }
 0xab5   : > { %2103 = vmatpush1.bf16.msra.mxu1 %v3218_v43  ;;  %3047 = vmatpush3.bf16.msra.mxu0 %v3221_v44 }
 0xab6   : > { %2104 = vmatprep.subr.bf16.mxu1 %v3224_v46  ;;  %3048 = vmatprep.subr.bf16.mxu0 %v3385_v1 }
 0xab7   : > { %2134 = vmatprep.mubr.bf16.mxu1 %v3392_v26  ;;  %3062 = vmatprep.mubr.msk.bf16.mxu0 %vm3386_vm0, %v3385_v1  ;;  %v3267_v26 = vld [vmem:[%s4105_s16 + $0x48] sm:$0xff]  }
 0xab9   : > { %2105 = vmatpush1.bf16.msra.mxu1 %v3222_v47  ;;  %3049 = vmatpush3.bf16.msra.mxu0 %v3225_v48 }
 0xaba   : > { %2106 = vmatprep.subr.bf16.mxu1 %v3228_v49  ;;  %3050 = vmatprep.subr.bf16.mxu0 %v3385_v1 }
 0xabd   : > { %2107 = vmatpush1.bf16.msra.mxu1 %v3226_v50  ;;  %3051 = vmatpush3.bf16.msra.mxu0 %v3229_v51 }
 0xabe   : > { %2108 = vmatprep.subr.bf16.mxu1 %v3232_v52  ;;  %3052 = vmatprep.subr.bf16.mxu0 %v3385_v1 }
 0xac1   : > { %2109 = vmatpush1.bf16.msra.mxu1 %v3230_v53  ;;  %3053 = vmatpush3.bf16.msra.mxu0 %v3233_v54 }
 0xac2   : > { %2110 = vmatprep.subr.bf16.mxu1 %v3236_v55  ;;  %3054 = vmatprep.subr.bf16.mxu0 %v3385_v1 }
 0xac5   : > { %2111 = vmatpush1.bf16.msra.mxu1 %v3234_v56  ;;  %3055 = vmatpush3.bf16.msra.mxu0 %v3237_v57 }
 0xac6   : > { %2112 = vmatprep.subr.bf16.mxu1 %v3240_v58  ;;  %3056 = vmatprep.subr.bf16.mxu0 %v3385_v1 }
 0xac9   : > { %2113 = vmatpush1.bf16.msra.mxu1 %v3238_v59  ;;  %3057 = vmatpush3.bf16.msra.mxu0 %v3241_v60 }
 0xaca   : > { %2114 = vmatprep.subr.bf16.mxu1 %v3244_v61  ;;  %3058 = vmatprep.subr.bf16.mxu0 %v3385_v1 }
 0xacd   : > { %2115 = vmatpush1.bf16.msra.mxu1 %v3242_v62  ;;  %3059 = vmatpush3.bf16.msra.mxu0 %v3245_v63 }
 0xace   : > { %2116 = vmatprep.subr.bf16.mxu1 %v3248_v0  ;;  %3060 = vmatprep.subr.bf16.mxu0 %v3385_v1 }
 0xad1   : > { %2117 = vmatpush1.bf16.msra.mxu1 %v3246_v2  ;;  %3061 = vmatpush3.bf16.msra.mxu0 %v3249_v3 }
 0xad2   : > { %3066 = vmatprep.subr.bf16.mxu0 %v3385_v1  ;;  %2869 = vmatprep.subr.bf16.mxu1 %v3250_v4 }
 0xad4   : > { %2135 = vmatmul.mubr.bf16.vlgmr.msra.gmra.mxu1 %v1700_v45  ;;  %3063 = vmatmul.mubr.bf16.vlgmr.msra.gmra.mxu0 %v1700_v45 }
 0xad5   : > { %3078 = vmatprep.mubr.msk.bf16.mxu0 %vm3386_vm0, %v3385_v1  ;;  %2870 = vmatpush3.bf16.msra.mxu1 %v3251_v5 }
 0xad6   : > { %2871 = vmatprep.subr.bf16.mxu1 %v3252_v6  ;;  %3067 = vmatpush3.bf16.msra.mxu0 %v2391_v12 }
 0xad7   : > { %3068 = vmatprep.subr.bf16.mxu0 %v3385_v1 }
 0xad9   : > { %2872 = vmatpush3.bf16.msra.mxu1 %v3253_v10 }
 0xada   : > { %2873 = vmatprep.subr.bf16.mxu1 %v3255_v14  ;;  %3069 = vmatpush3.bf16.msra.mxu0 %v3257_v16 }
 0xadb   : > { %3070 = vmatprep.subr.bf16.mxu0 %v3385_v1 }
 0xadd   : > { %2874 = vmatpush3.bf16.msra.mxu1 %v3256_v15 }
 0xade   : > { %2875 = vmatprep.subr.bf16.mxu1 %v3258_v17  ;;  %3071 = vmatpush3.bf16.msra.mxu0 %v3260_v19 }
 0xadf   : > { %3072 = vmatprep.subr.bf16.mxu0 %v3385_v1 }
 0xae1   : > { %2876 = vmatpush3.bf16.msra.mxu1 %v3259_v18 }
 0xae2   : > { %2877 = vmatprep.subr.bf16.mxu1 %v3261_v20  ;;  %3073 = vmatpush3.bf16.msra.mxu0 %v3263_v22 }
 0xae3   : > { %3074 = vmatprep.subr.bf16.mxu0 %v3385_v1 }
 0xae5   : > { %2878 = vmatpush3.bf16.msra.mxu1 %v3262_v21  ;;  %v2776_v21 = vld [vmem:[%s4106_s17] ss:$0 sm:$0xff] }
 0xae6   : > { %2879 = vmatprep.subr.bf16.mxu1 %v3264_v23  ;;  %3075 = vmatpush3.bf16.msra.mxu0 %v3266_v25 }
 0xae7   : > { %3076 = vmatprep.subr.bf16.mxu0 %v3385_v1 }
 0xae9   : > { %2880 = vmatpush3.bf16.msra.mxu1 %v3265_v24 }
 0xaea   : > { %2881 = vmatprep.subr.bf16.mxu1 %v3267_v26  ;;  %3077 = vmatpush3.bf16.msra.mxu0 %v3269_v28 }
 0xaed   : > { %2882 = vmatpush3.bf16.msra.mxu1 %v3268_v27 }
 0xaee   : > { %2883 = vmatprep.subr.bf16.mxu1 %v3270_v29 }
 0xaf1   : > { %2884 = vmatpush3.bf16.msra.mxu1 %v3271_v30 }
 0xb74   : > { %v1895_v31 = vpop.f32.mrf.mxu1  ;;  %v1936_v32 = vpop.f32.mrf.mxu0 }
 0xb75   : > { %v2750_v1 = vmul.f32 -1.442695, %v1895_v31  ;;  %v2752_v33 = vmul.f32 -1.442695, %v1936_v32 }
 0xb76   : > { %v1897_v34 = vpop.f32.mrf.mxu1  ;;  %v3044_v35 = vpop.f32.mrf.mxu0 }
 0xb77   : > { %3292 = vpow2.f32 %v2750_v1  ;;  %v2751_v36 = vmul.f32 -1.442695, %v1897_v34 }
 0xb78   : > { %3294 = vpow2.f32 %v2752_v33  ;;  %v1899_v37 = vpop.f32.mrf.mxu1  ;;  %v1939_v38 = vpop.f32.mrf.mxu0 }
 0xb79   : > { %3296 = vpow2.f32 %v2751_v36 }
 0xb7a   : > { %v1900_v39 = vpop.f32.mrf.mxu1  ;;  %v3045_v40 = vpop.f32.mrf.mxu0 }
 0xb84   : > { %v3293_v41 = vpop.eup %3292 }
 0xb85   : > { %v3295_v42 = vpop.eup %3294  ;;  %v2192_v43 = vadd.f32 1.0, %v3293_v41 }
 0xb86   : > { %v3297_v44 = vpop.eup %3296  ;;  %v2194_v45 = vadd.f32 1.0, %v3295_v42 }
 0xb87   : > { %3298 = vrcp.f32 %v2192_v43  ;;  %v2193_v46 = vadd.f32 1.0, %v3297_v44 }
 0xb88   : > { %3300 = vrcp.f32 %v2194_v45 }
 0xb89   : > { %3302 = vrcp.f32 %v2193_v46 }
 0xb94   : > { %v3299_v47 = vpop.eup %3298  ;;  %v2136_v48 = vpop.f32.mrf.mxu1 }
 0xb95   : > { %v2177_v49 = vpop.f32.mrf.mxu0  ;;  %v3301_v50 = vpop.eup %3300  ;;  %v2201_v51 = vmul.f32 %v3299_v47, %v1895_v31 }
 0xb96   : > { %v3303_v52 = vpop.eup %3302  ;;  %v2203_v53 = vmul.f32 %v3301_v50, %v1936_v32  ;;  %v2138_v54 = vpop.f32.mrf.mxu1 }
 0xb97   : > { %v3064_v55 = vpop.f32.mrf.mxu0  ;;  %v2202_v56 = vmul.f32 %v3303_v52, %v1897_v34  ;;  %v2204_v57 = vmul.f32 %v2201_v51, %v2136_v48 }
 0xb98   : > { %v2206_v58 = vmul.f32 %v2203_v53, %v2177_v49  ;;  %v2140_v59 = vpop.f32.mrf.mxu1 }
 0xb99   : > { %v2180_v60 = vpop.f32.mrf.mxu0  ;;  %v2205_v61 = vmul.f32 %v2202_v56, %v2138_v54  ;;  %v2207_v3 = vpack.c.bf16 %v2204_v57, %v2204_v57 }
 0xb9a   : > { %v2209_v62 = vpack.c.bf16 %v2206_v58, %v2206_v58  ;;  %v2141_v63 = vpop.f32.mrf.mxu1 }
 0xb9b   : > { %v3065_v0 = vpop.f32.mrf.mxu0  ;;  %v2208_v2 = vpack.c.bf16 %v2205_v61, %v2205_v61 }
 0xb9c   : > { %3079 = vmatmul.mubr.msk.bf16.vlgmr.msra.gmra.mxu0 %vm2382_vm9, %v2209_v62 }
 0xb9d   : > { %2425 = vmatprep.mubr.bf16.mxu1 %v2208_v2 }
 0xb9e   : > { %2426 = vmatmul.mubr.bf16.vlgmr.msra.gmra.mxu1 %v2207_v3 }
 0xc5c   : > { %v2467_v4 = vpop.f32.mrf.mxu0 }
 0xc5e   : > { %v3080_v5 = vpop.f32.mrf.mxu0  ;;  %v2885_v6 = vpop.f32.mrf.mxu1 }
 0xc60   : > { %v2470_v7 = vpop.f32.mrf.mxu0  ;;  %v2886_v8 = vpop.f32.mrf.mxu1 }
 0xc61   : > { %v2887_v9 = vadd.f32 %v2886_v8, %v2885_v6 }
 0xc62   : > { %v3081_v10 = vpop.f32.mrf.mxu0  ;;  %v2888_v11 = vpop.f32.mrf.mxu1 }
 0xc63   : > { %v2468_v12 = vadd.f32 %v2887_v9, %v2467_v4 }
 0xc64   : > { %v2889_v14 = vpop.f32.mrf.mxu1 }
 0xc65   : > { %v2473_v15 = vadd.f32 %v2468_v12, %v3829_v13 }
 0xc67   : > { %v2475_v16 = vmul.f32 %v2473_v15, %v2473_v15 }
 0xc69   : > { %2476 = vadd.xlane.f32.xlu1 %v2475_v16 }
 0xcf2   : > { %v2477_v17 = vpop.xlane.xlu1 %2476 }
 0xcf3   : > { %v2478_v18 = vmul.f32 0.0078125, %v2477_v17 }
 0xcf5   : > { %v2479_v19 = vadd.f32 1.1920929e-07, %v2478_v18 }
 0xcf7   : > { %3304 = vrsqrt.f32 %v2479_v19 }
 0xd04   : > { %v3305_v20 = vpop.eup %3304 }
 0xd05   : > { %v2481_v22 = vmul.f32 %v3305_v20, %v2473_v15 }
 0xd07   : > { %v2488_v23 = vmul.f32 %v2776_v21, %v2481_v22 }
 0xd09   : > { %2489 = vst [vmem:[%s642_s21] sm:$0xff] %v2488_v23 }
 0xd0a   : > { %3320 = shalt.err (!%p3317_p5)
}
 0xd0b   : > { %s3321_s19 = scalar_lea.hbm %s2503_s18, 128  ;;  %s3325_s1 = scalar_lea.hbm %s4137_s26, 256 }
 0xd0c   : > { %p3322_p6 = scmp.ne.s32.totalorder %s2503_s18, %s3321_s19  ;;  %p3326_p10 = scmp.lt.s32.totalorder %s2503_s18, %s4137_s26 }
 0xd0d   : > { %p3327_p11 = scmp.lt.s32.totalorder %s3325_s1, %s3321_s19 }
 0xd0e   : > { %p3323_p7 = pnand %p3322_p6, %p3530_p4 }
 0xd0f   : > { %p3328_p12 = por %p3327_p11, %p3326_p10 }
 0xd10   : > { %p3324_p9 = pneg %p3323_p7 }
 0xd12   : > { %p3329_p13 = pnand %p3328_p12, %p3324_p9 }
 0xd14   : > { %3332 = shalt.err (!%p3329_p13)
}
 0xd15   : > { %3082 = dma.vmem_to_hbm [thread:$0]  (%p3530_p4), %s2506_s22, 128, %s2503_s18, %s2491_s20  }
 0xd16 PF: > { %s4138_s3 = sld [smem:[#allocation11_spill]] }
 0xd17   : > { %s4139_s4 = sld [smem:[#allocation8_spill]] }
 0xd1c   : > { %p3088_p0 = scmp.ge.s32.totalorder %s4138_s3, 2 }
 0xd1d   : > { %s2517_s27 = sand.u32 1, %s4139_s4  }
 0xd1e   : > { %p3085_p1 = pnand %p3088_p0, %p3537_p8  ;;  %s2518_s24 = scalar_lea.sflag [#allocation6], %s2517_s27 }
 0xd20   : > { %p3086_p2 = pneg %p3085_p1 }
 0xd22   : > { %3358 = dma.done.wait (%p3086_p2), %s2518_s24, 128  }
 0xd23   : > { %3360 = vsyncadd (%p3086_p2), %s2518_s24, 4294967168  ;;  %s31_s19 = sadd.s32 1, %s4138_s3   ;;  %s4141_s30 = sld [smem:[#allocation9_spill]] }
 0xd24   : > { %p28_p3 = scmp.ge.s32.totalorder %s31_s19, 4   ;;  %s4142_s29 = sld [smem:[#allocation14_spill]] }
 0xd25   : > { %s4143_s2 = sld [smem:[#allocation10_spill]]  ;;  %s4145_s27 = smov %s3367_s28 }
 0xd26   : > { %s4144_s0 = sld [smem:[#allocation12_spill]] }
 0xd27   :  { %30 = sbr.rel (!%p28_p3) target bundleno = 11 (0xb), region = 143 }
 0xd29   : > { %s4146_s28 = smov %s4141_s30 }
 0xd2b   : > { %s4147_s30 = smov %s4143_s2 }
 0xd2c   :  { %2523 = vsyncpa [#allocation6], 1 }
 0xd2d   :  { %2525 = vsyncpa [#allocation6 + $0x1], 1 }

</bundles_post_ra>
